<compile_context>
chip_gen: v6e
topology: v6e:2x2x1
jax: 0.10.0
libtpu: 0.0.40
codegen_flags: <defaults>
</compile_context>

<pallas_src>
import functools

import jax
import jax.numpy as jnp
from jax.experimental import pallas as pl
from jax.experimental.pallas import tpu as pltpu

PAD_IDX = 0                        # dictionary.word2idx['<pad>']
_VMEM_LIMIT = 48 * 1024 * 1024     # safe on v7x (64 MiB/TC) and >> v5e's 16 MiB default


# ----------------------------------------------------------------------------
# tiling helpers
# ----------------------------------------------------------------------------
def _time_block(S, target=8):
    """Largest divisor of S that is <= target (steps per grid iteration)."""
    for t in range(min(target, S), 0, -1):
        if S % t == 0:
            return t
    return 1


def _row_tile(rows, target=512):
    """Row tile for the input projection (multiple of 32 for bf16 outputs)."""
    if rows <= target:
        return rows
    for t in range(target, 31, -32):
        if rows % t == 0:
            return t
    return rows


def _batch_tile(B, target=32):
    """Batch tile for attention / combine (multiple of 8, or the full batch)."""
    if B <= target:
        return B
    for t in range(target, 7, -8):
        if B % t == 0:
            return t
    return B


def _batch_split(B, max_parallel=2):
    """(tile, num_blocks) for the recurrent kernel's parallel batch axis (v7x)."""
    if B % max_parallel == 0 and (B // max_parallel) % 16 == 0:
        return B // max_parallel, max_parallel
    return B, 1


# ----------------------------------------------------------------------------
# GRU input projection (hoisted out of the recurrence): one fused (IN, 6H)
# bf16 matmul per layer covering all steps, the full batch and BOTH directions.
# ----------------------------------------------------------------------------
def _inproj1_kernel(x_ref, w_ref, b_ref, gif_ref, gib_ref, *, h3):
    x = x_ref[...].astype(w_ref.dtype)
    gi = jnp.dot(x, w_ref[...], preferred_element_type=jnp.float32) + b_ref[...]
    gif_ref[...] = gi[:, :h3].astype(gif_ref.dtype)
    gib_ref[...] = gi[:, h3:].astype(gib_ref.dtype)


def _inproj2_kernel(xf_ref, xb_ref, wt_ref, wb_ref, b_ref, gif_ref, gib_ref, *, h3):
    # Layers >= 1: previous layer's fwd/bwd streams are consumed separately
    # (K-split contraction) -- no concat([out_f, out_b]) HBM round trip.
    acc = jnp.dot(xf_ref[...].astype(wt_ref.dtype), wt_ref[...],
                  preferred_element_type=jnp.float32)
    acc = acc + jnp.dot(xb_ref[...].astype(wb_ref.dtype), wb_ref[...],
                        preferred_element_type=jnp.float32)
    gi = acc + b_ref[...]
    gif_ref[...] = gi[:, :h3].astype(gif_ref.dtype)
    gib_ref[...] = gi[:, h3:].astype(gib_ref.dtype)


def gru_input_projection_single(x, wih_f, bih_f, wih_b, bih_b):
    """x: (S, B, IN) -> (gi_fwd, gi_bwd), each (S, B, 3H) bf16."""
    S, B, IN = x.shape
    H3 = wih_f.shape[0]
    rows = S * B
    x2 = x.reshape(rows, IN)
    w6 = jnp.concatenate([wih_f.T, wih_b.T], axis=1).astype(jnp.bfloat16)   # (IN, 6H)
    b6 = jnp.concatenate([bih_f, bih_b]).reshape(1, 2 * H3).astype(jnp.float32)
    rt = _row_tile(rows)
    gif, gib = pl.pallas_call(
        functools.partial(_inproj1_kernel, h3=H3),
        out_shape=(jax.ShapeDtypeStruct((rows, H3), jnp.bfloat16),
                   jax.ShapeDtypeStruct((rows, H3), jnp.bfloat16)),
        grid_spec=pltpu.PrefetchScalarGridSpec(
            num_scalar_prefetch=0,
            grid=(rows // rt,),
            in_specs=[pl.BlockSpec((rt, IN), lambda r: (r, 0)),
                      pl.BlockSpec((IN, 2 * H3), lambda r: (0, 0)),
                      pl.BlockSpec((1, 2 * H3), lambda r: (0, 0))],
            out_specs=(pl.BlockSpec((rt, H3), lambda r: (r, 0)),
                       pl.BlockSpec((rt, H3), lambda r: (r, 0)))),
        compiler_params=pltpu.CompilerParams(
            dimension_semantics=("parallel",),
            vmem_limit_bytes=_VMEM_LIMIT),
    )(x2, w6, b6)
    return gif.reshape(S, B, H3), gib.reshape(S, B, H3)


def gru_input_projection_pair(xf, xb, wih_f, bih_f, wih_b, bih_b):
    """xf, xb: (S, B, H) from the previous layer -> (gi_fwd, gi_bwd) bf16."""
    S, B, H = xf.shape
    H3 = wih_f.shape[0]
    rows = S * B
    xf2 = xf.reshape(rows, H)
    xb2 = xb.reshape(rows, H)
    # W_ih is (3H, 2H): columns [:H] multiply the fwd stream, [H:] the bwd one.
    wt = jnp.concatenate([wih_f.T[:H], wih_b.T[:H]], axis=1).astype(jnp.bfloat16)
    wb = jnp.concatenate([wih_f.T[H:], wih_b.T[H:]], axis=1).astype(jnp.bfloat16)
    b6 = jnp.concatenate([bih_f, bih_b]).reshape(1, 2 * H3).astype(jnp.float32)
    rt = _row_tile(rows)
    gif, gib = pl.pallas_call(
        functools.partial(_inproj2_kernel, h3=H3),
        out_shape=(jax.ShapeDtypeStruct((rows, H3), jnp.bfloat16),
                   jax.ShapeDtypeStruct((rows, H3), jnp.bfloat16)),
        grid_spec=pltpu.PrefetchScalarGridSpec(
            num_scalar_prefetch=0,
            grid=(rows // rt,),
            in_specs=[pl.BlockSpec((rt, H), lambda r: (r, 0)),
                      pl.BlockSpec((rt, H), lambda r: (r, 0)),
                      pl.BlockSpec((H, 2 * H3), lambda r: (0, 0)),
                      pl.BlockSpec((H, 2 * H3), lambda r: (0, 0)),
                      pl.BlockSpec((1, 2 * H3), lambda r: (0, 0))],
            out_specs=(pl.BlockSpec((rt, H3), lambda r: (r, 0)),
                       pl.BlockSpec((rt, H3), lambda r: (r, 0)))),
        compiler_params=pltpu.CompilerParams(
            dimension_semantics=("parallel",),
            vmem_limit_bytes=_VMEM_LIMIT),
    )(xf2, xb2, wt, wb, b6)
    return gif.reshape(S, B, H3), gib.reshape(S, B, H3)


# ----------------------------------------------------------------------------
# Bidirectional GRU recurrence, time-blocked.  grid = (NB batch blocks,
# NT time blocks); each grid step runs T steps of both directions with an
# unrolled fori_loop.  Backward stream is fed/written through reversed
# index_maps (no [::-1] HBM copies).  PyTorch gate order [r, z, n];
# h' = (1-z)*n + z*h  with  n = tanh(gi_n + r*(W_hn h + b_hn)).
# ----------------------------------------------------------------------------
def _bigru_block_kernel(gif_ref, gib_ref, h0f_ref, h0b_ref,
                        whhf_ref, whhb_ref, bhhf_ref, bhhb_ref,
                        outf_ref, outb_ref, hf_scr, hb_scr, *, nhid, tsteps):
    ti = pl.program_id(1)

    @pl.when(ti == 0)
    def _():
        hf_scr[...] = h0f_ref[...].astype(jnp.float32)
        hb_scr[...] = h0b_ref[...].astype(jnp.float32)

    H = nhid
    whhf = whhf_ref[...]
    whhb = whhb_ref[...]
    bhhf = bhhf_ref[...]
    bhhb = bhhb_ref[...]

    def cell(gi, h, whh, bhh):
        # bf16 MXU operands, f32 accumulation; gate math stays f32
        # (v5e has no bf16 VPU/EUP; recurrence numerics).
        gh = jnp.dot(h.astype(whh.dtype), whh,
                     preferred_element_type=jnp.float32) + bhh
        gi = gi.astype(jnp.float32)
        r = jax.nn.sigmoid(gi[:, 0 * H:1 * H] + gh[:, 0 * H:1 * H])
        z = jax.nn.sigmoid(gi[:, 1 * H:2 * H] + gh[:, 1 * H:2 * H])
        n = jnp.tanh(gi[:, 2 * H:3 * H] + r * gh[:, 2 * H:3 * H])
        return (1.0 - z) * n + z * h

    def body(j, carry):
        hf, hb = carry
        hf = cell(gif_ref[j], hf, whhf, bhhf)          # fwd step at local row j
        outf_ref[j] = hf.astype(outf_ref.dtype)
        jb = tsteps - 1 - j                            # bwd step, reversed in-block
        hb = cell(gib_ref[jb], hb, whhb, bhhb)
        outb_ref[jb] = hb.astype(outb_ref.dtype)
        return hf, hb

    hf, hb = jax.lax.fori_loop(0, tsteps, body,
                               (hf_scr[...], hb_scr[...]), unroll=True)
    hf_scr[...] = hf
    hb_scr[...] = hb


def bigru_layer_rec(gif, gib, h0f, h0b, whh_f, bhh_f, whh_b, bhh_b, nhid):
    """gif/gib: (S, B, 3H) bf16 -> (out_f, out_b), each (S, B, H) f32."""
    S, B, H3 = gif.shape
    T = _time_block(S)
    NT = S // T
    TB, NB = _batch_split(B)
    kernel = functools.partial(_bigru_block_kernel, nhid=nhid, tsteps=T)

    out_f, out_b = pl.pallas_call(
        kernel,
        out_shape=(jax.ShapeDtypeStruct((S, B, nhid), jnp.float32),
                   jax.ShapeDtypeStruct((S, B, nhid), jnp.float32)),
        grid_spec=pltpu.PrefetchScalarGridSpec(
            num_scalar_prefetch=0,
            grid=(NB, NT),
            in_specs=[
                pl.BlockSpec((T, TB, H3), lambda b, t: (t, b, 0)),            # fwd gi
                pl.BlockSpec((T, TB, H3), lambda b, t: (NT - 1 - t, b, 0)),   # bwd gi (reversed)
                pl.BlockSpec((TB, nhid), lambda b, t: (b, 0)),
                pl.BlockSpec((TB, nhid), lambda b, t: (b, 0)),
                pl.BlockSpec((nhid, H3), lambda b, t: (0, 0)),
                pl.BlockSpec((nhid, H3), lambda b, t: (0, 0)),
                pl.BlockSpec((1, H3), lambda b, t: (0, 0)),
                pl.BlockSpec((1, H3), lambda b, t: (0, 0)),
            ],
            out_specs=(pl.BlockSpec((T, TB, nhid), lambda b, t: (t, b, 0)),
                       pl.BlockSpec((T, TB, nhid), lambda b, t: (NT - 1 - t, b, 0))),
            scratch_shapes=[pltpu.VMEM((TB, nhid), jnp.float32),
                            pltpu.VMEM((TB, nhid), jnp.float32)]),
        compiler_params=pltpu.CompilerParams(
            dimension_semantics=("parallel", "arbitrary"),   # batch ∥, time serial
            vmem_limit_bytes=_VMEM_LIMIT),
    )(gif, gib, h0f, h0b,
      whh_f.T.astype(jnp.bfloat16), whh_b.T.astype(jnp.bfloat16),
      bhh_f.reshape(1, -1).astype(jnp.float32),
      bhh_b.reshape(1, -1).astype(jnp.float32))
    return out_f, out_b


def bigru(x, h0, gru_params, nhid):
    """x: (S, B, ninp), h0: (2*nlayers, B, H) -> (out_f, out_b), each (S, B, H)."""
    out_f = out_b = None
    for l, (p_fwd, p_bwd) in enumerate(gru_params):
        wih_f, whh_f, bih_f, bhh_f = p_fwd
        wih_b, whh_b, bih_b, bhh_b = p_bwd
        if l == 0:
            gif, gib = gru_input_projection_single(x, wih_f, bih_f, wih_b, bih_b)
        else:
            gif, gib = gru_input_projection_pair(out_f, out_b,
                                                 wih_f, bih_f, wih_b, bih_b)
        out_f, out_b = bigru_layer_rec(gif, gib, h0[2 * l], h0[2 * l + 1],
                                       whh_f, bhh_f, whh_b, bhh_b, nhid)
    return out_f, out_b


# ----------------------------------------------------------------------------
# CrossSelf.fwd — structured self attention, batch-tiled, consuming the GRU
# output in its native (S, B, H) layout (no HBM transpose pass).
# ----------------------------------------------------------------------------
def _self_attn_kernel(xf_ref, xb_ref, mask_ref, w1f_ref, w1b_ref, w2_ref,
                      agg_ref, attn_ref):
    xf = xf_ref[...]                                   # (S, TB, H) f32
    xb = xb_ref[...]
    S, TB, H = xf.shape
    K = w2_ref.shape[1]
    cdt = w1f_ref.dtype                                # bf16 matmul operands
    # ws1/ws2 path on the 2-D (S*TB, .) slab; the merge is layout-free when TB
    # is a multiple of 8 (guaranteed by _batch_tile and the demo shapes).
    xf2 = xf.reshape(S * TB, H)
    xb2 = xb.reshape(S * TB, H)
    hbar = jnp.tanh(
        jnp.dot(xf2.astype(cdt), w1f_ref[...], preferred_element_type=jnp.float32)
        + jnp.dot(xb2.astype(cdt), w1b_ref[...], preferred_element_type=jnp.float32))
    al = jnp.dot(hbar.astype(cdt), w2_ref[...],
                 preferred_element_type=jnp.float32).reshape(S, TB, K)
    pen = al - 10000.0 * mask_ref[...]                 # mask (S, TB, 1), bcast over hops
    m = jnp.max(pen, axis=0, keepdims=True)            # softmax over S (leading axis)
    e = jnp.exp(pen - m)
    a = e * pl.reciprocal(jnp.sum(e, axis=0, keepdims=True), approx=True)
    attn_ref[...] = a.astype(attn_ref.dtype)           # (S, TB, K); tiny transpose outside
    # hops aggregation: hops is tiny, so a VPU multiply+reduce over S per hop is
    # used instead of a (K,S)x(S,H) MXU pass that would be ~all padding.
    aggs = []
    for k in range(K):
        w = a[:, :, k:k + 1]                            # (S, TB, 1)
        af = jnp.sum(w * xf, axis=0)                    # (TB, H)
        ab = jnp.sum(w * xb, axis=0)
        aggs.append(jnp.concatenate([af, ab], axis=-1))  # (TB, 2H)
    agg_ref[...] = jnp.stack(aggs, axis=1).astype(agg_ref.dtype)   # (TB, K, 2H)


def self_attention(out_f, out_b, tokens, ws1, ws2, hops):
    """out_f/out_b: (S, B, H); tokens: (S, B) -> agg (B, hops, 2H), attn (B, hops, S)."""
    S, B, H = out_f.shape
    AU = ws1.shape[0]
    TB = _batch_tile(B)
    mask = (tokens == PAD_IDX).astype(jnp.float32)[:, :, None]    # (S, B, 1)
    w1f = ws1[:, :H].T.astype(jnp.bfloat16)                       # (H, AU)
    w1b = ws1[:, H:].T.astype(jnp.bfloat16)
    w2 = ws2.T.astype(jnp.bfloat16)                               # (AU, hops)
    agg, attn = pl.pallas_call(
        _self_attn_kernel,
        out_shape=(jax.ShapeDtypeStruct((B, hops, 2 * H), jnp.float32),
                   jax.ShapeDtypeStruct((S, B, hops), jnp.float32)),
        grid_spec=pltpu.PrefetchScalarGridSpec(
            num_scalar_prefetch=0,
            grid=(B // TB,),
            in_specs=[pl.BlockSpec((S, TB, H), lambda b: (0, b, 0)),
                      pl.BlockSpec((S, TB, H), lambda b: (0, b, 0)),
                      pl.BlockSpec((S, TB, 1), lambda b: (0, b, 0)),
                      pl.BlockSpec((H, AU), lambda b: (0, 0)),
                      pl.BlockSpec((H, AU), lambda b: (0, 0)),
                      pl.BlockSpec((AU, hops), lambda b: (0, 0))],
            out_specs=(pl.BlockSpec((TB, hops, 2 * H), lambda b: (b, 0, 0)),
                       pl.BlockSpec((S, TB, hops), lambda b: (0, b, 0)))),
        compiler_params=pltpu.CompilerParams(
            dimension_semantics=("parallel",),
            vmem_limit_bytes=_VMEM_LIMIT),
    )(out_f, out_b, mask, w1f, w1b, w2)
    attn = jnp.transpose(attn, (1, 2, 0))              # (B, hops, S) — tiny array
    return agg, attn


# ----------------------------------------------------------------------------
# BaseAttn.combine_hops — batch-tiled, whole-hop softmax in one kernel.
# ----------------------------------------------------------------------------
def _combine_hops_kernel(r1_ref, r2_ref, ipm_ref, r1o_ref, r2o_ref, adist_ref):
    r1 = r1_ref[...]                                   # (TB, K, 2H) f32
    r2 = r2_ref[...]
    K = r1.shape[1]
    ipm = ipm_ref[...]
    # per-hop IPM matmul (K is tiny; avoids an in-kernel merge reshape)
    r2p = jnp.stack(
        [jnp.dot(r2[:, k, :].astype(ipm.dtype), ipm,
                 preferred_element_type=jnp.float32) for k in range(K)],
        axis=1)                                        # (TB, K, 2H)
    s = jnp.tanh(jnp.sum(r1 * r2p, axis=-1))           # (TB, K)
    m = jnp.max(s, axis=-1, keepdims=True)
    e = jnp.exp(s - m)
    a = e * pl.reciprocal(jnp.sum(e, axis=-1, keepdims=True), approx=True)
    r1o_ref[...] = jnp.sum(a[:, :, None] * r1, axis=1).astype(r1o_ref.dtype)
    r2o_ref[...] = jnp.sum(a[:, :, None] * r2, axis=1).astype(r2o_ref.dtype)
    adist_ref[...] = a.astype(adist_ref.dtype)


def combine_hops(r1, r2, ipm_w):
    """r1, r2: (B, hops, 2H) -> (B, 2H), (B, 2H), (B, hops)."""
    B, K, H2 = r1.shape
    TB = _batch_tile(B)
    return pl.pallas_call(
        _combine_hops_kernel,
        out_shape=(jax.ShapeDtypeStruct((B, H2), jnp.float32),
                   jax.ShapeDtypeStruct((B, H2), jnp.float32),
                   jax.ShapeDtypeStruct((B, K), jnp.float32)),
        grid_spec=pltpu.PrefetchScalarGridSpec(
            num_scalar_prefetch=0,
            grid=(B // TB,),
            in_specs=[pl.BlockSpec((TB, K, H2), lambda b: (b, 0, 0)),
                      pl.BlockSpec((TB, K, H2), lambda b: (b, 0, 0)),
                      pl.BlockSpec((H2, H2), lambda b: (0, 0))],
            out_specs=(pl.BlockSpec((TB, H2), lambda b: (b, 0)),
                       pl.BlockSpec((TB, H2), lambda b: (b, 0)),
                       pl.BlockSpec((TB, K), lambda b: (b, 0)))),
        compiler_params=pltpu.CompilerParams(
            dimension_semantics=("parallel",),
            vmem_limit_bytes=_VMEM_LIMIT),
    )(r1, r2, ipm_w.T.astype(jnp.bfloat16))


# ----------------------------------------------------------------------------
# Full RnnEncoder.forward (eval mode: dropout = identity)
# ----------------------------------------------------------------------------
def rnn_encoder_forward(params, tokens1, tokens2, hidden, *, nhid, hops):
    S, B = tokens1.shape
    # Fuse the two sentences along the batch axis: one GRU pass and one
    # attention pass on a 2B batch instead of two passes on B.
    tokens = jnp.concatenate([tokens1, tokens2], axis=1)         # (S, 2B)
    h0 = jnp.concatenate([hidden, hidden], axis=1)               # (2*nlayers, 2B, H)
    emb = jnp.take(params["emb"], tokens, axis=0)                # (S, 2B, ninp)
    out_f, out_b = bigru(emb, h0, params["gru"], nhid)           # each (S, 2B, H)
    agg, attn = self_attention(out_f, out_b, tokens,
                               params["ws1"], params["ws2"], hops)
    r1, r2, adist = combine_hops(agg[:B], agg[B:], params["ipm"])
    return r1, r2, [attn[:B], attn[B:]], adist


def init_params(key, *, ntoken, ninp, nhid, nlayers, attention_unit, hops):
    keys = iter(jax.random.split(key, 128))

    def uni(shape, scale=0.1):
        return jax.random.uniform(next(keys), shape, jnp.float32, -scale, scale)

    emb = uni((ntoken, ninp)).at[PAD_IDX].set(0.0)               # <pad> row zeroed
    gru = []
    in_size = ninp
    for _ in range(nlayers):
        layer = []
        for _ in range(2):                                       # fwd, bwd
            layer.append((uni((3 * nhid, in_size)),              # W_ih
                          uni((3 * nhid, nhid)),                 # W_hh
                          uni((3 * nhid,)),                      # b_ih
                          uni((3 * nhid,))))                     # b_hh
        gru.append(tuple(layer))
        in_size = 2 * nhid
    H = 2 * nhid
    return {
        "emb": emb,
        "gru": gru,
        "ws1": uni((attention_unit, H)),                         # nn.Linear(H, AU, bias=False)
        "ws2": uni((hops, attention_unit)),                      # nn.Linear(AU, hops, bias=False)
        "ipm": uni((H, H)),                                      # nn.Linear(H, H, bias=False)
    }


if __name__ == "__main__":
    ntoken, ninp, nhid, nlayers = 50, 32, 32, 2
    attention_unit, hops = 16, 4
    S, B = 8, 4

    key = jax.random.PRNGKey(0)
    kp, k1, k2 = jax.random.split(key, 3)
    params = init_params(kp, ntoken=ntoken, ninp=ninp, nhid=nhid,
                         nlayers=nlayers, attention_unit=attention_unit, hops=hops)

    tokens1 = jax.random.randint(k1, (S, B), 1, ntoken).astype(jnp.int32)
    tokens2 = jax.random.randint(k2, (S, B), 1, ntoken).astype(jnp.int32)
    tokens1 = tokens1.at[-2:, :].set(PAD_IDX)                    # trailing <pad> tokens
    tokens2 = tokens2.at[-1:, :].set(PAD_IDX)

    hidden = jnp.zeros((nlayers * 2, B, nhid), jnp.float32)      # RNN.init_hidden

    fwd = jax.jit(functools.partial(rnn_encoder_forward, nhid=nhid, hops=hops))
    r1, r2, attention, adist = fwd(params, tokens1, tokens2, hidden)
    jax.block_until_ready((r1, r2, attention, adist))

    assert r1.shape == (B, 2 * nhid) and r2.shape == (B, 2 * nhid)
    assert attention[0].shape == (B, hops, S) and attention[1].shape == (B, hops, S)
    assert adist.shape == (B, hops)
    print("KERNEL_OK")
</pallas_src>

<mosaic_0001>
module attributes {stable_mosaic.version = 11 : i64} {
  func.func @_inproj1_kernel(%arg0: i32, %arg1: memref<64x32xf32, #tpu.memory_space<vmem>>, %arg2: memref<32x192xbf16, #tpu.memory_space<vmem>>, %arg3: memref<1x192xf32, #tpu.memory_space<vmem>>, %arg4: memref<64x96xbf16, #tpu.memory_space<vmem>>, %arg5: memref<64x96xbf16, #tpu.memory_space<vmem>>) attributes {dimension_semantics = [#tpu.dimension_semantics<parallel>], iteration_bounds = array<i64: 1>, scalar_prefetch = 0 : i64, scratch_operands = 0 : i64, tpu.core_type = #tpu.core_type<tc>, window_params = [{transform_indices = @transform_0, window_bounds = array<i64: 64, 32>}, {pipeline_mode = #tpu.pipeline_mode<synchronous>, transform_indices = @transform_1, window_bounds = array<i64: 32, 192>}, {pipeline_mode = #tpu.pipeline_mode<synchronous>, transform_indices = @transform_2, window_bounds = array<i64: 1, 192>}, {transform_indices = @transform_3, window_bounds = array<i64: 64, 96>}, {transform_indices = @transform_4, window_bounds = array<i64: 64, 96>}]} {
    %c0 = arith.constant 0 : index
    %c0_0 = arith.constant 0 : index
    %0 = vector.load %arg1[%c0, %c0_0] : memref<64x32xf32, #tpu.memory_space<vmem>>, vector<64x32xf32>
    %1 = arith.truncf %0 : vector<64x32xf32> to vector<64x32xbf16>
    %c0_1 = arith.constant 0 : index
    %c0_2 = arith.constant 0 : index
    %2 = vector.load %arg2[%c0_1, %c0_2] : memref<32x192xbf16, #tpu.memory_space<vmem>>, vector<32x192xbf16>
    %cst = arith.constant dense<0.000000e+00> : vector<64x192xf32>
    %3 = tpu.matmul %1, %2, %cst {dimension_numbers = #tpu.dot_dimension_numbers<[1], [0], [0], [1], [0, 0, 1, 1], [], []>} : vector<64x32xbf16>, vector<32x192xbf16>, vector<64x192xf32> -> vector<64x192xf32>
    %c0_3 = arith.constant 0 : index
    %c0_4 = arith.constant 0 : index
    %4 = vector.load %arg3[%c0_3, %c0_4] : memref<1x192xf32, #tpu.memory_space<vmem>>, vector<1x192xf32>
    %5 = vector.broadcast %4 : vector<1x192xf32> to vector<64x192xf32>
    %6 = arith.addf %3, %5 : vector<64x192xf32>
    %7 = vector.extract_strided_slice %6 {offsets = [0, 0], sizes = [64, 96], strides = [1, 1]} : vector<64x192xf32> to vector<64x96xf32>
    %8 = arith.truncf %7 : vector<64x96xf32> to vector<64x96xbf16>
    %c0_5 = arith.constant 0 : index
    %c0_6 = arith.constant 0 : index
    %9 = vector.load %arg4[%c0_5, %c0_6] : memref<64x96xbf16, #tpu.memory_space<vmem>>, vector<64x96xbf16>
    tpu.vector_store %arg4[%c0_5, %c0_6], %8 {strides = array<i32>} : memref<64x96xbf16, #tpu.memory_space<vmem>>, vector<64x96xbf16>,
    %10 = vector.extract_strided_slice %6 {offsets = [0, 96], sizes = [64, 96], strides = [1, 1]} : vector<64x192xf32> to vector<64x96xf32>
    %11 = arith.truncf %10 : vector<64x96xf32> to vector<64x96xbf16>
    %c0_7 = arith.constant 0 : index
    %c0_8 = arith.constant 0 : index
    %12 = vector.load %arg5[%c0_7, %c0_8] : memref<64x96xbf16, #tpu.memory_space<vmem>>, vector<64x96xbf16>
    tpu.vector_store %arg5[%c0_7, %c0_8], %11 {strides = array<i32>} : memref<64x96xbf16, #tpu.memory_space<vmem>>, vector<64x96xbf16>,
    return
  }
  func.func @transform_0(%arg0: i32) -> (i32, i32) {
    %c0_i32 = arith.constant 0 : i32
    %c0_i32_0 = arith.constant 0 : i32
    return %arg0, %c0_i32 : i32, i32
  }
  func.func @transform_1(%arg0: i32) -> (i32, i32) {
    %c0_i32 = arith.constant 0 : i32
    %c0_i32_0 = arith.constant 0 : i32
    %c0_i32_1 = arith.constant 0 : i32
    return %c0_i32, %c0_i32_0 : i32, i32
  }
  func.func @transform_2(%arg0: i32) -> (i32, i32) {
    %c0_i32 = arith.constant 0 : i32
    %c0_i32_0 = arith.constant 0 : i32
    %c0_i32_1 = arith.constant 0 : i32
    return %c0_i32, %c0_i32_0 : i32, i32
  }
  func.func @transform_3(%arg0: i32) -> (i32, i32) {
    %c0_i32 = arith.constant 0 : i32
    %c0_i32_0 = arith.constant 0 : i32
    return %arg0, %c0_i32 : i32, i32
  }
  func.func @transform_4(%arg0: i32) -> (i32, i32) {
    %c0_i32 = arith.constant 0 : i32
    %c0_i32_0 = arith.constant 0 : i32
    return %arg0, %c0_i32 : i32, i32
  }
}

module attributes {stable_mosaic.version = 11 : i64} {
  func.func @_inproj2_kernel(%arg0: i32, %arg1: memref<64x32xf32, #tpu.memory_space<vmem>>, %arg2: memref<64x32xf32, #tpu.memory_space<vmem>>, %arg3: memref<32x192xbf16, #tpu.memory_space<vmem>>, %arg4: memref<32x192xbf16, #tpu.memory_space<vmem>>, %arg5: memref<1x192xf32, #tpu.memory_space<vmem>>, %arg6: memref<64x96xbf16, #tpu.memory_space<vmem>>, %arg7: memref<64x96xbf16, #tpu.memory_space<vmem>>) attributes {dimension_semantics = [#tpu.dimension_semantics<parallel>], iteration_bounds = array<i64: 1>, scalar_prefetch = 0 : i64, scratch_operands = 0 : i64, tpu.core_type = #tpu.core_type<tc>, window_params = [{transform_indices = @transform_0, window_bounds = array<i64: 64, 32>}, {transform_indices = @transform_1, window_bounds = array<i64: 64, 32>}, {pipeline_mode = #tpu.pipeline_mode<synchronous>, transform_indices = @transform_2, window_bounds = array<i64: 32, 192>}, {pipeline_mode = #tpu.pipeline_mode<synchronous>, transform_indices = @transform_3, window_bounds = array<i64: 32, 192>}, {pipeline_mode = #tpu.pipeline_mode<synchronous>, transform_indices = @transform_4, window_bounds = array<i64: 1, 192>}, {transform_indices = @transform_5, window_bounds = array<i64: 64, 96>}, {transform_indices = @transform_6, window_bounds = array<i64: 64, 96>}]} {
    %c0 = arith.constant 0 : index
    %c0_0 = arith.constant 0 : index
    %0 = vector.load %arg1[%c0, %c0_0] : memref<64x32xf32, #tpu.memory_space<vmem>>, vector<64x32xf32>
    %1 = arith.truncf %0 : vector<64x32xf32> to vector<64x32xbf16>
    %c0_1 = arith.constant 0 : index
    %c0_2 = arith.constant 0 : index
    %2 = vector.load %arg3[%c0_1, %c0_2] : memref<32x192xbf16, #tpu.memory_space<vmem>>, vector<32x192xbf16>
    %cst = arith.constant dense<0.000000e+00> : vector<64x192xf32>
    %3 = tpu.matmul %1, %2, %cst {dimension_numbers = #tpu.dot_dimension_numbers<[1], [0], [0], [1], [0, 0, 1, 1], [], []>} : vector<64x32xbf16>, vector<32x192xbf16>, vector<64x192xf32> -> vector<64x192xf32>
    %c0_3 = arith.constant 0 : index
    %c0_4 = arith.constant 0 : index
    %4 = vector.load %arg2[%c0_3, %c0_4] : memref<64x32xf32, #tpu.memory_space<vmem>>, vector<64x32xf32>
    %5 = arith.truncf %4 : vector<64x32xf32> to vector<64x32xbf16>
    %c0_5 = arith.constant 0 : index
    %c0_6 = arith.constant 0 : index
    %6 = vector.load %arg4[%c0_5, %c0_6] : memref<32x192xbf16, #tpu.memory_space<vmem>>, vector<32x192xbf16>
    %cst_7 = arith.constant dense<0.000000e+00> : vector<64x192xf32>
    %7 = tpu.matmul %5, %6, %cst_7 {dimension_numbers = #tpu.dot_dimension_numbers<[1], [0], [0], [1], [0, 0, 1, 1], [], []>} : vector<64x32xbf16>, vector<32x192xbf16>, vector<64x192xf32> -> vector<64x192xf32>
    %8 = arith.addf %3, %7 : vector<64x192xf32>
    %c0_8 = arith.constant 0 : index
    %c0_9 = arith.constant 0 : index
    %9 = vector.load %arg5[%c0_8, %c0_9] : memref<1x192xf32, #tpu.memory_space<vmem>>, vector<1x192xf32>
    %10 = vector.broadcast %9 : vector<1x192xf32> to vector<64x192xf32>
    %11 = arith.addf %8, %10 : vector<64x192xf32>
    %12 = vector.extract_strided_slice %11 {offsets = [0, 0], sizes = [64, 96], strides = [1, 1]} : vector<64x192xf32> to vector<64x96xf32>
    %13 = arith.truncf %12 : vector<64x96xf32> to vector<64x96xbf16>
    %c0_10 = arith.constant 0 : index
    %c0_11 = arith.constant 0 : index
    %14 = vector.load %arg6[%c0_10, %c0_11] : memref<64x96xbf16, #tpu.memory_space<vmem>>, vector<64x96xbf16>
    tpu.vector_store %arg6[%c0_10, %c0_11], %13 {strides = array<i32>} : memref<64x96xbf16, #tpu.memory_space<vmem>>, vector<64x96xbf16>,
    %15 = vector.extract_strided_slice %11 {offsets = [0, 96], sizes = [64, 96], strides = [1, 1]} : vector<64x192xf32> to vector<64x96xf32>
    %16 = arith.truncf %15 : vector<64x96xf32> to vector<64x96xbf16>
    %c0_12 = arith.constant 0 : index
    %c0_13 = arith.constant 0 : index
    %17 = vector.load %arg7[%c0_12, %c0_13] : memref<64x96xbf16, #tpu.memory_space<vmem>>, vector<64x96xbf16>
    tpu.vector_store %arg7[%c0_12, %c0_13], %16 {strides = array<i32>} : memref<64x96xbf16, #tpu.memory_space<vmem>>, vector<64x96xbf16>,
    return
  }
  func.func @transform_0(%arg0: i32) -> (i32, i32) {
    %c0_i32 = arith.constant 0 : i32
    %c0_i32_0 = arith.constant 0 : i32
    return %arg0, %c0_i32 : i32, i32
  }
  func.func @transform_1(%arg0: i32) -> (i32, i32) {
    %c0_i32 = arith.constant 0 : i32
    %c0_i32_0 = arith.constant 0 : i32
    return %arg0, %c0_i32 : i32, i32
  }
  func.func @transform_2(%arg0: i32) -> (i32, i32) {
    %c0_i32 = arith.constant 0 : i32
    %c0_i32_0 = arith.constant 0 : i32
    %c0_i32_1 = arith.constant 0 : i32
    return %c0_i32, %c0_i32_0 : i32, i32
  }
  func.func @transform_3(%arg0: i32) -> (i32, i32) {
    %c0_i32 = arith.constant 0 : i32
    %c0_i32_0 = arith.constant 0 : i32
    %c0_i32_1 = arith.constant 0 : i32
    return %c0_i32, %c0_i32_0 : i32, i32
  }
  func.func @transform_4(%arg0: i32) -> (i32, i32) {
    %c0_i32 = arith.constant 0 : i32
    %c0_i32_0 = arith.constant 0 : i32
    %c0_i32_1 = arith.constant 0 : i32
    return %c0_i32, %c0_i32_0 : i32, i32
  }
  func.func @transform_5(%arg0: i32) -> (i32, i32) {
    %c0_i32 = arith.constant 0 : i32
    %c0_i32_0 = arith.constant 0 : i32
    return %arg0, %c0_i32 : i32, i32
  }
  func.func @transform_6(%arg0: i32) -> (i32, i32) {
    %c0_i32 = arith.constant 0 : i32
    %c0_i32_0 = arith.constant 0 : i32
    return %arg0, %c0_i32 : i32, i32
  }
}

module attributes {stable_mosaic.version = 11 : i64} {
  func.func @_bigru_block_kernel(%arg0: i32, %arg1: i32, %arg2: memref<8x8x96xbf16, #tpu.memory_space<vmem>>, %arg3: memref<8x8x96xbf16, #tpu.memory_space<vmem>>, %arg4: memref<8x32xf32, #tpu.memory_space<vmem>>, %arg5: memref<8x32xf32, #tpu.memory_space<vmem>>, %arg6: memref<32x96xbf16, #tpu.memory_space<vmem>>, %arg7: memref<32x96xbf16, #tpu.memory_space<vmem>>, %arg8: memref<1x96xf32, #tpu.memory_space<vmem>>, %arg9: memref<1x96xf32, #tpu.memory_space<vmem>>, %arg10: memref<8x8x32xf32, #tpu.memory_space<vmem>>, %arg11: memref<8x8x32xf32, #tpu.memory_space<vmem>>, %arg12: memref<8x32xf32, #tpu.memory_space<vmem>>, %arg13: memref<8x32xf32, #tpu.memory_space<vmem>>) attributes {dimension_semantics = [#tpu.dimension_semantics<parallel>, #tpu.dimension_semantics<arbitrary>], iteration_bounds = array<i64: 1, 1>, scalar_prefetch = 0 : i64, scratch_operands = 2 : i64, tpu.core_type = #tpu.core_type<tc>, window_params = [{transform_indices = @transform_0, window_bounds = array<i64: 8, 8, 96>}, {transform_indices = @transform_1, window_bounds = array<i64: 8, 8, 96>}, {transform_indices = @transform_2, window_bounds = array<i64: 8, 32>}, {transform_indices = @transform_3, window_bounds = array<i64: 8, 32>}, {pipeline_mode = #tpu.pipeline_mode<synchronous>, transform_indices = @transform_4, window_bounds = array<i64: 32, 96>}, {pipeline_mode = #tpu.pipeline_mode<synchronous>, transform_indices = @transform_5, window_bounds = array<i64: 32, 96>}, {pipeline_mode = #tpu.pipeline_mode<synchronous>, transform_indices = @transform_6, window_bounds = array<i64: 1, 96>}, {pipeline_mode = #tpu.pipeline_mode<synchronous>, transform_indices = @transform_7, window_bounds = array<i64: 1, 96>}, {transform_indices = @transform_8, window_bounds = array<i64: 8, 8, 32>}, {transform_indices = @transform_9, window_bounds = array<i64: 8, 8, 32>}]} {
    %c0_i32 = arith.constant 0 : i32
    %0 = arith.cmpi eq, %arg1, %c0_i32 : i32
    %1 = arith.extui %0 : i1 to i32
    %c0_i32_0 = arith.constant 0 : i32
    %2 = arith.cmpi ne, %1, %c0_i32_0 : i32
    scf.if %2 {
      %c0_152 = arith.constant 0 : index
      %c0_153 = arith.constant 0 : index
      %627 = vector.load %arg4[%c0_152, %c0_153] : memref<8x32xf32, #tpu.memory_space<vmem>>, vector<8x32xf32>
      %c0_154 = arith.constant 0 : index
      %c0_155 = arith.constant 0 : index
      %628 = vector.load %arg12[%c0_154, %c0_155] : memref<8x32xf32, #tpu.memory_space<vmem>>, vector<8x32xf32>
      tpu.vector_store %arg12[%c0_154, %c0_155], %627 {strides = array<i32>} : memref<8x32xf32, #tpu.memory_space<vmem>>, vector<8x32xf32>,
      %c0_156 = arith.constant 0 : index
      %c0_157 = arith.constant 0 : index
      %629 = vector.load %arg5[%c0_156, %c0_157] : memref<8x32xf32, #tpu.memory_space<vmem>>, vector<8x32xf32>
      %c0_158 = arith.constant 0 : index
      %c0_159 = arith.constant 0 : index
      %630 = vector.load %arg13[%c0_158, %c0_159] : memref<8x32xf32, #tpu.memory_space<vmem>>, vector<8x32xf32>
      tpu.vector_store %arg13[%c0_158, %c0_159], %629 {strides = array<i32>} : memref<8x32xf32, #tpu.memory_space<vmem>>, vector<8x32xf32>,
    } else {
    }
    %c0 = arith.constant 0 : index
    %c0_1 = arith.constant 0 : index
    %3 = vector.load %arg6[%c0, %c0_1] : memref<32x96xbf16, #tpu.memory_space<vmem>>, vector<32x96xbf16>
    %c0_2 = arith.constant 0 : index
    %c0_3 = arith.constant 0 : index
    %4 = vector.load %arg7[%c0_2, %c0_3] : memref<32x96xbf16, #tpu.memory_space<vmem>>, vector<32x96xbf16>
    %c0_4 = arith.constant 0 : index
    %c0_5 = arith.constant 0 : index
    %5 = vector.load %arg8[%c0_4, %c0_5] : memref<1x96xf32, #tpu.memory_space<vmem>>, vector<1x96xf32>
    %c0_6 = arith.constant 0 : index
    %c0_7 = arith.constant 0 : index
    %6 = vector.load %arg9[%c0_6, %c0_7] : memref<1x96xf32, #tpu.memory_space<vmem>>, vector<1x96xf32>
    %c0_8 = arith.constant 0 : index
    %c0_9 = arith.constant 0 : index
    %7 = vector.load %arg12[%c0_8, %c0_9] : memref<8x32xf32, #tpu.memory_space<vmem>>, vector<8x32xf32>
    %c0_10 = arith.constant 0 : index
    %c0_11 = arith.constant 0 : index
    %8 = vector.load %arg13[%c0_10, %c0_11] : memref<8x32xf32, #tpu.memory_space<vmem>>, vector<8x32xf32>
    %c0_i32_12 = arith.constant 0 : i32
    %9 = arith.index_cast %c0_i32_12 : i32 to index
    %c0_13 = arith.constant 0 : index
    %c0_14 = arith.constant 0 : index
    %10 = vector.load %arg2[%9, %c0_13, %c0_14] : memref<8x8x96xbf16, #tpu.memory_space<vmem>>, vector<1x8x96xbf16>
    %11 = vector.shape_cast %10 : vector<1x8x96xbf16> to vector<8x96xbf16>
    %12 = arith.truncf %7 : vector<8x32xf32> to vector<8x32xbf16>
    %cst = arith.constant dense<0.000000e+00> : vector<8x96xf32>
    %13 = tpu.matmul %12, %3, %cst {dimension_numbers = #tpu.dot_dimension_numbers<[1], [0], [0], [1], [0, 0, 1, 1], [], []>} : vector<8x32xbf16>, vector<32x96xbf16>, vector<8x96xf32> -> vector<8x96xf32>
    %14 = vector.broadcast %5 : vector<1x96xf32> to vector<8x96xf32>
    %15 = arith.addf %13, %14 : vector<8x96xf32>
    %16 = arith.extf %11 : vector<8x96xbf16> to vector<8x96xf32>
    %17 = vector.extract_strided_slice %16 {offsets = [0, 0], sizes = [8, 32], strides = [1, 1]} : vector<8x96xf32> to vector<8x32xf32>
    %18 = vector.extract_strided_slice %15 {offsets = [0, 0], sizes = [8, 32], strides = [1, 1]} : vector<8x96xf32> to vector<8x32xf32>
    %19 = arith.addf %17, %18 : vector<8x32xf32>
    %20 = arith.negf %19 : vector<8x32xf32>
    %21 = math.exp %20 : vector<8x32xf32>
    %cst_15 = arith.constant 1.000000e+00 : f32
    %22 = vector.broadcast %cst_15 : f32 to vector<8x32xf32>
    %23 = arith.addf %22, %21 : vector<8x32xf32>
    %24 = arith.divf %22, %23 : vector<8x32xf32>
    %25 = vector.extract_strided_slice %16 {offsets = [0, 32], sizes = [8, 32], strides = [1, 1]} : vector<8x96xf32> to vector<8x32xf32>
    %26 = vector.extract_strided_slice %15 {offsets = [0, 32], sizes = [8, 32], strides = [1, 1]} : vector<8x96xf32> to vector<8x32xf32>
    %27 = arith.addf %25, %26 : vector<8x32xf32>
    %28 = arith.negf %27 : vector<8x32xf32>
    %29 = math.exp %28 : vector<8x32xf32>
    %cst_16 = arith.constant 1.000000e+00 : f32
    %30 = vector.broadcast %cst_16 : f32 to vector<8x32xf32>
    %31 = arith.addf %30, %29 : vector<8x32xf32>
    %32 = arith.divf %30, %31 : vector<8x32xf32>
    %33 = vector.extract_strided_slice %16 {offsets = [0, 64], sizes = [8, 32], strides = [1, 1]} : vector<8x96xf32> to vector<8x32xf32>
    %34 = vector.extract_strided_slice %15 {offsets = [0, 64], sizes = [8, 32], strides = [1, 1]} : vector<8x96xf32> to vector<8x32xf32>
    %35 = arith.mulf %24, %34 : vector<8x32xf32>
    %36 = arith.addf %33, %35 : vector<8x32xf32>
    %37 = math.tanh %36 : vector<8x32xf32>
    %cst_17 = arith.constant 1.000000e+00 : f32
    %38 = vector.broadcast %cst_17 : f32 to vector<8x32xf32>
    %39 = arith.subf %38, %32 : vector<8x32xf32>
    %40 = arith.mulf %39, %37 : vector<8x32xf32>
    %41 = arith.mulf %32, %7 : vector<8x32xf32>
    %42 = arith.addf %40, %41 : vector<8x32xf32>
    %43 = arith.index_cast %c0_i32_12 : i32 to index
    %c0_18 = arith.constant 0 : index
    %c0_19 = arith.constant 0 : index
    %44 = vector.load %arg10[%43, %c0_18, %c0_19] : memref<8x8x32xf32, #tpu.memory_space<vmem>>, vector<1x8x32xf32>
    %45 = vector.shape_cast %44 : vector<1x8x32xf32> to vector<8x32xf32>
    %46 = vector.shape_cast %42 : vector<8x32xf32> to vector<1x8x32xf32>
    tpu.vector_store %arg10[%43, %c0_18, %c0_19], %46 {strides = array<i32>} : memref<8x8x32xf32, #tpu.memory_space<vmem>>, vector<1x8x32xf32>,
    %c7_i32 = arith.constant 7 : i32
    %47 = arith.subi %c7_i32, %c0_i32_12 : i32
    %48 = arith.index_cast %47 : i32 to index
    %c0_20 = arith.constant 0 : index
    %c0_21 = arith.constant 0 : index
    %49 = vector.load %arg3[%48, %c0_20, %c0_21] : memref<8x8x96xbf16, #tpu.memory_space<vmem>>, vector<1x8x96xbf16>
    %50 = vector.shape_cast %49 : vector<1x8x96xbf16> to vector<8x96xbf16>
    %51 = arith.truncf %8 : vector<8x32xf32> to vector<8x32xbf16>
    %cst_22 = arith.constant dense<0.000000e+00> : vector<8x96xf32>
    %52 = tpu.matmul %51, %4, %cst_22 {dimension_numbers = #tpu.dot_dimension_numbers<[1], [0], [0], [1], [0, 0, 1, 1], [], []>} : vector<8x32xbf16>, vector<32x96xbf16>, vector<8x96xf32> -> vector<8x96xf32>
    %53 = vector.broadcast %6 : vector<1x96xf32> to vector<8x96xf32>
    %54 = arith.addf %52, %53 : vector<8x96xf32>
    %55 = arith.extf %50 : vector<8x96xbf16> to vector<8x96xf32>
    %56 = vector.extract_strided_slice %55 {offsets = [0, 0], sizes = [8, 32], strides = [1, 1]} : vector<8x96xf32> to vector<8x32xf32>
    %57 = vector.extract_strided_slice %54 {offsets = [0, 0], sizes = [8, 32], strides = [1, 1]} : vector<8x96xf32> to vector<8x32xf32>
    %58 = arith.addf %56, %57 : vector<8x32xf32>
    %59 = arith.negf %58 : vector<8x32xf32>
    %60 = math.exp %59 : vector<8x32xf32>
    %cst_23 = arith.constant 1.000000e+00 : f32
    %61 = vector.broadcast %cst_23 : f32 to vector<8x32xf32>
    %62 = arith.addf %61, %60 : vector<8x32xf32>
    %63 = arith.divf %61, %62 : vector<8x32xf32>
    %64 = vector.extract_strided_slice %55 {offsets = [0, 32], sizes = [8, 32], strides = [1, 1]} : vector<8x96xf32> to vector<8x32xf32>
    %65 = vector.extract_strided_slice %54 {offsets = [0, 32], sizes = [8, 32], strides = [1, 1]} : vector<8x96xf32> to vector<8x32xf32>
    %66 = arith.addf %64, %65 : vector<8x32xf32>
    %67 = arith.negf %66 : vector<8x32xf32>
    %68 = math.exp %67 : vector<8x32xf32>
    %cst_24 = arith.constant 1.000000e+00 : f32
    %69 = vector.broadcast %cst_24 : f32 to vector<8x32xf32>
    %70 = arith.addf %69, %68 : vector<8x32xf32>
    %71 = arith.divf %69, %70 : vector<8x32xf32>
    %72 = vector.extract_strided_slice %55 {offsets = [0, 64], sizes = [8, 32], strides = [1, 1]} : vector<8x96xf32> to vector<8x32xf32>
    %73 = vector.extract_strided_slice %54 {offsets = [0, 64], sizes = [8, 32], strides = [1, 1]} : vector<8x96xf32> to vector<8x32xf32>
    %74 = arith.mulf %63, %73 : vector<8x32xf32>
    %75 = arith.addf %72, %74 : vector<8x32xf32>
    %76 = math.tanh %75 : vector<8x32xf32>
    %cst_25 = arith.constant 1.000000e+00 : f32
    %77 = vector.broadcast %cst_25 : f32 to vector<8x32xf32>
    %78 = arith.subf %77, %71 : vector<8x32xf32>
    %79 = arith.mulf %78, %76 : vector<8x32xf32>
    %80 = arith.mulf %71, %8 : vector<8x32xf32>
    %81 = arith.addf %79, %80 : vector<8x32xf32>
    %82 = arith.index_cast %47 : i32 to index
    %c0_26 = arith.constant 0 : index
    %c0_27 = arith.constant 0 : index
    %83 = vector.load %arg11[%82, %c0_26, %c0_27] : memref<8x8x32xf32, #tpu.memory_space<vmem>>, vector<1x8x32xf32>
    %84 = vector.shape_cast %83 : vector<1x8x32xf32> to vector<8x32xf32>
    %85 = vector.shape_cast %81 : vector<8x32xf32> to vector<1x8x32xf32>
    tpu.vector_store %arg11[%82, %c0_26, %c0_27], %85 {strides = array<i32>} : memref<8x8x32xf32, #tpu.memory_space<vmem>>, vector<1x8x32xf32>,
    %c1_i32 = arith.constant 1 : i32
    %86 = arith.index_cast %c1_i32 : i32 to index
    %c0_28 = arith.constant 0 : index
    %c0_29 = arith.constant 0 : index
    %87 = vector.load %arg2[%86, %c0_28, %c0_29] : memref<8x8x96xbf16, #tpu.memory_space<vmem>>, vector<1x8x96xbf16>
    %88 = vector.shape_cast %87 : vector<1x8x96xbf16> to vector<8x96xbf16>
    %89 = arith.truncf %42 : vector<8x32xf32> to vector<8x32xbf16>
    %cst_30 = arith.constant dense<0.000000e+00> : vector<8x96xf32>
    %90 = tpu.matmul %89, %3, %cst_30 {dimension_numbers = #tpu.dot_dimension_numbers<[1], [0], [0], [1], [0, 0, 1, 1], [], []>} : vector<8x32xbf16>, vector<32x96xbf16>, vector<8x96xf32> -> vector<8x96xf32>
    %91 = vector.broadcast %5 : vector<1x96xf32> to vector<8x96xf32>
    %92 = arith.addf %90, %91 : vector<8x96xf32>
    %93 = arith.extf %88 : vector<8x96xbf16> to vector<8x96xf32>
    %94 = vector.extract_strided_slice %93 {offsets = [0, 0], sizes = [8, 32], strides = [1, 1]} : vector<8x96xf32> to vector<8x32xf32>
    %95 = vector.extract_strided_slice %92 {offsets = [0, 0], sizes = [8, 32], strides = [1, 1]} : vector<8x96xf32> to vector<8x32xf32>
    %96 = arith.addf %94, %95 : vector<8x32xf32>
    %97 = arith.negf %96 : vector<8x32xf32>
    %98 = math.exp %97 : vector<8x32xf32>
    %cst_31 = arith.constant 1.000000e+00 : f32
    %99 = vector.broadcast %cst_31 : f32 to vector<8x32xf32>
    %100 = arith.addf %99, %98 : vector<8x32xf32>
    %101 = arith.divf %99, %100 : vector<8x32xf32>
    %102 = vector.extract_strided_slice %93 {offsets = [0, 32], sizes = [8, 32], strides = [1, 1]} : vector<8x96xf32> to vector<8x32xf32>
    %103 = vector.extract_strided_slice %92 {offsets = [0, 32], sizes = [8, 32], strides = [1, 1]} : vector<8x96xf32> to vector<8x32xf32>
    %104 = arith.addf %102, %103 : vector<8x32xf32>
    %105 = arith.negf %104 : vector<8x32xf32>
    %106 = math.exp %105 : vector<8x32xf32>
    %cst_32 = arith.constant 1.000000e+00 : f32
    %107 = vector.broadcast %cst_32 : f32 to vector<8x32xf32>
    %108 = arith.addf %107, %106 : vector<8x32xf32>
    %109 = arith.divf %107, %108 : vector<8x32xf32>
    %110 = vector.extract_strided_slice %93 {offsets = [0, 64], sizes = [8, 32], strides = [1, 1]} : vector<8x96xf32> to vector<8x32xf32>
    %111 = vector.extract_strided_slice %92 {offsets = [0, 64], sizes = [8, 32], strides = [1, 1]} : vector<8x96xf32> to vector<8x32xf32>
    %112 = arith.mulf %101, %111 : vector<8x32xf32>
    %113 = arith.addf %110, %112 : vector<8x32xf32>
    %114 = math.tanh %113 : vector<8x32xf32>
    %cst_33 = arith.constant 1.000000e+00 : f32
    %115 = vector.broadcast %cst_33 : f32 to vector<8x32xf32>
    %116 = arith.subf %115, %109 : vector<8x32xf32>
    %117 = arith.mulf %116, %114 : vector<8x32xf32>
    %118 = arith.mulf %109, %42 : vector<8x32xf32>
    %119 = arith.addf %117, %118 : vector<8x32xf32>
    %120 = arith.index_cast %c1_i32 : i32 to index
    %c0_34 = arith.constant 0 : index
    %c0_35 = arith.constant 0 : index
    %121 = vector.load %arg10[%120, %c0_34, %c0_35] : memref<8x8x32xf32, #tpu.memory_space<vmem>>, vector<1x8x32xf32>
    %122 = vector.shape_cast %121 : vector<1x8x32xf32> to vector<8x32xf32>
    %123 = vector.shape_cast %119 : vector<8x32xf32> to vector<1x8x32xf32>
    tpu.vector_store %arg10[%120, %c0_34, %c0_35], %123 {strides = array<i32>} : memref<8x8x32xf32, #tpu.memory_space<vmem>>, vector<1x8x32xf32>,
    %c7_i32_36 = arith.constant 7 : i32
    %124 = arith.subi %c7_i32_36, %c1_i32 : i32
    %125 = arith.index_cast %124 : i32 to index
    %c0_37 = arith.constant 0 : index
    %c0_38 = arith.constant 0 : index
    %126 = vector.load %arg3[%125, %c0_37, %c0_38] : memref<8x8x96xbf16, #tpu.memory_space<vmem>>, vector<1x8x96xbf16>
    %127 = vector.shape_cast %126 : vector<1x8x96xbf16> to vector<8x96xbf16>
    %128 = arith.truncf %81 : vector<8x32xf32> to vector<8x32xbf16>
    %cst_39 = arith.constant dense<0.000000e+00> : vector<8x96xf32>
    %129 = tpu.matmul %128, %4, %cst_39 {dimension_numbers = #tpu.dot_dimension_numbers<[1], [0], [0], [1], [0, 0, 1, 1], [], []>} : vector<8x32xbf16>, vector<32x96xbf16>, vector<8x96xf32> -> vector<8x96xf32>
    %130 = vector.broadcast %6 : vector<1x96xf32> to vector<8x96xf32>
    %131 = arith.addf %129, %130 : vector<8x96xf32>
    %132 = arith.extf %127 : vector<8x96xbf16> to vector<8x96xf32>
    %133 = vector.extract_strided_slice %132 {offsets = [0, 0], sizes = [8, 32], strides = [1, 1]} : vector<8x96xf32> to vector<8x32xf32>
    %134 = vector.extract_strided_slice %131 {offsets = [0, 0], sizes = [8, 32], strides = [1, 1]} : vector<8x96xf32> to vector<8x32xf32>
    %135 = arith.addf %133, %134 : vector<8x32xf32>
    %136 = arith.negf %135 : vector<8x32xf32>
    %137 = math.exp %136 : vector<8x32xf32>
    %cst_40 = arith.constant 1.000000e+00 : f32
    %138 = vector.broadcast %cst_40 : f32 to vector<8x32xf32>
    %139 = arith.addf %138, %137 : vector<8x32xf32>
    %140 = arith.divf %138, %139 : vector<8x32xf32>
    %141 = vector.extract_strided_slice %132 {offsets = [0, 32], sizes = [8, 32], strides = [1, 1]} : vector<8x96xf32> to vector<8x32xf32>
    %142 = vector.extract_strided_slice %131 {offsets = [0, 32], sizes = [8, 32], strides = [1, 1]} : vector<8x96xf32> to vector<8x32xf32>
    %143 = arith.addf %141, %142 : vector<8x32xf32>
    %144 = arith.negf %143 : vector<8x32xf32>
    %145 = math.exp %144 : vector<8x32xf32>
    %cst_41 = arith.constant 1.000000e+00 : f32
    %146 = vector.broadcast %cst_41 : f32 to vector<8x32xf32>
    %147 = arith.addf %146, %145 : vector<8x32xf32>
    %148 = arith.divf %146, %147 : vector<8x32xf32>
    %149 = vector.extract_strided_slice %132 {offsets = [0, 64], sizes = [8, 32], strides = [1, 1]} : vector<8x96xf32> to vector<8x32xf32>
    %150 = vector.extract_strided_slice %131 {offsets = [0, 64], sizes = [8, 32], strides = [1, 1]} : vector<8x96xf32> to vector<8x32xf32>
    %151 = arith.mulf %140, %150 : vector<8x32xf32>
    %152 = arith.addf %149, %151 : vector<8x32xf32>
    %153 = math.tanh %152 : vector<8x32xf32>
    %cst_42 = arith.constant 1.000000e+00 : f32
    %154 = vector.broadcast %cst_42 : f32 to vector<8x32xf32>
    %155 = arith.subf %154, %148 : vector<8x32xf32>
    %156 = arith.mulf %155, %153 : vector<8x32xf32>
    %157 = arith.mulf %148, %81 : vector<8x32xf32>
    %158 = arith.addf %156, %157 : vector<8x32xf32>
    %159 = arith.index_cast %124 : i32 to index
    %c0_43 = arith.constant 0 : index
    %c0_44 = arith.constant 0 : index
    %160 = vector.load %arg11[%159, %c0_43, %c0_44] : memref<8x8x32xf32, #tpu.memory_space<vmem>>, vector<1x8x32xf32>
    %161 = vector.shape_cast %160 : vector<1x8x32xf32> to vector<8x32xf32>
    %162 = vector.shape_cast %158 : vector<8x32xf32> to vector<1x8x32xf32>
    tpu.vector_store %arg11[%159, %c0_43, %c0_44], %162 {strides = array<i32>} : memref<8x8x32xf32, #tpu.memory_space<vmem>>, vector<1x8x32xf32>,
    %c2_i32 = arith.constant 2 : i32
    %163 = arith.index_cast %c2_i32 : i32 to index
    %c0_45 = arith.constant 0 : index
    %c0_46 = arith.constant 0 : index
    %164 = vector.load %arg2[%163, %c0_45, %c0_46] : memref<8x8x96xbf16, #tpu.memory_space<vmem>>, vector<1x8x96xbf16>
    %165 = vector.shape_cast %164 : vector<1x8x96xbf16> to vector<8x96xbf16>
    %166 = arith.truncf %119 : vector<8x32xf32> to vector<8x32xbf16>
    %cst_47 = arith.constant dense<0.000000e+00> : vector<8x96xf32>
    %167 = tpu.matmul %166, %3, %cst_47 {dimension_numbers = #tpu.dot_dimension_numbers<[1], [0], [0], [1], [0, 0, 1, 1], [], []>} : vector<8x32xbf16>, vector<32x96xbf16>, vector<8x96xf32> -> vector<8x96xf32>
    %168 = vector.broadcast %5 : vector<1x96xf32> to vector<8x96xf32>
    %169 = arith.addf %167, %168 : vector<8x96xf32>
    %170 = arith.extf %165 : vector<8x96xbf16> to vector<8x96xf32>
    %171 = vector.extract_strided_slice %170 {offsets = [0, 0], sizes = [8, 32], strides = [1, 1]} : vector<8x96xf32> to vector<8x32xf32>
    %172 = vector.extract_strided_slice %169 {offsets = [0, 0], sizes = [8, 32], strides = [1, 1]} : vector<8x96xf32> to vector<8x32xf32>
    %173 = arith.addf %171, %172 : vector<8x32xf32>
    %174 = arith.negf %173 : vector<8x32xf32>
    %175 = math.exp %174 : vector<8x32xf32>
    %cst_48 = arith.constant 1.000000e+00 : f32
    %176 = vector.broadcast %cst_48 : f32 to vector<8x32xf32>
    %177 = arith.addf %176, %175 : vector<8x32xf32>
    %178 = arith.divf %176, %177 : vector<8x32xf32>
    %179 = vector.extract_strided_slice %170 {offsets = [0, 32], sizes = [8, 32], strides = [1, 1]} : vector<8x96xf32> to vector<8x32xf32>
    %180 = vector.extract_strided_slice %169 {offsets = [0, 32], sizes = [8, 32], strides = [1, 1]} : vector<8x96xf32> to vector<8x32xf32>
    %181 = arith.addf %179, %180 : vector<8x32xf32>
    %182 = arith.negf %181 : vector<8x32xf32>
    %183 = math.exp %182 : vector<8x32xf32>
    %cst_49 = arith.constant 1.000000e+00 : f32
    %184 = vector.broadcast %cst_49 : f32 to vector<8x32xf32>
    %185 = arith.addf %184, %183 : vector<8x32xf32>
    %186 = arith.divf %184, %185 : vector<8x32xf32>
    %187 = vector.extract_strided_slice %170 {offsets = [0, 64], sizes = [8, 32], strides = [1, 1]} : vector<8x96xf32> to vector<8x32xf32>
    %188 = vector.extract_strided_slice %169 {offsets = [0, 64], sizes = [8, 32], strides = [1, 1]} : vector<8x96xf32> to vector<8x32xf32>
    %189 = arith.mulf %178, %188 : vector<8x32xf32>
    %190 = arith.addf %187, %189 : vector<8x32xf32>
    %191 = math.tanh %190 : vector<8x32xf32>
    %cst_50 = arith.constant 1.000000e+00 : f32
    %192 = vector.broadcast %cst_50 : f32 to vector<8x32xf32>
    %193 = arith.subf %192, %186 : vector<8x32xf32>
    %194 = arith.mulf %193, %191 : vector<8x32xf32>
    %195 = arith.mulf %186, %119 : vector<8x32xf32>
    %196 = arith.addf %194, %195 : vector<8x32xf32>
    %197 = arith.index_cast %c2_i32 : i32 to index
    %c0_51 = arith.constant 0 : index
    %c0_52 = arith.constant 0 : index
    %198 = vector.load %arg10[%197, %c0_51, %c0_52] : memref<8x8x32xf32, #tpu.memory_space<vmem>>, vector<1x8x32xf32>
    %199 = vector.shape_cast %198 : vector<1x8x32xf32> to vector<8x32xf32>
    %200 = vector.shape_cast %196 : vector<8x32xf32> to vector<1x8x32xf32>
    tpu.vector_store %arg10[%197, %c0_51, %c0_52], %200 {strides = array<i32>} : memref<8x8x32xf32, #tpu.memory_space<vmem>>, vector<1x8x32xf32>,
    %c7_i32_53 = arith.constant 7 : i32
    %201 = arith.subi %c7_i32_53, %c2_i32 : i32
    %202 = arith.index_cast %201 : i32 to index
    %c0_54 = arith.constant 0 : index
    %c0_55 = arith.constant 0 : index
    %203 = vector.load %arg3[%202, %c0_54, %c0_55] : memref<8x8x96xbf16, #tpu.memory_space<vmem>>, vector<1x8x96xbf16>
    %204 = vector.shape_cast %203 : vector<1x8x96xbf16> to vector<8x96xbf16>
    %205 = arith.truncf %158 : vector<8x32xf32> to vector<8x32xbf16>
    %cst_56 = arith.constant dense<0.000000e+00> : vector<8x96xf32>
    %206 = tpu.matmul %205, %4, %cst_56 {dimension_numbers = #tpu.dot_dimension_numbers<[1], [0], [0], [1], [0, 0, 1, 1], [], []>} : vector<8x32xbf16>, vector<32x96xbf16>, vector<8x96xf32> -> vector<8x96xf32>
    %207 = vector.broadcast %6 : vector<1x96xf32> to vector<8x96xf32>
    %208 = arith.addf %206, %207 : vector<8x96xf32>
    %209 = arith.extf %204 : vector<8x96xbf16> to vector<8x96xf32>
    %210 = vector.extract_strided_slice %209 {offsets = [0, 0], sizes = [8, 32], strides = [1, 1]} : vector<8x96xf32> to vector<8x32xf32>
    %211 = vector.extract_strided_slice %208 {offsets = [0, 0], sizes = [8, 32], strides = [1, 1]} : vector<8x96xf32> to vector<8x32xf32>
    %212 = arith.addf %210, %211 : vector<8x32xf32>
    %213 = arith.negf %212 : vector<8x32xf32>
    %214 = math.exp %213 : vector<8x32xf32>
    %cst_57 = arith.constant 1.000000e+00 : f32
    %215 = vector.broadcast %cst_57 : f32 to vector<8x32xf32>
    %216 = arith.addf %215, %214 : vector<8x32xf32>
    %217 = arith.divf %215, %216 : vector<8x32xf32>
    %218 = vector.extract_strided_slice %209 {offsets = [0, 32], sizes = [8, 32], strides = [1, 1]} : vector<8x96xf32> to vector<8x32xf32>
    %219 = vector.extract_strided_slice %208 {offsets = [0, 32], sizes = [8, 32], strides = [1, 1]} : vector<8x96xf32> to vector<8x32xf32>
    %220 = arith.addf %218, %219 : vector<8x32xf32>
    %221 = arith.negf %220 : vector<8x32xf32>
    %222 = math.exp %221 : vector<8x32xf32>
    %cst_58 = arith.constant 1.000000e+00 : f32
    %223 = vector.broadcast %cst_58 : f32 to vector<8x32xf32>
    %224 = arith.addf %223, %222 : vector<8x32xf32>
    %225 = arith.divf %223, %224 : vector<8x32xf32>
    %226 = vector.extract_strided_slice %209 {offsets = [0, 64], sizes = [8, 32], strides = [1, 1]} : vector<8x96xf32> to vector<8x32xf32>
    %227 = vector.extract_strided_slice %208 {offsets = [0, 64], sizes = [8, 32], strides = [1, 1]} : vector<8x96xf32> to vector<8x32xf32>
    %228 = arith.mulf %217, %227 : vector<8x32xf32>
    %229 = arith.addf %226, %228 : vector<8x32xf32>
    %230 = math.tanh %229 : vector<8x32xf32>
    %cst_59 = arith.constant 1.000000e+00 : f32
    %231 = vector.broadcast %cst_59 : f32 to vector<8x32xf32>
    %232 = arith.subf %231, %225 : vector<8x32xf32>
    %233 = arith.mulf %232, %230 : vector<8x32xf32>
    %234 = arith.mulf %225, %158 : vector<8x32xf32>
    %235 = arith.addf %233, %234 : vector<8x32xf32>
    %236 = arith.index_cast %201 : i32 to index
    %c0_60 = arith.constant 0 : index
    %c0_61 = arith.constant 0 : index
    %237 = vector.load %arg11[%236, %c0_60, %c0_61] : memref<8x8x32xf32, #tpu.memory_space<vmem>>, vector<1x8x32xf32>
    %238 = vector.shape_cast %237 : vector<1x8x32xf32> to vector<8x32xf32>
    %239 = vector.shape_cast %235 : vector<8x32xf32> to vector<1x8x32xf32>
    tpu.vector_store %arg11[%236, %c0_60, %c0_61], %239 {strides = array<i32>} : memref<8x8x32xf32, #tpu.memory_space<vmem>>, vector<1x8x32xf32>,
    %c3_i32 = arith.constant 3 : i32
    %240 = arith.index_cast %c3_i32 : i32 to index
    %c0_62 = arith.constant 0 : index
    %c0_63 = arith.constant 0 : index
    %241 = vector.load %arg2[%240, %c0_62, %c0_63] : memref<8x8x96xbf16, #tpu.memory_space<vmem>>, vector<1x8x96xbf16>
    %242 = vector.shape_cast %241 : vector<1x8x96xbf16> to vector<8x96xbf16>
    %243 = arith.truncf %196 : vector<8x32xf32> to vector<8x32xbf16>
    %cst_64 = arith.constant dense<0.000000e+00> : vector<8x96xf32>
    %244 = tpu.matmul %243, %3, %cst_64 {dimension_numbers = #tpu.dot_dimension_numbers<[1], [0], [0], [1], [0, 0, 1, 1], [], []>} : vector<8x32xbf16>, vector<32x96xbf16>, vector<8x96xf32> -> vector<8x96xf32>
    %245 = vector.broadcast %5 : vector<1x96xf32> to vector<8x96xf32>
    %246 = arith.addf %244, %245 : vector<8x96xf32>
    %247 = arith.extf %242 : vector<8x96xbf16> to vector<8x96xf32>
    %248 = vector.extract_strided_slice %247 {offsets = [0, 0], sizes = [8, 32], strides = [1, 1]} : vector<8x96xf32> to vector<8x32xf32>
    %249 = vector.extract_strided_slice %246 {offsets = [0, 0], sizes = [8, 32], strides = [1, 1]} : vector<8x96xf32> to vector<8x32xf32>
    %250 = arith.addf %248, %249 : vector<8x32xf32>
    %251 = arith.negf %250 : vector<8x32xf32>
    %252 = math.exp %251 : vector<8x32xf32>
    %cst_65 = arith.constant 1.000000e+00 : f32
    %253 = vector.broadcast %cst_65 : f32 to vector<8x32xf32>
    %254 = arith.addf %253, %252 : vector<8x32xf32>
    %255 = arith.divf %253, %254 : vector<8x32xf32>
    %256 = vector.extract_strided_slice %247 {offsets = [0, 32], sizes = [8, 32], strides = [1, 1]} : vector<8x96xf32> to vector<8x32xf32>
    %257 = vector.extract_strided_slice %246 {offsets = [0, 32], sizes = [8, 32], strides = [1, 1]} : vector<8x96xf32> to vector<8x32xf32>
    %258 = arith.addf %256, %257 : vector<8x32xf32>
    %259 = arith.negf %258 : vector<8x32xf32>
    %260 = math.exp %259 : vector<8x32xf32>
    %cst_66 = arith.constant 1.000000e+00 : f32
    %261 = vector.broadcast %cst_66 : f32 to vector<8x32xf32>
    %262 = arith.addf %261, %260 : vector<8x32xf32>
    %263 = arith.divf %261, %262 : vector<8x32xf32>
    %264 = vector.extract_strided_slice %247 {offsets = [0, 64], sizes = [8, 32], strides = [1, 1]} : vector<8x96xf32> to vector<8x32xf32>
    %265 = vector.extract_strided_slice %246 {offsets = [0, 64], sizes = [8, 32], strides = [1, 1]} : vector<8x96xf32> to vector<8x32xf32>
    %266 = arith.mulf %255, %265 : vector<8x32xf32>
    %267 = arith.addf %264, %266 : vector<8x32xf32>
    %268 = math.tanh %267 : vector<8x32xf32>
    %cst_67 = arith.constant 1.000000e+00 : f32
    %269 = vector.broadcast %cst_67 : f32 to vector<8x32xf32>
    %270 = arith.subf %269, %263 : vector<8x32xf32>
    %271 = arith.mulf %270, %268 : vector<8x32xf32>
    %272 = arith.mulf %263, %196 : vector<8x32xf32>
    %273 = arith.addf %271, %272 : vector<8x32xf32>
    %274 = arith.index_cast %c3_i32 : i32 to index
    %c0_68 = arith.constant 0 : index
    %c0_69 = arith.constant 0 : index
    %275 = vector.load %arg10[%274, %c0_68, %c0_69] : memref<8x8x32xf32, #tpu.memory_space<vmem>>, vector<1x8x32xf32>
    %276 = vector.shape_cast %275 : vector<1x8x32xf32> to vector<8x32xf32>
    %277 = vector.shape_cast %273 : vector<8x32xf32> to vector<1x8x32xf32>
    tpu.vector_store %arg10[%274, %c0_68, %c0_69], %277 {strides = array<i32>} : memref<8x8x32xf32, #tpu.memory_space<vmem>>, vector<1x8x32xf32>,
    %c7_i32_70 = arith.constant 7 : i32
    %278 = arith.subi %c7_i32_70, %c3_i32 : i32
    %279 = arith.index_cast %278 : i32 to index
    %c0_71 = arith.constant 0 : index
    %c0_72 = arith.constant 0 : index
    %280 = vector.load %arg3[%279, %c0_71, %c0_72] : memref<8x8x96xbf16, #tpu.memory_space<vmem>>, vector<1x8x96xbf16>
    %281 = vector.shape_cast %280 : vector<1x8x96xbf16> to vector<8x96xbf16>
    %282 = arith.truncf %235 : vector<8x32xf32> to vector<8x32xbf16>
    %cst_73 = arith.constant dense<0.000000e+00> : vector<8x96xf32>
    %283 = tpu.matmul %282, %4, %cst_73 {dimension_numbers = #tpu.dot_dimension_numbers<[1], [0], [0], [1], [0, 0, 1, 1], [], []>} : vector<8x32xbf16>, vector<32x96xbf16>, vector<8x96xf32> -> vector<8x96xf32>
    %284 = vector.broadcast %6 : vector<1x96xf32> to vector<8x96xf32>
    %285 = arith.addf %283, %284 : vector<8x96xf32>
    %286 = arith.extf %281 : vector<8x96xbf16> to vector<8x96xf32>
    %287 = vector.extract_strided_slice %286 {offsets = [0, 0], sizes = [8, 32], strides = [1, 1]} : vector<8x96xf32> to vector<8x32xf32>
    %288 = vector.extract_strided_slice %285 {offsets = [0, 0], sizes = [8, 32], strides = [1, 1]} : vector<8x96xf32> to vector<8x32xf32>
    %289 = arith.addf %287, %288 : vector<8x32xf32>
    %290 = arith.negf %289 : vector<8x32xf32>
    %291 = math.exp %290 : vector<8x32xf32>
    %cst_74 = arith.constant 1.000000e+00 : f32
    %292 = vector.broadcast %cst_74 : f32 to vector<8x32xf32>
    %293 = arith.addf %292, %291 : vector<8x32xf32>
    %294 = arith.divf %292, %293 : vector<8x32xf32>
    %295 = vector.extract_strided_slice %286 {offsets = [0, 32], sizes = [8, 32], strides = [1, 1]} : vector<8x96xf32> to vector<8x32xf32>
    %296 = vector.extract_strided_slice %285 {offsets = [0, 32], sizes = [8, 32], strides = [1, 1]} : vector<8x96xf32> to vector<8x32xf32>
    %297 = arith.addf %295, %296 : vector<8x32xf32>
    %298 = arith.negf %297 : vector<8x32xf32>
    %299 = math.exp %298 : vector<8x32xf32>
    %cst_75 = arith.constant 1.000000e+00 : f32
    %300 = vector.broadcast %cst_75 : f32 to vector<8x32xf32>
    %301 = arith.addf %300, %299 : vector<8x32xf32>
    %302 = arith.divf %300, %301 : vector<8x32xf32>
    %303 = vector.extract_strided_slice %286 {offsets = [0, 64], sizes = [8, 32], strides = [1, 1]} : vector<8x96xf32> to vector<8x32xf32>
    %304 = vector.extract_strided_slice %285 {offsets = [0, 64], sizes = [8, 32], strides = [1, 1]} : vector<8x96xf32> to vector<8x32xf32>
    %305 = arith.mulf %294, %304 : vector<8x32xf32>
    %306 = arith.addf %303, %305 : vector<8x32xf32>
    %307 = math.tanh %306 : vector<8x32xf32>
    %cst_76 = arith.constant 1.000000e+00 : f32
    %308 = vector.broadcast %cst_76 : f32 to vector<8x32xf32>
    %309 = arith.subf %308, %302 : vector<8x32xf32>
    %310 = arith.mulf %309, %307 : vector<8x32xf32>
    %311 = arith.mulf %302, %235 : vector<8x32xf32>
    %312 = arith.addf %310, %311 : vector<8x32xf32>
    %313 = arith.index_cast %278 : i32 to index
    %c0_77 = arith.constant 0 : index
    %c0_78 = arith.constant 0 : index
    %314 = vector.load %arg11[%313, %c0_77, %c0_78] : memref<8x8x32xf32, #tpu.memory_space<vmem>>, vector<1x8x32xf32>
    %315 = vector.shape_cast %314 : vector<1x8x32xf32> to vector<8x32xf32>
    %316 = vector.shape_cast %312 : vector<8x32xf32> to vector<1x8x32xf32>
    tpu.vector_store %arg11[%313, %c0_77, %c0_78], %316 {strides = array<i32>} : memref<8x8x32xf32, #tpu.memory_space<vmem>>, vector<1x8x32xf32>,
    %c4_i32 = arith.constant 4 : i32
    %317 = arith.index_cast %c4_i32 : i32 to index
    %c0_79 = arith.constant 0 : index
    %c0_80 = arith.constant 0 : index
    %318 = vector.load %arg2[%317, %c0_79, %c0_80] : memref<8x8x96xbf16, #tpu.memory_space<vmem>>, vector<1x8x96xbf16>
    %319 = vector.shape_cast %318 : vector<1x8x96xbf16> to vector<8x96xbf16>
    %320 = arith.truncf %273 : vector<8x32xf32> to vector<8x32xbf16>
    %cst_81 = arith.constant dense<0.000000e+00> : vector<8x96xf32>
    %321 = tpu.matmul %320, %3, %cst_81 {dimension_numbers = #tpu.dot_dimension_numbers<[1], [0], [0], [1], [0, 0, 1, 1], [], []>} : vector<8x32xbf16>, vector<32x96xbf16>, vector<8x96xf32> -> vector<8x96xf32>
    %322 = vector.broadcast %5 : vector<1x96xf32> to vector<8x96xf32>
    %323 = arith.addf %321, %322 : vector<8x96xf32>
    %324 = arith.extf %319 : vector<8x96xbf16> to vector<8x96xf32>
    %325 = vector.extract_strided_slice %324 {offsets = [0, 0], sizes = [8, 32], strides = [1, 1]} : vector<8x96xf32> to vector<8x32xf32>
    %326 = vector.extract_strided_slice %323 {offsets = [0, 0], sizes = [8, 32], strides = [1, 1]} : vector<8x96xf32> to vector<8x32xf32>
    %327 = arith.addf %325, %326 : vector<8x32xf32>
    %328 = arith.negf %327 : vector<8x32xf32>
    %329 = math.exp %328 : vector<8x32xf32>
    %cst_82 = arith.constant 1.000000e+00 : f32
    %330 = vector.broadcast %cst_82 : f32 to vector<8x32xf32>
    %331 = arith.addf %330, %329 : vector<8x32xf32>
    %332 = arith.divf %330, %331 : vector<8x32xf32>
    %333 = vector.extract_strided_slice %324 {offsets = [0, 32], sizes = [8, 32], strides = [1, 1]} : vector<8x96xf32> to vector<8x32xf32>
    %334 = vector.extract_strided_slice %323 {offsets = [0, 32], sizes = [8, 32], strides = [1, 1]} : vector<8x96xf32> to vector<8x32xf32>
    %335 = arith.addf %333, %334 : vector<8x32xf32>
    %336 = arith.negf %335 : vector<8x32xf32>
    %337 = math.exp %336 : vector<8x32xf32>
    %cst_83 = arith.constant 1.000000e+00 : f32
    %338 = vector.broadcast %cst_83 : f32 to vector<8x32xf32>
    %339 = arith.addf %338, %337 : vector<8x32xf32>
    %340 = arith.divf %338, %339 : vector<8x32xf32>
    %341 = vector.extract_strided_slice %324 {offsets = [0, 64], sizes = [8, 32], strides = [1, 1]} : vector<8x96xf32> to vector<8x32xf32>
    %342 = vector.extract_strided_slice %323 {offsets = [0, 64], sizes = [8, 32], strides = [1, 1]} : vector<8x96xf32> to vector<8x32xf32>
    %343 = arith.mulf %332, %342 : vector<8x32xf32>
    %344 = arith.addf %341, %343 : vector<8x32xf32>
    %345 = math.tanh %344 : vector<8x32xf32>
    %cst_84 = arith.constant 1.000000e+00 : f32
    %346 = vector.broadcast %cst_84 : f32 to vector<8x32xf32>
    %347 = arith.subf %346, %340 : vector<8x32xf32>
    %348 = arith.mulf %347, %345 : vector<8x32xf32>
    %349 = arith.mulf %340, %273 : vector<8x32xf32>
    %350 = arith.addf %348, %349 : vector<8x32xf32>
    %351 = arith.index_cast %c4_i32 : i32 to index
    %c0_85 = arith.constant 0 : index
    %c0_86 = arith.constant 0 : index
    %352 = vector.load %arg10[%351, %c0_85, %c0_86] : memref<8x8x32xf32, #tpu.memory_space<vmem>>, vector<1x8x32xf32>
    %353 = vector.shape_cast %352 : vector<1x8x32xf32> to vector<8x32xf32>
    %354 = vector.shape_cast %350 : vector<8x32xf32> to vector<1x8x32xf32>
    tpu.vector_store %arg10[%351, %c0_85, %c0_86], %354 {strides = array<i32>} : memref<8x8x32xf32, #tpu.memory_space<vmem>>, vector<1x8x32xf32>,
    %c7_i32_87 = arith.constant 7 : i32
    %355 = arith.subi %c7_i32_87, %c4_i32 : i32
    %356 = arith.index_cast %355 : i32 to index
    %c0_88 = arith.constant 0 : index
    %c0_89 = arith.constant 0 : index
    %357 = vector.load %arg3[%356, %c0_88, %c0_89] : memref<8x8x96xbf16, #tpu.memory_space<vmem>>, vector<1x8x96xbf16>
    %358 = vector.shape_cast %357 : vector<1x8x96xbf16> to vector<8x96xbf16>
    %359 = arith.truncf %312 : vector<8x32xf32> to vector<8x32xbf16>
    %cst_90 = arith.constant dense<0.000000e+00> : vector<8x96xf32>
    %360 = tpu.matmul %359, %4, %cst_90 {dimension_numbers = #tpu.dot_dimension_numbers<[1], [0], [0], [1], [0, 0, 1, 1], [], []>} : vector<8x32xbf16>, vector<32x96xbf16>, vector<8x96xf32> -> vector<8x96xf32>
    %361 = vector.broadcast %6 : vector<1x96xf32> to vector<8x96xf32>
    %362 = arith.addf %360, %361 : vector<8x96xf32>
    %363 = arith.extf %358 : vector<8x96xbf16> to vector<8x96xf32>
    %364 = vector.extract_strided_slice %363 {offsets = [0, 0], sizes = [8, 32], strides = [1, 1]} : vector<8x96xf32> to vector<8x32xf32>
    %365 = vector.extract_strided_slice %362 {offsets = [0, 0], sizes = [8, 32], strides = [1, 1]} : vector<8x96xf32> to vector<8x32xf32>
    %366 = arith.addf %364, %365 : vector<8x32xf32>
    %367 = arith.negf %366 : vector<8x32xf32>
    %368 = math.exp %367 : vector<8x32xf32>
    %cst_91 = arith.constant 1.000000e+00 : f32
    %369 = vector.broadcast %cst_91 : f32 to vector<8x32xf32>
    %370 = arith.addf %369, %368 : vector<8x32xf32>
    %371 = arith.divf %369, %370 : vector<8x32xf32>
    %372 = vector.extract_strided_slice %363 {offsets = [0, 32], sizes = [8, 32], strides = [1, 1]} : vector<8x96xf32> to vector<8x32xf32>
    %373 = vector.extract_strided_slice %362 {offsets = [0, 32], sizes = [8, 32], strides = [1, 1]} : vector<8x96xf32> to vector<8x32xf32>
    %374 = arith.addf %372, %373 : vector<8x32xf32>
    %375 = arith.negf %374 : vector<8x32xf32>
    %376 = math.exp %375 : vector<8x32xf32>
    %cst_92 = arith.constant 1.000000e+00 : f32
    %377 = vector.broadcast %cst_92 : f32 to vector<8x32xf32>
    %378 = arith.addf %377, %376 : vector<8x32xf32>
    %379 = arith.divf %377, %378 : vector<8x32xf32>
    %380 = vector.extract_strided_slice %363 {offsets = [0, 64], sizes = [8, 32], strides = [1, 1]} : vector<8x96xf32> to vector<8x32xf32>
    %381 = vector.extract_strided_slice %362 {offsets = [0, 64], sizes = [8, 32], strides = [1, 1]} : vector<8x96xf32> to vector<8x32xf32>
    %382 = arith.mulf %371, %381 : vector<8x32xf32>
    %383 = arith.addf %380, %382 : vector<8x32xf32>
    %384 = math.tanh %383 : vector<8x32xf32>
    %cst_93 = arith.constant 1.000000e+00 : f32
    %385 = vector.broadcast %cst_93 : f32 to vector<8x32xf32>
    %386 = arith.subf %385, %379 : vector<8x32xf32>
    %387 = arith.mulf %386, %384 : vector<8x32xf32>
    %388 = arith.mulf %379, %312 : vector<8x32xf32>
    %389 = arith.addf %387, %388 : vector<8x32xf32>
    %390 = arith.index_cast %355 : i32 to index
    %c0_94 = arith.constant 0 : index
    %c0_95 = arith.constant 0 : index
    %391 = vector.load %arg11[%390, %c0_94, %c0_95] : memref<8x8x32xf32, #tpu.memory_space<vmem>>, vector<1x8x32xf32>
    %392 = vector.shape_cast %391 : vector<1x8x32xf32> to vector<8x32xf32>
    %393 = vector.shape_cast %389 : vector<8x32xf32> to vector<1x8x32xf32>
    tpu.vector_store %arg11[%390, %c0_94, %c0_95], %393 {strides = array<i32>} : memref<8x8x32xf32, #tpu.memory_space<vmem>>, vector<1x8x32xf32>,
    %c5_i32 = arith.constant 5 : i32
    %394 = arith.index_cast %c5_i32 : i32 to index
    %c0_96 = arith.constant 0 : index
    %c0_97 = arith.constant 0 : index
    %395 = vector.load %arg2[%394, %c0_96, %c0_97] : memref<8x8x96xbf16, #tpu.memory_space<vmem>>, vector<1x8x96xbf16>
    %396 = vector.shape_cast %395 : vector<1x8x96xbf16> to vector<8x96xbf16>
    %397 = arith.truncf %350 : vector<8x32xf32> to vector<8x32xbf16>
    %cst_98 = arith.constant dense<0.000000e+00> : vector<8x96xf32>
    %398 = tpu.matmul %397, %3, %cst_98 {dimension_numbers = #tpu.dot_dimension_numbers<[1], [0], [0], [1], [0, 0, 1, 1], [], []>} : vector<8x32xbf16>, vector<32x96xbf16>, vector<8x96xf32> -> vector<8x96xf32>
    %399 = vector.broadcast %5 : vector<1x96xf32> to vector<8x96xf32>
    %400 = arith.addf %398, %399 : vector<8x96xf32>
    %401 = arith.extf %396 : vector<8x96xbf16> to vector<8x96xf32>
    %402 = vector.extract_strided_slice %401 {offsets = [0, 0], sizes = [8, 32], strides = [1, 1]} : vector<8x96xf32> to vector<8x32xf32>
    %403 = vector.extract_strided_slice %400 {offsets = [0, 0], sizes = [8, 32], strides = [1, 1]} : vector<8x96xf32> to vector<8x32xf32>
    %404 = arith.addf %402, %403 : vector<8x32xf32>
    %405 = arith.negf %404 : vector<8x32xf32>
    %406 = math.exp %405 : vector<8x32xf32>
    %cst_99 = arith.constant 1.000000e+00 : f32
    %407 = vector.broadcast %cst_99 : f32 to vector<8x32xf32>
    %408 = arith.addf %407, %406 : vector<8x32xf32>
    %409 = arith.divf %407, %408 : vector<8x32xf32>
    %410 = vector.extract_strided_slice %401 {offsets = [0, 32], sizes = [8, 32], strides = [1, 1]} : vector<8x96xf32> to vector<8x32xf32>
    %411 = vector.extract_strided_slice %400 {offsets = [0, 32], sizes = [8, 32], strides = [1, 1]} : vector<8x96xf32> to vector<8x32xf32>
    %412 = arith.addf %410, %411 : vector<8x32xf32>
    %413 = arith.negf %412 : vector<8x32xf32>
    %414 = math.exp %413 : vector<8x32xf32>
    %cst_100 = arith.constant 1.000000e+00 : f32
    %415 = vector.broadcast %cst_100 : f32 to vector<8x32xf32>
    %416 = arith.addf %415, %414 : vector<8x32xf32>
    %417 = arith.divf %415, %416 : vector<8x32xf32>
    %418 = vector.extract_strided_slice %401 {offsets = [0, 64], sizes = [8, 32], strides = [1, 1]} : vector<8x96xf32> to vector<8x32xf32>
    %419 = vector.extract_strided_slice %400 {offsets = [0, 64], sizes = [8, 32], strides = [1, 1]} : vector<8x96xf32> to vector<8x32xf32>
    %420 = arith.mulf %409, %419 : vector<8x32xf32>
    %421 = arith.addf %418, %420 : vector<8x32xf32>
    %422 = math.tanh %421 : vector<8x32xf32>
    %cst_101 = arith.constant 1.000000e+00 : f32
    %423 = vector.broadcast %cst_101 : f32 to vector<8x32xf32>
    %424 = arith.subf %423, %417 : vector<8x32xf32>
    %425 = arith.mulf %424, %422 : vector<8x32xf32>
    %426 = arith.mulf %417, %350 : vector<8x32xf32>
    %427 = arith.addf %425, %426 : vector<8x32xf32>
    %428 = arith.index_cast %c5_i32 : i32 to index
    %c0_102 = arith.constant 0 : index
    %c0_103 = arith.constant 0 : index
    %429 = vector.load %arg10[%428, %c0_102, %c0_103] : memref<8x8x32xf32, #tpu.memory_space<vmem>>, vector<1x8x32xf32>
    %430 = vector.shape_cast %429 : vector<1x8x32xf32> to vector<8x32xf32>
    %431 = vector.shape_cast %427 : vector<8x32xf32> to vector<1x8x32xf32>
    tpu.vector_store %arg10[%428, %c0_102, %c0_103], %431 {strides = array<i32>} : memref<8x8x32xf32, #tpu.memory_space<vmem>>, vector<1x8x32xf32>,
    %c7_i32_104 = arith.constant 7 : i32
    %432 = arith.subi %c7_i32_104, %c5_i32 : i32
    %433 = arith.index_cast %432 : i32 to index
    %c0_105 = arith.constant 0 : index
    %c0_106 = arith.constant 0 : index
    %434 = vector.load %arg3[%433, %c0_105, %c0_106] : memref<8x8x96xbf16, #tpu.memory_space<vmem>>, vector<1x8x96xbf16>
    %435 = vector.shape_cast %434 : vector<1x8x96xbf16> to vector<8x96xbf16>
    %436 = arith.truncf %389 : vector<8x32xf32> to vector<8x32xbf16>
    %cst_107 = arith.constant dense<0.000000e+00> : vector<8x96xf32>
    %437 = tpu.matmul %436, %4, %cst_107 {dimension_numbers = #tpu.dot_dimension_numbers<[1], [0], [0], [1], [0, 0, 1, 1], [], []>} : vector<8x32xbf16>, vector<32x96xbf16>, vector<8x96xf32> -> vector<8x96xf32>
    %438 = vector.broadcast %6 : vector<1x96xf32> to vector<8x96xf32>
    %439 = arith.addf %437, %438 : vector<8x96xf32>
    %440 = arith.extf %435 : vector<8x96xbf16> to vector<8x96xf32>
    %441 = vector.extract_strided_slice %440 {offsets = [0, 0], sizes = [8, 32], strides = [1, 1]} : vector<8x96xf32> to vector<8x32xf32>
    %442 = vector.extract_strided_slice %439 {offsets = [0, 0], sizes = [8, 32], strides = [1, 1]} : vector<8x96xf32> to vector<8x32xf32>
    %443 = arith.addf %441, %442 : vector<8x32xf32>
    %444 = arith.negf %443 : vector<8x32xf32>
    %445 = math.exp %444 : vector<8x32xf32>
    %cst_108 = arith.constant 1.000000e+00 : f32
    %446 = vector.broadcast %cst_108 : f32 to vector<8x32xf32>
    %447 = arith.addf %446, %445 : vector<8x32xf32>
    %448 = arith.divf %446, %447 : vector<8x32xf32>
    %449 = vector.extract_strided_slice %440 {offsets = [0, 32], sizes = [8, 32], strides = [1, 1]} : vector<8x96xf32> to vector<8x32xf32>
    %450 = vector.extract_strided_slice %439 {offsets = [0, 32], sizes = [8, 32], strides = [1, 1]} : vector<8x96xf32> to vector<8x32xf32>
    %451 = arith.addf %449, %450 : vector<8x32xf32>
    %452 = arith.negf %451 : vector<8x32xf32>
    %453 = math.exp %452 : vector<8x32xf32>
    %cst_109 = arith.constant 1.000000e+00 : f32
    %454 = vector.broadcast %cst_109 : f32 to vector<8x32xf32>
    %455 = arith.addf %454, %453 : vector<8x32xf32>
    %456 = arith.divf %454, %455 : vector<8x32xf32>
    %457 = vector.extract_strided_slice %440 {offsets = [0, 64], sizes = [8, 32], strides = [1, 1]} : vector<8x96xf32> to vector<8x32xf32>
    %458 = vector.extract_strided_slice %439 {offsets = [0, 64], sizes = [8, 32], strides = [1, 1]} : vector<8x96xf32> to vector<8x32xf32>
    %459 = arith.mulf %448, %458 : vector<8x32xf32>
    %460 = arith.addf %457, %459 : vector<8x32xf32>
    %461 = math.tanh %460 : vector<8x32xf32>
    %cst_110 = arith.constant 1.000000e+00 : f32
    %462 = vector.broadcast %cst_110 : f32 to vector<8x32xf32>
    %463 = arith.subf %462, %456 : vector<8x32xf32>
    %464 = arith.mulf %463, %461 : vector<8x32xf32>
    %465 = arith.mulf %456, %389 : vector<8x32xf32>
    %466 = arith.addf %464, %465 : vector<8x32xf32>
    %467 = arith.index_cast %432 : i32 to index
    %c0_111 = arith.constant 0 : index
    %c0_112 = arith.constant 0 : index
    %468 = vector.load %arg11[%467, %c0_111, %c0_112] : memref<8x8x32xf32, #tpu.memory_space<vmem>>, vector<1x8x32xf32>
    %469 = vector.shape_cast %468 : vector<1x8x32xf32> to vector<8x32xf32>
    %470 = vector.shape_cast %466 : vector<8x32xf32> to vector<1x8x32xf32>
    tpu.vector_store %arg11[%467, %c0_111, %c0_112], %470 {strides = array<i32>} : memref<8x8x32xf32, #tpu.memory_space<vmem>>, vector<1x8x32xf32>,
    %c6_i32 = arith.constant 6 : i32
    %471 = arith.index_cast %c6_i32 : i32 to index
    %c0_113 = arith.constant 0 : index
    %c0_114 = arith.constant 0 : index
    %472 = vector.load %arg2[%471, %c0_113, %c0_114] : memref<8x8x96xbf16, #tpu.memory_space<vmem>>, vector<1x8x96xbf16>
    %473 = vector.shape_cast %472 : vector<1x8x96xbf16> to vector<8x96xbf16>
    %474 = arith.truncf %427 : vector<8x32xf32> to vector<8x32xbf16>
    %cst_115 = arith.constant dense<0.000000e+00> : vector<8x96xf32>
    %475 = tpu.matmul %474, %3, %cst_115 {dimension_numbers = #tpu.dot_dimension_numbers<[1], [0], [0], [1], [0, 0, 1, 1], [], []>} : vector<8x32xbf16>, vector<32x96xbf16>, vector<8x96xf32> -> vector<8x96xf32>
    %476 = vector.broadcast %5 : vector<1x96xf32> to vector<8x96xf32>
    %477 = arith.addf %475, %476 : vector<8x96xf32>
    %478 = arith.extf %473 : vector<8x96xbf16> to vector<8x96xf32>
    %479 = vector.extract_strided_slice %478 {offsets = [0, 0], sizes = [8, 32], strides = [1, 1]} : vector<8x96xf32> to vector<8x32xf32>
    %480 = vector.extract_strided_slice %477 {offsets = [0, 0], sizes = [8, 32], strides = [1, 1]} : vector<8x96xf32> to vector<8x32xf32>
    %481 = arith.addf %479, %480 : vector<8x32xf32>
    %482 = arith.negf %481 : vector<8x32xf32>
    %483 = math.exp %482 : vector<8x32xf32>
    %cst_116 = arith.constant 1.000000e+00 : f32
    %484 = vector.broadcast %cst_116 : f32 to vector<8x32xf32>
    %485 = arith.addf %484, %483 : vector<8x32xf32>
    %486 = arith.divf %484, %485 : vector<8x32xf32>
    %487 = vector.extract_strided_slice %478 {offsets = [0, 32], sizes = [8, 32], strides = [1, 1]} : vector<8x96xf32> to vector<8x32xf32>
    %488 = vector.extract_strided_slice %477 {offsets = [0, 32], sizes = [8, 32], strides = [1, 1]} : vector<8x96xf32> to vector<8x32xf32>
    %489 = arith.addf %487, %488 : vector<8x32xf32>
    %490 = arith.negf %489 : vector<8x32xf32>
    %491 = math.exp %490 : vector<8x32xf32>
    %cst_117 = arith.constant 1.000000e+00 : f32
    %492 = vector.broadcast %cst_117 : f32 to vector<8x32xf32>
    %493 = arith.addf %492, %491 : vector<8x32xf32>
    %494 = arith.divf %492, %493 : vector<8x32xf32>
    %495 = vector.extract_strided_slice %478 {offsets = [0, 64], sizes = [8, 32], strides = [1, 1]} : vector<8x96xf32> to vector<8x32xf32>
    %496 = vector.extract_strided_slice %477 {offsets = [0, 64], sizes = [8, 32], strides = [1, 1]} : vector<8x96xf32> to vector<8x32xf32>
    %497 = arith.mulf %486, %496 : vector<8x32xf32>
    %498 = arith.addf %495, %497 : vector<8x32xf32>
    %499 = math.tanh %498 : vector<8x32xf32>
    %cst_118 = arith.constant 1.000000e+00 : f32
    %500 = vector.broadcast %cst_118 : f32 to vector<8x32xf32>
    %501 = arith.subf %500, %494 : vector<8x32xf32>
    %502 = arith.mulf %501, %499 : vector<8x32xf32>
    %503 = arith.mulf %494, %427 : vector<8x32xf32>
    %504 = arith.addf %502, %503 : vector<8x32xf32>
    %505 = arith.index_cast %c6_i32 : i32 to index
    %c0_119 = arith.constant 0 : index
    %c0_120 = arith.constant 0 : index
    %506 = vector.load %arg10[%505, %c0_119, %c0_120] : memref<8x8x32xf32, #tpu.memory_space<vmem>>, vector<1x8x32xf32>
    %507 = vector.shape_cast %506 : vector<1x8x32xf32> to vector<8x32xf32>
    %508 = vector.shape_cast %504 : vector<8x32xf32> to vector<1x8x32xf32>
    tpu.vector_store %arg10[%505, %c0_119, %c0_120], %508 {strides = array<i32>} : memref<8x8x32xf32, #tpu.memory_space<vmem>>, vector<1x8x32xf32>,
    %c7_i32_121 = arith.constant 7 : i32
    %509 = arith.subi %c7_i32_121, %c6_i32 : i32
    %510 = arith.index_cast %509 : i32 to index
    %c0_122 = arith.constant 0 : index
    %c0_123 = arith.constant 0 : index
    %511 = vector.load %arg3[%510, %c0_122, %c0_123] : memref<8x8x96xbf16, #tpu.memory_space<vmem>>, vector<1x8x96xbf16>
    %512 = vector.shape_cast %511 : vector<1x8x96xbf16> to vector<8x96xbf16>
    %513 = arith.truncf %466 : vector<8x32xf32> to vector<8x32xbf16>
    %cst_124 = arith.constant dense<0.000000e+00> : vector<8x96xf32>
    %514 = tpu.matmul %513, %4, %cst_124 {dimension_numbers = #tpu.dot_dimension_numbers<[1], [0], [0], [1], [0, 0, 1, 1], [], []>} : vector<8x32xbf16>, vector<32x96xbf16>, vector<8x96xf32> -> vector<8x96xf32>
    %515 = vector.broadcast %6 : vector<1x96xf32> to vector<8x96xf32>
    %516 = arith.addf %514, %515 : vector<8x96xf32>
    %517 = arith.extf %512 : vector<8x96xbf16> to vector<8x96xf32>
    %518 = vector.extract_strided_slice %517 {offsets = [0, 0], sizes = [8, 32], strides = [1, 1]} : vector<8x96xf32> to vector<8x32xf32>
    %519 = vector.extract_strided_slice %516 {offsets = [0, 0], sizes = [8, 32], strides = [1, 1]} : vector<8x96xf32> to vector<8x32xf32>
    %520 = arith.addf %518, %519 : vector<8x32xf32>
    %521 = arith.negf %520 : vector<8x32xf32>
    %522 = math.exp %521 : vector<8x32xf32>
    %cst_125 = arith.constant 1.000000e+00 : f32
    %523 = vector.broadcast %cst_125 : f32 to vector<8x32xf32>
    %524 = arith.addf %523, %522 : vector<8x32xf32>
    %525 = arith.divf %523, %524 : vector<8x32xf32>
    %526 = vector.extract_strided_slice %517 {offsets = [0, 32], sizes = [8, 32], strides = [1, 1]} : vector<8x96xf32> to vector<8x32xf32>
    %527 = vector.extract_strided_slice %516 {offsets = [0, 32], sizes = [8, 32], strides = [1, 1]} : vector<8x96xf32> to vector<8x32xf32>
    %528 = arith.addf %526, %527 : vector<8x32xf32>
    %529 = arith.negf %528 : vector<8x32xf32>
    %530 = math.exp %529 : vector<8x32xf32>
    %cst_126 = arith.constant 1.000000e+00 : f32
    %531 = vector.broadcast %cst_126 : f32 to vector<8x32xf32>
    %532 = arith.addf %531, %530 : vector<8x32xf32>
    %533 = arith.divf %531, %532 : vector<8x32xf32>
    %534 = vector.extract_strided_slice %517 {offsets = [0, 64], sizes = [8, 32], strides = [1, 1]} : vector<8x96xf32> to vector<8x32xf32>
    %535 = vector.extract_strided_slice %516 {offsets = [0, 64], sizes = [8, 32], strides = [1, 1]} : vector<8x96xf32> to vector<8x32xf32>
    %536 = arith.mulf %525, %535 : vector<8x32xf32>
    %537 = arith.addf %534, %536 : vector<8x32xf32>
    %538 = math.tanh %537 : vector<8x32xf32>
    %cst_127 = arith.constant 1.000000e+00 : f32
    %539 = vector.broadcast %cst_127 : f32 to vector<8x32xf32>
    %540 = arith.subf %539, %533 : vector<8x32xf32>
    %541 = arith.mulf %540, %538 : vector<8x32xf32>
    %542 = arith.mulf %533, %466 : vector<8x32xf32>
    %543 = arith.addf %541, %542 : vector<8x32xf32>
    %544 = arith.index_cast %509 : i32 to index
    %c0_128 = arith.constant 0 : index
    %c0_129 = arith.constant 0 : index
    %545 = vector.load %arg11[%544, %c0_128, %c0_129] : memref<8x8x32xf32, #tpu.memory_space<vmem>>, vector<1x8x32xf32>
    %546 = vector.shape_cast %545 : vector<1x8x32xf32> to vector<8x32xf32>
    %547 = vector.shape_cast %543 : vector<8x32xf32> to vector<1x8x32xf32>
    tpu.vector_store %arg11[%544, %c0_128, %c0_129], %547 {strides = array<i32>} : memref<8x8x32xf32, #tpu.memory_space<vmem>>, vector<1x8x32xf32>,
    %c7_i32_130 = arith.constant 7 : i32
    %548 = arith.index_cast %c7_i32_130 : i32 to index
    %c0_131 = arith.constant 0 : index
    %c0_132 = arith.constant 0 : index
    %549 = vector.load %arg2[%548, %c0_131, %c0_132] : memref<8x8x96xbf16, #tpu.memory_space<vmem>>, vector<1x8x96xbf16>
    %550 = vector.shape_cast %549 : vector<1x8x96xbf16> to vector<8x96xbf16>
    %551 = arith.truncf %504 : vector<8x32xf32> to vector<8x32xbf16>
    %cst_133 = arith.constant dense<0.000000e+00> : vector<8x96xf32>
    %552 = tpu.matmul %551, %3, %cst_133 {dimension_numbers = #tpu.dot_dimension_numbers<[1], [0], [0], [1], [0, 0, 1, 1], [], []>} : vector<8x32xbf16>, vector<32x96xbf16>, vector<8x96xf32> -> vector<8x96xf32>
    %553 = vector.broadcast %5 : vector<1x96xf32> to vector<8x96xf32>
    %554 = arith.addf %552, %553 : vector<8x96xf32>
    %555 = arith.extf %550 : vector<8x96xbf16> to vector<8x96xf32>
    %556 = vector.extract_strided_slice %555 {offsets = [0, 0], sizes = [8, 32], strides = [1, 1]} : vector<8x96xf32> to vector<8x32xf32>
    %557 = vector.extract_strided_slice %554 {offsets = [0, 0], sizes = [8, 32], strides = [1, 1]} : vector<8x96xf32> to vector<8x32xf32>
    %558 = arith.addf %556, %557 : vector<8x32xf32>
    %559 = arith.negf %558 : vector<8x32xf32>
    %560 = math.exp %559 : vector<8x32xf32>
    %cst_134 = arith.constant 1.000000e+00 : f32
    %561 = vector.broadcast %cst_134 : f32 to vector<8x32xf32>
    %562 = arith.addf %561, %560 : vector<8x32xf32>
    %563 = arith.divf %561, %562 : vector<8x32xf32>
    %564 = vector.extract_strided_slice %555 {offsets = [0, 32], sizes = [8, 32], strides = [1, 1]} : vector<8x96xf32> to vector<8x32xf32>
    %565 = vector.extract_strided_slice %554 {offsets = [0, 32], sizes = [8, 32], strides = [1, 1]} : vector<8x96xf32> to vector<8x32xf32>
    %566 = arith.addf %564, %565 : vector<8x32xf32>
    %567 = arith.negf %566 : vector<8x32xf32>
    %568 = math.exp %567 : vector<8x32xf32>
    %cst_135 = arith.constant 1.000000e+00 : f32
    %569 = vector.broadcast %cst_135 : f32 to vector<8x32xf32>
    %570 = arith.addf %569, %568 : vector<8x32xf32>
    %571 = arith.divf %569, %570 : vector<8x32xf32>
    %572 = vector.extract_strided_slice %555 {offsets = [0, 64], sizes = [8, 32], strides = [1, 1]} : vector<8x96xf32> to vector<8x32xf32>
    %573 = vector.extract_strided_slice %554 {offsets = [0, 64], sizes = [8, 32], strides = [1, 1]} : vector<8x96xf32> to vector<8x32xf32>
    %574 = arith.mulf %563, %573 : vector<8x32xf32>
    %575 = arith.addf %572, %574 : vector<8x32xf32>
    %576 = math.tanh %575 : vector<8x32xf32>
    %cst_136 = arith.constant 1.000000e+00 : f32
    %577 = vector.broadcast %cst_136 : f32 to vector<8x32xf32>
    %578 = arith.subf %577, %571 : vector<8x32xf32>
    %579 = arith.mulf %578, %576 : vector<8x32xf32>
    %580 = arith.mulf %571, %504 : vector<8x32xf32>
    %581 = arith.addf %579, %580 : vector<8x32xf32>
    %582 = arith.index_cast %c7_i32_130 : i32 to index
    %c0_137 = arith.constant 0 : index
    %c0_138 = arith.constant 0 : index
    %583 = vector.load %arg10[%582, %c0_137, %c0_138] : memref<8x8x32xf32, #tpu.memory_space<vmem>>, vector<1x8x32xf32>
    %584 = vector.shape_cast %583 : vector<1x8x32xf32> to vector<8x32xf32>
    %585 = vector.shape_cast %581 : vector<8x32xf32> to vector<1x8x32xf32>
    tpu.vector_store %arg10[%582, %c0_137, %c0_138], %585 {strides = array<i32>} : memref<8x8x32xf32, #tpu.memory_space<vmem>>, vector<1x8x32xf32>,
    %c7_i32_139 = arith.constant 7 : i32
    %586 = arith.subi %c7_i32_139, %c7_i32_130 : i32
    %587 = arith.index_cast %586 : i32 to index
    %c0_140 = arith.constant 0 : index
    %c0_141 = arith.constant 0 : index
    %588 = vector.load %arg3[%587, %c0_140, %c0_141] : memref<8x8x96xbf16, #tpu.memory_space<vmem>>, vector<1x8x96xbf16>
    %589 = vector.shape_cast %588 : vector<1x8x96xbf16> to vector<8x96xbf16>
    %590 = arith.truncf %543 : vector<8x32xf32> to vector<8x32xbf16>
    %cst_142 = arith.constant dense<0.000000e+00> : vector<8x96xf32>
    %591 = tpu.matmul %590, %4, %cst_142 {dimension_numbers = #tpu.dot_dimension_numbers<[1], [0], [0], [1], [0, 0, 1, 1], [], []>} : vector<8x32xbf16>, vector<32x96xbf16>, vector<8x96xf32> -> vector<8x96xf32>
    %592 = vector.broadcast %6 : vector<1x96xf32> to vector<8x96xf32>
    %593 = arith.addf %591, %592 : vector<8x96xf32>
    %594 = arith.extf %589 : vector<8x96xbf16> to vector<8x96xf32>
    %595 = vector.extract_strided_slice %594 {offsets = [0, 0], sizes = [8, 32], strides = [1, 1]} : vector<8x96xf32> to vector<8x32xf32>
    %596 = vector.extract_strided_slice %593 {offsets = [0, 0], sizes = [8, 32], strides = [1, 1]} : vector<8x96xf32> to vector<8x32xf32>
    %597 = arith.addf %595, %596 : vector<8x32xf32>
    %598 = arith.negf %597 : vector<8x32xf32>
    %599 = math.exp %598 : vector<8x32xf32>
    %cst_143 = arith.constant 1.000000e+00 : f32
    %600 = vector.broadcast %cst_143 : f32 to vector<8x32xf32>
    %601 = arith.addf %600, %599 : vector<8x32xf32>
    %602 = arith.divf %600, %601 : vector<8x32xf32>
    %603 = vector.extract_strided_slice %594 {offsets = [0, 32], sizes = [8, 32], strides = [1, 1]} : vector<8x96xf32> to vector<8x32xf32>
    %604 = vector.extract_strided_slice %593 {offsets = [0, 32], sizes = [8, 32], strides = [1, 1]} : vector<8x96xf32> to vector<8x32xf32>
    %605 = arith.addf %603, %604 : vector<8x32xf32>
    %606 = arith.negf %605 : vector<8x32xf32>
    %607 = math.exp %606 : vector<8x32xf32>
    %cst_144 = arith.constant 1.000000e+00 : f32
    %608 = vector.broadcast %cst_144 : f32 to vector<8x32xf32>
    %609 = arith.addf %608, %607 : vector<8x32xf32>
    %610 = arith.divf %608, %609 : vector<8x32xf32>
    %611 = vector.extract_strided_slice %594 {offsets = [0, 64], sizes = [8, 32], strides = [1, 1]} : vector<8x96xf32> to vector<8x32xf32>
    %612 = vector.extract_strided_slice %593 {offsets = [0, 64], sizes = [8, 32], strides = [1, 1]} : vector<8x96xf32> to vector<8x32xf32>
    %613 = arith.mulf %602, %612 : vector<8x32xf32>
    %614 = arith.addf %611, %613 : vector<8x32xf32>
    %615 = math.tanh %614 : vector<8x32xf32>
    %cst_145 = arith.constant 1.000000e+00 : f32
    %616 = vector.broadcast %cst_145 : f32 to vector<8x32xf32>
    %617 = arith.subf %616, %610 : vector<8x32xf32>
    %618 = arith.mulf %617, %615 : vector<8x32xf32>
    %619 = arith.mulf %610, %543 : vector<8x32xf32>
    %620 = arith.addf %618, %619 : vector<8x32xf32>
    %621 = arith.index_cast %586 : i32 to index
    %c0_146 = arith.constant 0 : index
    %c0_147 = arith.constant 0 : index
    %622 = vector.load %arg11[%621, %c0_146, %c0_147] : memref<8x8x32xf32, #tpu.memory_space<vmem>>, vector<1x8x32xf32>
    %623 = vector.shape_cast %622 : vector<1x8x32xf32> to vector<8x32xf32>
    %624 = vector.shape_cast %620 : vector<8x32xf32> to vector<1x8x32xf32>
    tpu.vector_store %arg11[%621, %c0_146, %c0_147], %624 {strides = array<i32>} : memref<8x8x32xf32, #tpu.memory_space<vmem>>, vector<1x8x32xf32>,
    %c8_i32 = arith.constant 8 : i32
    %c0_148 = arith.constant 0 : index
    %c0_149 = arith.constant 0 : index
    %625 = vector.load %arg12[%c0_148, %c0_149] : memref<8x32xf32, #tpu.memory_space<vmem>>, vector<8x32xf32>
    tpu.vector_store %arg12[%c0_148, %c0_149], %581 {strides = array<i32>} : memref<8x32xf32, #tpu.memory_space<vmem>>, vector<8x32xf32>,
    %c0_150 = arith.constant 0 : index
    %c0_151 = arith.constant 0 : index
    %626 = vector.load %arg13[%c0_150, %c0_151] : memref<8x32xf32, #tpu.memory_space<vmem>>, vector<8x32xf32>
    tpu.vector_store %arg13[%c0_150, %c0_151], %620 {strides = array<i32>} : memref<8x32xf32, #tpu.memory_space<vmem>>, vector<8x32xf32>,
    return
  }
  func.func @transform_0(%arg0: i32, %arg1: i32) -> (i32, i32, i32) {
    %c0_i32 = arith.constant 0 : i32
    %c0_i32_0 = arith.constant 0 : i32
    return %arg1, %arg0, %c0_i32 : i32, i32, i32
  }
  func.func @transform_1(%arg0: i32, %arg1: i32) -> (i32, i32, i32) {
    %c0_i32 = arith.constant 0 : i32
    %0 = arith.subi %c0_i32, %arg1 : i32
    %c0_i32_0 = arith.constant 0 : i32
    %c0_i32_1 = arith.constant 0 : i32
    return %0, %arg0, %c0_i32_0 : i32, i32, i32
  }
  func.func @transform_2(%arg0: i32, %arg1: i32) -> (i32, i32) {
    %c0_i32 = arith.constant 0 : i32
    %c0_i32_0 = arith.constant 0 : i32
    return %arg0, %c0_i32 : i32, i32
  }
  func.func @transform_3(%arg0: i32, %arg1: i32) -> (i32, i32) {
    %c0_i32 = arith.constant 0 : i32
    %c0_i32_0 = arith.constant 0 : i32
    return %arg0, %c0_i32 : i32, i32
  }
  func.func @transform_4(%arg0: i32, %arg1: i32) -> (i32, i32) {
    %c0_i32 = arith.constant 0 : i32
    %c0_i32_0 = arith.constant 0 : i32
    %c0_i32_1 = arith.constant 0 : i32
    return %c0_i32, %c0_i32_0 : i32, i32
  }
  func.func @transform_5(%arg0: i32, %arg1: i32) -> (i32, i32) {
    %c0_i32 = arith.constant 0 : i32
    %c0_i32_0 = arith.constant 0 : i32
    %c0_i32_1 = arith.constant 0 : i32
    return %c0_i32, %c0_i32_0 : i32, i32
  }
  func.func @transform_6(%arg0: i32, %arg1: i32) -> (i32, i32) {
    %c0_i32 = arith.constant 0 : i32
    %c0_i32_0 = arith.constant 0 : i32
    %c0_i32_1 = arith.constant 0 : i32
    return %c0_i32, %c0_i32_0 : i32, i32
  }
  func.func @transform_7(%arg0: i32, %arg1: i32) -> (i32, i32) {
    %c0_i32 = arith.constant 0 : i32
    %c0_i32_0 = arith.constant 0 : i32
    %c0_i32_1 = arith.constant 0 : i32
    return %c0_i32, %c0_i32_0 : i32, i32
  }
  func.func @transform_8(%arg0: i32, %arg1: i32) -> (i32, i32, i32) {
    %c0_i32 = arith.constant 0 : i32
    %c0_i32_0 = arith.constant 0 : i32
    return %arg1, %arg0, %c0_i32 : i32, i32, i32
  }
  func.func @transform_9(%arg0: i32, %arg1: i32) -> (i32, i32, i32) {
    %c0_i32 = arith.constant 0 : i32
    %0 = arith.subi %c0_i32, %arg1 : i32
    %c0_i32_0 = arith.constant 0 : i32
    %c0_i32_1 = arith.constant 0 : i32
    return %0, %arg0, %c0_i32_0 : i32, i32, i32
  }
}

module attributes {stable_mosaic.version = 11 : i64} {
  func.func @_self_attn_kernel(%arg0: i32, %arg1: memref<8x8x32xf32, #tpu.memory_space<vmem>>, %arg2: memref<8x8x32xf32, #tpu.memory_space<vmem>>, %arg3: memref<8x8x1xf32, #tpu.memory_space<vmem>>, %arg4: memref<32x16xbf16, #tpu.memory_space<vmem>>, %arg5: memref<32x16xbf16, #tpu.memory_space<vmem>>, %arg6: memref<16x4xbf16, #tpu.memory_space<vmem>>, %arg7: memref<8x4x64xf32, #tpu.memory_space<vmem>>, %arg8: memref<8x8x4xf32, #tpu.memory_space<vmem>>) attributes {dimension_semantics = [#tpu.dimension_semantics<parallel>], iteration_bounds = array<i64: 1>, scalar_prefetch = 0 : i64, scratch_operands = 0 : i64, tpu.core_type = #tpu.core_type<tc>, window_params = [{transform_indices = @transform_0, window_bounds = array<i64: 8, 8, 32>}, {transform_indices = @transform_1, window_bounds = array<i64: 8, 8, 32>}, {transform_indices = @transform_2, window_bounds = array<i64: 8, 8, 1>}, {pipeline_mode = #tpu.pipeline_mode<synchronous>, transform_indices = @transform_3, window_bounds = array<i64: 32, 16>}, {pipeline_mode = #tpu.pipeline_mode<synchronous>, transform_indices = @transform_4, window_bounds = array<i64: 32, 16>}, {pipeline_mode = #tpu.pipeline_mode<synchronous>, transform_indices = @transform_5, window_bounds = array<i64: 16, 4>}, {transform_indices = @transform_6, window_bounds = array<i64: 8, 4, 64>}, {transform_indices = @transform_7, window_bounds = array<i64: 8, 8, 4>}]} {
    %c0 = arith.constant 0 : index
    %c0_0 = arith.constant 0 : index
    %c0_1 = arith.constant 0 : index
    %0 = vector.load %arg1[%c0, %c0_0, %c0_1] : memref<8x8x32xf32, #tpu.memory_space<vmem>>, vector<8x8x32xf32>
    %c0_2 = arith.constant 0 : index
    %c0_3 = arith.constant 0 : index
    %c0_4 = arith.constant 0 : index
    %1 = vector.load %arg2[%c0_2, %c0_3, %c0_4] : memref<8x8x32xf32, #tpu.memory_space<vmem>>, vector<8x8x32xf32>
    %2 = vector.shape_cast %0 : vector<8x8x32xf32> to vector<64x32xf32>
    %3 = vector.shape_cast %1 : vector<8x8x32xf32> to vector<64x32xf32>
    %4 = arith.truncf %2 : vector<64x32xf32> to vector<64x32xbf16>
    %c0_5 = arith.constant 0 : index
    %c0_6 = arith.constant 0 : index
    %5 = vector.load %arg4[%c0_5, %c0_6] : memref<32x16xbf16, #tpu.memory_space<vmem>>, vector<32x16xbf16>
    %cst = arith.constant dense<0.000000e+00> : vector<64x16xf32>
    %6 = tpu.matmul %4, %5, %cst {dimension_numbers = #tpu.dot_dimension_numbers<[1], [0], [0], [1], [0, 0, 1, 1], [], []>} : vector<64x32xbf16>, vector<32x16xbf16>, vector<64x16xf32> -> vector<64x16xf32>
    %7 = arith.truncf %3 : vector<64x32xf32> to vector<64x32xbf16>
    %c0_7 = arith.constant 0 : index
    %c0_8 = arith.constant 0 : index
    %8 = vector.load %arg5[%c0_7, %c0_8] : memref<32x16xbf16, #tpu.memory_space<vmem>>, vector<32x16xbf16>
    %cst_9 = arith.constant dense<0.000000e+00> : vector<64x16xf32>
    %9 = tpu.matmul %7, %8, %cst_9 {dimension_numbers = #tpu.dot_dimension_numbers<[1], [0], [0], [1], [0, 0, 1, 1], [], []>} : vector<64x32xbf16>, vector<32x16xbf16>, vector<64x16xf32> -> vector<64x16xf32>
    %10 = arith.addf %6, %9 : vector<64x16xf32>
    %11 = math.tanh %10 : vector<64x16xf32>
    %12 = arith.truncf %11 : vector<64x16xf32> to vector<64x16xbf16>
    %c0_10 = arith.constant 0 : index
    %c0_11 = arith.constant 0 : index
    %13 = vector.load %arg6[%c0_10, %c0_11] : memref<16x4xbf16, #tpu.memory_space<vmem>>, vector<16x4xbf16>
    %cst_12 = arith.constant dense<0.000000e+00> : vector<64x4xf32>
    %14 = tpu.matmul %12, %13, %cst_12 {dimension_numbers = #tpu.dot_dimension_numbers<[1], [0], [0], [1], [0, 0, 1, 1], [], []>} : vector<64x16xbf16>, vector<16x4xbf16>, vector<64x4xf32> -> vector<64x4xf32>
    %15 = vector.shape_cast %14 : vector<64x4xf32> to vector<8x8x4xf32>
    %c0_13 = arith.constant 0 : index
    %c0_14 = arith.constant 0 : index
    %c0_15 = arith.constant 0 : index
    %16 = vector.load %arg3[%c0_13, %c0_14, %c0_15] : memref<8x8x1xf32, #tpu.memory_space<vmem>>, vector<8x8x1xf32>
    %cst_16 = arith.constant 1.000000e+04 : f32
    %17 = vector.broadcast %cst_16 : f32 to vector<8x8x1xf32>
    %18 = arith.mulf %17, %16 : vector<8x8x1xf32>
    %19 = vector.broadcast %18 : vector<8x8x1xf32> to vector<8x8x4xf32>
    %20 = arith.subf %15, %19 : vector<8x8x4xf32>
    %cst_17 = arith.constant dense<0xFF800000> : vector<8x4xf32>
    %21 = vector.multi_reduction <maximumf>, %20, %cst_17 [0] : vector<8x8x4xf32> to vector<8x4xf32>
    %22 = vector.shape_cast %21 : vector<8x4xf32> to vector<1x8x4xf32>
    %23 = vector.broadcast %22 : vector<1x8x4xf32> to vector<8x8x4xf32>
    %24 = arith.subf %20, %23 : vector<8x8x4xf32>
    %25 = math.exp %24 : vector<8x8x4xf32>
    %cst_18 = arith.constant dense<0.000000e+00> : vector<8x4xf32>
    %26 = vector.multi_reduction <add>, %25, %cst_18 [0] : vector<8x8x4xf32> to vector<8x4xf32>
    %27 = vector.shape_cast %26 : vector<8x4xf32> to vector<1x8x4xf32>
    %28 = tpu.reciprocal %27 {approx = true} : vector<1x8x4xf32> -> vector<1x8x4xf32>
    %29 = vector.broadcast %28 : vector<1x8x4xf32> to vector<8x8x4xf32>
    %30 = arith.mulf %25, %29 : vector<8x8x4xf32>
    %c0_19 = arith.constant 0 : index
    %c0_20 = arith.constant 0 : index
    %c0_21 = arith.constant 0 : index
    %31 = vector.load %arg8[%c0_19, %c0_20, %c0_21] : memref<8x8x4xf32, #tpu.memory_space<vmem>>, vector<8x8x4xf32>
    tpu.vector_store %arg8[%c0_19, %c0_20, %c0_21], %30 {strides = array<i32>} : memref<8x8x4xf32, #tpu.memory_space<vmem>>, vector<8x8x4xf32>,
    %32 = vector.extract_strided_slice %30 {offsets = [0, 0, 0], sizes = [8, 8, 1], strides = [1, 1, 1]} : vector<8x8x4xf32> to vector<8x8x1xf32>
    %33 = vector.broadcast %32 : vector<8x8x1xf32> to vector<8x8x32xf32>
    %34 = arith.mulf %33, %0 : vector<8x8x32xf32>
    %cst_22 = arith.constant dense<0.000000e+00> : vector<8x32xf32>
    %35 = vector.multi_reduction <add>, %34, %cst_22 [0] : vector<8x8x32xf32> to vector<8x32xf32>
    %36 = vector.broadcast %32 : vector<8x8x1xf32> to vector<8x8x32xf32>
    %37 = arith.mulf %36, %1 : vector<8x8x32xf32>
    %cst_23 = arith.constant dense<0.000000e+00> : vector<8x32xf32>
    %38 = vector.multi_reduction <add>, %37, %cst_23 [0] : vector<8x8x32xf32> to vector<8x32xf32>
    %39 = tpu.concatenate %35, %38 in 1 : vector<8x32xf32>, vector<8x32xf32> -> vector<8x64xf32>
    %40 = vector.extract_strided_slice %30 {offsets = [0, 0, 1], sizes = [8, 8, 1], strides = [1, 1, 1]} : vector<8x8x4xf32> to vector<8x8x1xf32>
    %41 = vector.broadcast %40 : vector<8x8x1xf32> to vector<8x8x32xf32>
    %42 = arith.mulf %41, %0 : vector<8x8x32xf32>
    %cst_24 = arith.constant dense<0.000000e+00> : vector<8x32xf32>
    %43 = vector.multi_reduction <add>, %42, %cst_24 [0] : vector<8x8x32xf32> to vector<8x32xf32>
    %44 = vector.broadcast %40 : vector<8x8x1xf32> to vector<8x8x32xf32>
    %45 = arith.mulf %44, %1 : vector<8x8x32xf32>
    %cst_25 = arith.constant dense<0.000000e+00> : vector<8x32xf32>
    %46 = vector.multi_reduction <add>, %45, %cst_25 [0] : vector<8x8x32xf32> to vector<8x32xf32>
    %47 = tpu.concatenate %43, %46 in 1 : vector<8x32xf32>, vector<8x32xf32> -> vector<8x64xf32>
    %48 = vector.extract_strided_slice %30 {offsets = [0, 0, 2], sizes = [8, 8, 1], strides = [1, 1, 1]} : vector<8x8x4xf32> to vector<8x8x1xf32>
    %49 = vector.broadcast %48 : vector<8x8x1xf32> to vector<8x8x32xf32>
    %50 = arith.mulf %49, %0 : vector<8x8x32xf32>
    %cst_26 = arith.constant dense<0.000000e+00> : vector<8x32xf32>
    %51 = vector.multi_reduction <add>, %50, %cst_26 [0] : vector<8x8x32xf32> to vector<8x32xf32>
    %52 = vector.broadcast %48 : vector<8x8x1xf32> to vector<8x8x32xf32>
    %53 = arith.mulf %52, %1 : vector<8x8x32xf32>
    %cst_27 = arith.constant dense<0.000000e+00> : vector<8x32xf32>
    %54 = vector.multi_reduction <add>, %53, %cst_27 [0] : vector<8x8x32xf32> to vector<8x32xf32>
    %55 = tpu.concatenate %51, %54 in 1 : vector<8x32xf32>, vector<8x32xf32> -> vector<8x64xf32>
    %56 = vector.extract_strided_slice %30 {offsets = [0, 0, 3], sizes = [8, 8, 1], strides = [1, 1, 1]} : vector<8x8x4xf32> to vector<8x8x1xf32>
    %57 = vector.broadcast %56 : vector<8x8x1xf32> to vector<8x8x32xf32>
    %58 = arith.mulf %57, %0 : vector<8x8x32xf32>
    %cst_28 = arith.constant dense<0.000000e+00> : vector<8x32xf32>
    %59 = vector.multi_reduction <add>, %58, %cst_28 [0] : vector<8x8x32xf32> to vector<8x32xf32>
    %60 = vector.broadcast %56 : vector<8x8x1xf32> to vector<8x8x32xf32>
    %61 = arith.mulf %60, %1 : vector<8x8x32xf32>
    %cst_29 = arith.constant dense<0.000000e+00> : vector<8x32xf32>
    %62 = vector.multi_reduction <add>, %61, %cst_29 [0] : vector<8x8x32xf32> to vector<8x32xf32>
    %63 = tpu.concatenate %59, %62 in 1 : vector<8x32xf32>, vector<8x32xf32> -> vector<8x64xf32>
    %64 = vector.shape_cast %39 : vector<8x64xf32> to vector<8x1x64xf32>
    %65 = vector.shape_cast %47 : vector<8x64xf32> to vector<8x1x64xf32>
    %66 = vector.shape_cast %55 : vector<8x64xf32> to vector<8x1x64xf32>
    %67 = vector.shape_cast %63 : vector<8x64xf32> to vector<8x1x64xf32>
    %68 = tpu.concatenate %64, %65, %66, %67 in 1 : vector<8x1x64xf32>, vector<8x1x64xf32>, vector<8x1x64xf32>, vector<8x1x64xf32> -> vector<8x4x64xf32>
    %c0_30 = arith.constant 0 : index
    %c0_31 = arith.constant 0 : index
    %c0_32 = arith.constant 0 : index
    %69 = vector.load %arg7[%c0_30, %c0_31, %c0_32] : memref<8x4x64xf32, #tpu.memory_space<vmem>>, vector<8x4x64xf32>
    tpu.vector_store %arg7[%c0_30, %c0_31, %c0_32], %68 {strides = array<i32>} : memref<8x4x64xf32, #tpu.memory_space<vmem>>, vector<8x4x64xf32>,
    return
  }
  func.func @transform_0(%arg0: i32) -> (i32, i32, i32) {
    %c0_i32 = arith.constant 0 : i32
    %c0_i32_0 = arith.constant 0 : i32
    %c0_i32_1 = arith.constant 0 : i32
    return %c0_i32, %arg0, %c0_i32_0 : i32, i32, i32
  }
  func.func @transform_1(%arg0: i32) -> (i32, i32, i32) {
    %c0_i32 = arith.constant 0 : i32
    %c0_i32_0 = arith.constant 0 : i32
    %c0_i32_1 = arith.constant 0 : i32
    return %c0_i32, %arg0, %c0_i32_0 : i32, i32, i32
  }
  func.func @transform_2(%arg0: i32) -> (i32, i32, i32) {
    %c0_i32 = arith.constant 0 : i32
    %c0_i32_0 = arith.constant 0 : i32
    %c0_i32_1 = arith.constant 0 : i32
    return %c0_i32, %arg0, %c0_i32_0 : i32, i32, i32
  }
  func.func @transform_3(%arg0: i32) -> (i32, i32) {
    %c0_i32 = arith.constant 0 : i32
    %c0_i32_0 = arith.constant 0 : i32
    %c0_i32_1 = arith.constant 0 : i32
    return %c0_i32, %c0_i32_0 : i32, i32
  }
  func.func @transform_4(%arg0: i32) -> (i32, i32) {
    %c0_i32 = arith.constant 0 : i32
    %c0_i32_0 = arith.constant 0 : i32
    %c0_i32_1 = arith.constant 0 : i32
    return %c0_i32, %c0_i32_0 : i32, i32
  }
  func.func @transform_5(%arg0: i32) -> (i32, i32) {
    %c0_i32 = arith.constant 0 : i32
    %c0_i32_0 = arith.constant 0 : i32
    %c0_i32_1 = arith.constant 0 : i32
    return %c0_i32, %c0_i32_0 : i32, i32
  }
  func.func @transform_6(%arg0: i32) -> (i32, i32, i32) {
    %c0_i32 = arith.constant 0 : i32
    %c0_i32_0 = arith.constant 0 : i32
    %c0_i32_1 = arith.constant 0 : i32
    return %arg0, %c0_i32, %c0_i32_0 : i32, i32, i32
  }
  func.func @transform_7(%arg0: i32) -> (i32, i32, i32) {
    %c0_i32 = arith.constant 0 : i32
    %c0_i32_0 = arith.constant 0 : i32
    %c0_i32_1 = arith.constant 0 : i32
    return %c0_i32, %arg0, %c0_i32_0 : i32, i32, i32
  }
}

module attributes {stable_mosaic.version = 11 : i64} {
  func.func @_combine_hops_kernel(%arg0: i32, %arg1: memref<4x4x64xf32, #tpu.memory_space<vmem>>, %arg2: memref<4x4x64xf32, #tpu.memory_space<vmem>>, %arg3: memref<64x64xbf16, #tpu.memory_space<vmem>>, %arg4: memref<4x64xf32, #tpu.memory_space<vmem>>, %arg5: memref<4x64xf32, #tpu.memory_space<vmem>>, %arg6: memref<4x4xf32, #tpu.memory_space<vmem>>) attributes {dimension_semantics = [#tpu.dimension_semantics<parallel>], iteration_bounds = array<i64: 1>, scalar_prefetch = 0 : i64, scratch_operands = 0 : i64, tpu.core_type = #tpu.core_type<tc>, window_params = [{transform_indices = @transform_0, window_bounds = array<i64: 4, 4, 64>}, {transform_indices = @transform_1, window_bounds = array<i64: 4, 4, 64>}, {pipeline_mode = #tpu.pipeline_mode<synchronous>, transform_indices = @transform_2, window_bounds = array<i64: 64, 64>}, {transform_indices = @transform_3, window_bounds = array<i64: 4, 64>}, {transform_indices = @transform_4, window_bounds = array<i64: 4, 64>}, {transform_indices = @transform_5, window_bounds = array<i64: 4, 4>}]} {
    %c0 = arith.constant 0 : index
    %c0_0 = arith.constant 0 : index
    %c0_1 = arith.constant 0 : index
    %0 = vector.load %arg1[%c0, %c0_0, %c0_1] : memref<4x4x64xf32, #tpu.memory_space<vmem>>, vector<4x4x64xf32>
    %c0_2 = arith.constant 0 : index
    %c0_3 = arith.constant 0 : index
    %c0_4 = arith.constant 0 : index
    %1 = vector.load %arg2[%c0_2, %c0_3, %c0_4] : memref<4x4x64xf32, #tpu.memory_space<vmem>>, vector<4x4x64xf32>
    %c0_5 = arith.constant 0 : index
    %c0_6 = arith.constant 0 : index
    %2 = vector.load %arg3[%c0_5, %c0_6] : memref<64x64xbf16, #tpu.memory_space<vmem>>, vector<64x64xbf16>
    %3 = vector.extract_strided_slice %1 {offsets = [0, 0, 0], sizes = [4, 1, 64], strides = [1, 1, 1]} : vector<4x4x64xf32> to vector<4x1x64xf32>
    %4 = vector.shape_cast %3 : vector<4x1x64xf32> to vector<4x64xf32>
    %5 = arith.truncf %4 : vector<4x64xf32> to vector<4x64xbf16>
    %cst = arith.constant dense<0.000000e+00> : vector<4x64xf32>
    %6 = tpu.matmul %5, %2, %cst {dimension_numbers = #tpu.dot_dimension_numbers<[1], [0], [0], [1], [0, 0, 1, 1], [], []>} : vector<4x64xbf16>, vector<64x64xbf16>, vector<4x64xf32> -> vector<4x64xf32>
    %7 = vector.extract_strided_slice %1 {offsets = [0, 1, 0], sizes = [4, 1, 64], strides = [1, 1, 1]} : vector<4x4x64xf32> to vector<4x1x64xf32>
    %8 = vector.shape_cast %7 : vector<4x1x64xf32> to vector<4x64xf32>
    %9 = arith.truncf %8 : vector<4x64xf32> to vector<4x64xbf16>
    %cst_7 = arith.constant dense<0.000000e+00> : vector<4x64xf32>
    %10 = tpu.matmul %9, %2, %cst_7 {dimension_numbers = #tpu.dot_dimension_numbers<[1], [0], [0], [1], [0, 0, 1, 1], [], []>} : vector<4x64xbf16>, vector<64x64xbf16>, vector<4x64xf32> -> vector<4x64xf32>
    %11 = vector.extract_strided_slice %1 {offsets = [0, 2, 0], sizes = [4, 1, 64], strides = [1, 1, 1]} : vector<4x4x64xf32> to vector<4x1x64xf32>
    %12 = vector.shape_cast %11 : vector<4x1x64xf32> to vector<4x64xf32>
    %13 = arith.truncf %12 : vector<4x64xf32> to vector<4x64xbf16>
    %cst_8 = arith.constant dense<0.000000e+00> : vector<4x64xf32>
    %14 = tpu.matmul %13, %2, %cst_8 {dimension_numbers = #tpu.dot_dimension_numbers<[1], [0], [0], [1], [0, 0, 1, 1], [], []>} : vector<4x64xbf16>, vector<64x64xbf16>, vector<4x64xf32> -> vector<4x64xf32>
    %15 = vector.extract_strided_slice %1 {offsets = [0, 3, 0], sizes = [4, 1, 64], strides = [1, 1, 1]} : vector<4x4x64xf32> to vector<4x1x64xf32>
    %16 = vector.shape_cast %15 : vector<4x1x64xf32> to vector<4x64xf32>
    %17 = arith.truncf %16 : vector<4x64xf32> to vector<4x64xbf16>
    %cst_9 = arith.constant dense<0.000000e+00> : vector<4x64xf32>
    %18 = tpu.matmul %17, %2, %cst_9 {dimension_numbers = #tpu.dot_dimension_numbers<[1], [0], [0], [1], [0, 0, 1, 1], [], []>} : vector<4x64xbf16>, vector<64x64xbf16>, vector<4x64xf32> -> vector<4x64xf32>
    %19 = vector.shape_cast %6 : vector<4x64xf32> to vector<4x1x64xf32>
    %20 = vector.shape_cast %10 : vector<4x64xf32> to vector<4x1x64xf32>
    %21 = vector.shape_cast %14 : vector<4x64xf32> to vector<4x1x64xf32>
    %22 = vector.shape_cast %18 : vector<4x64xf32> to vector<4x1x64xf32>
    %23 = tpu.concatenate %19, %20, %21, %22 in 1 : vector<4x1x64xf32>, vector<4x1x64xf32>, vector<4x1x64xf32>, vector<4x1x64xf32> -> vector<4x4x64xf32>
    %24 = arith.mulf %0, %23 : vector<4x4x64xf32>
    %cst_10 = arith.constant dense<0.000000e+00> : vector<4x4xf32>
    %25 = vector.multi_reduction <add>, %24, %cst_10 [2] : vector<4x4x64xf32> to vector<4x4xf32>
    %26 = math.tanh %25 : vector<4x4xf32>
    %cst_11 = arith.constant dense<0xFF800000> : vector<4xf32>
    %27 = vector.multi_reduction <maximumf>, %26, %cst_11 [1] : vector<4x4xf32> to vector<4xf32>
    %28 = vector.shape_cast %27 : vector<4xf32> to vector<4x1xf32>
    %29 = vector.broadcast %28 : vector<4x1xf32> to vector<4x4xf32>
    %30 = arith.subf %26, %29 : vector<4x4xf32>
    %31 = math.exp %30 : vector<4x4xf32>
    %cst_12 = arith.constant dense<0.000000e+00> : vector<4xf32>
    %32 = vector.multi_reduction <add>, %31, %cst_12 [1] : vector<4x4xf32> to vector<4xf32>
    %33 = vector.shape_cast %32 : vector<4xf32> to vector<4x1xf32>
    %34 = tpu.reciprocal %33 {approx = true} : vector<4x1xf32> -> vector<4x1xf32>
    %35 = vector.broadcast %34 : vector<4x1xf32> to vector<4x4xf32>
    %36 = arith.mulf %31, %35 : vector<4x4xf32>
    %37 = vector.shape_cast %36 : vector<4x4xf32> to vector<4x4x1xf32>
    %38 = vector.broadcast %37 : vector<4x4x1xf32> to vector<4x4x64xf32>
    %39 = arith.mulf %38, %0 : vector<4x4x64xf32>
    %cst_13 = arith.constant dense<0.000000e+00> : vector<4x64xf32>
    %40 = vector.multi_reduction <add>, %39, %cst_13 [1] : vector<4x4x64xf32> to vector<4x64xf32>
    %c0_14 = arith.constant 0 : index
    %c0_15 = arith.constant 0 : index
    %41 = vector.load %arg4[%c0_14, %c0_15] : memref<4x64xf32, #tpu.memory_space<vmem>>, vector<4x64xf32>
    tpu.vector_store %arg4[%c0_14, %c0_15], %40 {strides = array<i32>} : memref<4x64xf32, #tpu.memory_space<vmem>>, vector<4x64xf32>,
    %42 = vector.shape_cast %36 : vector<4x4xf32> to vector<4x4x1xf32>
    %43 = vector.broadcast %42 : vector<4x4x1xf32> to vector<4x4x64xf32>
    %44 = arith.mulf %43, %1 : vector<4x4x64xf32>
    %cst_16 = arith.constant dense<0.000000e+00> : vector<4x64xf32>
    %45 = vector.multi_reduction <add>, %44, %cst_16 [1] : vector<4x4x64xf32> to vector<4x64xf32>
    %c0_17 = arith.constant 0 : index
    %c0_18 = arith.constant 0 : index
    %46 = vector.load %arg5[%c0_17, %c0_18] : memref<4x64xf32, #tpu.memory_space<vmem>>, vector<4x64xf32>
    tpu.vector_store %arg5[%c0_17, %c0_18], %45 {strides = array<i32>} : memref<4x64xf32, #tpu.memory_space<vmem>>, vector<4x64xf32>,
    %c0_19 = arith.constant 0 : index
    %c0_20 = arith.constant 0 : index
    %47 = vector.load %arg6[%c0_19, %c0_20] : memref<4x4xf32, #tpu.memory_space<vmem>>, vector<4x4xf32>
    tpu.vector_store %arg6[%c0_19, %c0_20], %36 {strides = array<i32>} : memref<4x4xf32, #tpu.memory_space<vmem>>, vector<4x4xf32>,
    return
  }
  func.func @transform_0(%arg0: i32) -> (i32, i32, i32) {
    %c0_i32 = arith.constant 0 : i32
    %c0_i32_0 = arith.constant 0 : i32
    %c0_i32_1 = arith.constant 0 : i32
    return %arg0, %c0_i32, %c0_i32_0 : i32, i32, i32
  }
  func.func @transform_1(%arg0: i32) -> (i32, i32, i32) {
    %c0_i32 = arith.constant 0 : i32
    %c0_i32_0 = arith.constant 0 : i32
    %c0_i32_1 = arith.constant 0 : i32
    return %arg0, %c0_i32, %c0_i32_0 : i32, i32, i32
  }
  func.func @transform_2(%arg0: i32) -> (i32, i32) {
    %c0_i32 = arith.constant 0 : i32
    %c0_i32_0 = arith.constant 0 : i32
    %c0_i32_1 = arith.constant 0 : i32
    return %c0_i32, %c0_i32_0 : i32, i32
  }
  func.func @transform_3(%arg0: i32) -> (i32, i32) {
    %c0_i32 = arith.constant 0 : i32
    %c0_i32_0 = arith.constant 0 : i32
    return %arg0, %c0_i32 : i32, i32
  }
  func.func @transform_4(%arg0: i32) -> (i32, i32) {
    %c0_i32 = arith.constant 0 : i32
    %c0_i32_0 = arith.constant 0 : i32
    return %arg0, %c0_i32 : i32, i32
  }
  func.func @transform_5(%arg0: i32) -> (i32, i32) {
    %c0_i32 = arith.constant 0 : i32
    %c0_i32_0 = arith.constant 0 : i32
    return %arg0, %c0_i32 : i32, i32
  }
}

</mosaic_0001>

<bundles_post_ra>
// kernel: rnn_encoder_forward.6
= control target key start
LH: loop header
LB: loop body
LE: loop exit
PB: predicated region body
PF: predicated region fallthrough
CT: control target
= control target key end

     0   :  { %v325_v1 = vmov 0   ;;  %vm65_vm0 = vcmask 261120   ;;  %v35_v17 = vlaneseq  ;;  %vm183_vm1 = vcmask 781312   ;;  %s326_s16 = smov 32   ;;  %s475_s1 = inlined_call_operand.vmem [shape: bf16[32,192], index: 1, kind: input, shape index: {}]   ;;  %s476_s0 = inlined_call_operand.vmem [shape: f32[64,32], index: 0, kind: input, shape index: {}]   ;;  %s477_s2 = inlined_call_operand.vmem [shape: f32[1,192], index: 2, kind: input, shape index: {}]   ;;  %s478_s3 = inlined_call_operand.vmem [shape: bf16[64,96], index: 3, kind: output, shape index: {0}]   ;;  %s479_s4 = inlined_call_operand.vmem [shape: bf16[64,96], index: 4, kind: output, shape index: {1}]  }
   0x1   :  { %v319_v0 = vld [vmem:[%s475_s1 + $0x14] ss:$8 sps:$4 sm:$0xff]   ;;  %110 = vmatprep.mubr.bf16.mxu0 %v325_v1  ;;  %130 = vmatprep.mubr.bf16.mxu1 %v325_v1  ;;  %v321_v2 = vld [vmem:[%s475_s1 + $0x10] ss:$8 sps:$4 sm:$0xff]   ;;  %v322_v3 = vld [vmem:[%s475_s1 + $0x4] ss:$8 sps:$4 sm:$0xff]  }
   0x2   :  { %90 = vmatprep.subr.bf16.mxu0 %v319_v0  ;;  %313 = vmatprep.subr.bf16.mxu1 %v319_v0  ;;  %v324_v4 = vld [vmem:[%s475_s1] ss:$8 sps:$4 sm:$0xff]   ;;  %v19_v11 = vld [vmem:[%s476_s0 + $0x10] sm:$0xff]  ;;  %v20_v12 = vld [vmem:[%s476_s0 + $0x18] sm:$0xff]  ;;  %v36_v18 = vshrl.u32 %v35_v17, 7 }
   0x3   :  { %v17_v5 = vld [vmem:[%s476_s0] sm:$0xff]  ;;  %91 = vmatpush1.bf16.msra.mxu0 %v321_v2  ;;  %315 = vmatpush1.bf16.msra.mxu1 %v321_v2  ;;  %v18_v6 = vld [vmem:[%s476_s0 + $0x8] sm:$0xff]  ;;  %v23_v13 = vld [vmem:[%s476_s0 + $0x30] sm:$0xff]  ;;  %v26_v15 = vpack.c.bf16 %v20_v12, %v19_v11 }
   0x4   :  { %v21_v7 = vld [vmem:[%s476_s0 + $0x20] sm:$0xff]  ;;  %v22_v8 = vld [vmem:[%s476_s0 + $0x28] sm:$0xff]  ;;  %92 = vmatprep.subr.bf16.mxu0 %v322_v3  ;;  %314 = vmatprep.subr.bf16.mxu1 %v322_v3  ;;  %v25_v9 = vpack.c.bf16 %v18_v6, %v17_v5  ;;  %v24_v14 = vld [vmem:[%s476_s0 + $0x38] sm:$0xff]  ;;  %v37_v19 = vsub.s32 0, %v36_v18  ;;  %v41_v21 = vsub.s32 1, %v36_v18 }
   0x5   :  { %v27_v10 = vpack.c.bf16 %v22_v8, %v21_v7  ;;  %v28_v16 = vpack.c.bf16 %v24_v14, %v23_v13  ;;  %v33_v20 = vld [vmem:[%s477_s2] sm:$0x3] }
   0x6   :  { %v38_v22 = vrot.slane %v33_v20, %v37_v19  ;;  %v42_v23 = vrot.slane %v33_v20, %v41_v21 }
   0x7   :  { %93 = vmatpush1.bf16.msra.mxu0 %v324_v4  ;;  %316 = vmatpush1.bf16.msra.mxu1 %v324_v4 }
   0xa   :  { %277 = vmatmul.mubr.msk.bf16.vlgmr.msra.gmra.mxu0 %vm65_vm0, %v25_v9  ;;  %279 = vmatmul.mubr.msk.bf16.vlgmr.msra.gmra.mxu1 %vm65_vm0, %v27_v10 }
   0xb   :  { %120 = vmatprep.mubr.bf16.mxu0 %v325_v1  ;;  %140 = vmatprep.mubr.bf16.mxu1 %v325_v1 }
  0x12   :  { %278 = vmatmul.mubr.msk.bf16.gmra.mxu0 %vm65_vm0, %v26_v15  ;;  %280 = vmatmul.mubr.msk.bf16.gmra.mxu1 %vm65_vm0, %v28_v16 }
  0xca   :  { %v112_v24 = vpop.f32.mrf.mxu0  ;;  %v132_v25 = vpop.f32.mrf.mxu1 }
  0xcb   :  { %v113_v26 = vadd.f32 %v112_v24, %v38_v22  ;;  %v133_v27 = vadd.f32 %v132_v25, %v38_v22 }
  0xcc   :  { %v114_v28 = vpop.f32.mrf.mxu0  ;;  %v134_v29 = vpop.f32.mrf.mxu1 }
  0xcd   :  { %v297_v30 = vpack.c.bf16 %v113_v26, %v113_v26  ;;  %v301_v31 = vpack.c.bf16 %v133_v27, %v133_v27  ;;  %v115_v32 = vadd.f32 %v114_v28, %v42_v23  ;;  %v135_v38 = vadd.f32 %v134_v29, %v42_v23 }
  0xce   :  { %v116_v33 = vpop.f32.mrf.mxu0  ;;  %v136_v34 = vpop.f32.mrf.mxu1 }
  0xcf   :  { %184 = vst.msk [vmem:[%s478_s3] sm:$0xf] %vm183_vm1, %v297_v30  ;;  %188 = vst.msk [vmem:[%s478_s3 + $0x10] sm:$0xf] %vm183_vm1, %v301_v31  ;;  %v117_v35 = vadd.f32 %v116_v33, %v38_v22  ;;  %v137_v36 = vadd.f32 %v136_v34, %v38_v22  ;;  %v305_v37 = vpack.c.bf16 %v115_v32, %v113_v26 }
  0xd0   :  { %v118_v39 = vpop.f32.mrf.mxu0  ;;  %v138_v40 = vpop.f32.mrf.mxu1  ;;  %v309_v49 = vpack.c.bf16 %v135_v38, %v133_v27 }
  0xd1   :  { %v298_v41 = vpack.c.bf16 %v117_v35, %v117_v35  ;;  %v302_v42 = vpack.c.bf16 %v137_v36, %v137_v36  ;;  %v139_v43 = vadd.f32 %v138_v40, %v42_v23  ;;  %216 = vrot.lane.b32.xlu0 %v305_v37, %s326_s16  ;;  %v119_v50 = vadd.f32 %v118_v39, %v42_v23 }
  0xd2   :  { %v122_v44 = vpop.f32.mrf.mxu0  ;;  %v142_v45 = vpop.f32.mrf.mxu1 }
  0xd3   :  { %185 = vst.msk [vmem:[%s478_s3 + $0x4] sm:$0xf] %vm183_vm1, %v298_v41  ;;  %189 = vst.msk [vmem:[%s478_s3 + $0x14] sm:$0xf] %vm183_vm1, %v302_v42  ;;  %v123_v46 = vadd.f32 %v122_v44, %v38_v22  ;;  %v143_v47 = vadd.f32 %v142_v45, %v38_v22  ;;  %v310_v48 = vpack.c.bf16 %v139_v43, %v137_v36 }
  0xd4   :  { %v124_v51 = vpop.f32.mrf.mxu0  ;;  %v144_v52 = vpop.f32.mrf.mxu1  ;;  %v306_v61 = vpack.c.bf16 %v119_v50, %v117_v35 }
  0xd5   :  { %v299_v53 = vpack.c.bf16 %v123_v46, %v123_v46  ;;  %v303_v54 = vpack.c.bf16 %v143_v47, %v143_v47  ;;  %v125_v55 = vadd.f32 %v124_v51, %v42_v23  ;;  %226 = vrot.lane.b32.xlu1 %v310_v48, %s326_s16  ;;  %224 = vrot.lane.b32.xlu0 %v309_v49, %s326_s16 }
  0xd6   :  { %v126_v56 = vpop.f32.mrf.mxu0  ;;  %v146_v57 = vpop.f32.mrf.mxu1  ;;  %v145_v62 = vadd.f32 %v144_v52, %v42_v23 }
  0xd7   :  { %186 = vst.msk [vmem:[%s478_s3 + $0x8] sm:$0xf] %vm183_vm1, %v299_v53  ;;  %190 = vst.msk [vmem:[%s478_s3 + $0x18] sm:$0xf] %vm183_vm1, %v303_v54  ;;  %v307_v58 = vpack.c.bf16 %v125_v55, %v123_v46  ;;  %v127_v59 = vadd.f32 %v126_v56, %v38_v22  ;;  %v147_v60 = vadd.f32 %v146_v57, %v38_v22 }
  0xd8   :  { %v128_v63 = vpop.f32.mrf.mxu0  ;;  %v148_v0 = vpop.f32.mrf.mxu1  ;;  %v311_v6 = vpack.c.bf16 %v145_v62, %v143_v47 }
  0xd9   :  { %v300_v1 = vpack.c.bf16 %v127_v59, %v127_v59  ;;  %v304_v2 = vpack.c.bf16 %v147_v60, %v147_v60  ;;  %v129_v3 = vadd.f32 %v128_v63, %v42_v23  ;;  %220 = vrot.lane.b32.xlu1 %v307_v58, %s326_s16  ;;  %218 = vrot.lane.b32.xlu0 %v306_v61, %s326_s16 }
  0xda   :  { %v149_v5 = vadd.f32 %v148_v0, %v42_v23 }
  0xdb   :  { %187 = vst.msk [vmem:[%s478_s3 + $0xc] sm:$0xf] %vm183_vm1, %v300_v1  ;;  %191 = vst.msk [vmem:[%s478_s3 + $0x1c] sm:$0xf] %vm183_vm1, %v304_v2  ;;  %v308_v4 = vpack.c.bf16 %v129_v3, %v127_v59 }
  0xdc   :  { %v312_v7 = vpack.c.bf16 %v149_v5, %v147_v60 }
  0xdd   :  { %222 = vrot.lane.b32.xlu1 %v308_v4, %s326_s16  ;;  %228 = vrot.lane.b32.xlu0 %v311_v6, %s326_s16 }
  0xe1   :  { %230 = vrot.lane.b32.xlu1 %v312_v7, %s326_s16 }
 0x143   :  { %v217_v8 = vpop.permute.xlu0 %216 }
 0x144   :  { %v232_v9 = vrot.slane %v217_v8, 4 }
 0x146   :  { %v241_v10 = vsel %vm65_vm0, %v217_v8, %v232_v9 }
 0x147   :  { %257 = vst.msk [vmem:[%s479_s4] sm:$0xf] %vm183_vm1, %v241_v10  ;;  %v227_v11 = vpop.permute.xlu1 %226  ;;  %v225_v13 = vpop.permute.xlu0 %224 }
 0x148   :  { %v237_v12 = vrot.slane %v227_v11, 4  ;;  %v236_v14 = vrot.slane %v225_v13, 4 }
 0x14a   :  { %v246_v15 = vsel %vm65_vm0, %v227_v11, %v237_v12  ;;  %v245_v16 = vsel %vm65_vm0, %v225_v13, %v236_v14 }
 0x14b   :  { %262 = vst.msk [vmem:[%s479_s4 + $0x14] sm:$0xf] %vm183_vm1, %v246_v15  ;;  %v221_v17 = vpop.permute.xlu1 %220  ;;  %261 = vst.msk [vmem:[%s479_s4 + $0x10] sm:$0xf] %vm183_vm1, %v245_v16  ;;  %v219_v19 = vpop.permute.xlu0 %218 }
 0x14c   :  { %v234_v18 = vrot.slane %v221_v17, 4  ;;  %v233_v20 = vrot.slane %v219_v19, 4 }
 0x14e   :  { %v243_v21 = vsel %vm65_vm0, %v221_v17, %v234_v18  ;;  %v242_v22 = vsel %vm65_vm0, %v219_v19, %v233_v20 }
 0x14f   :  { %259 = vst.msk [vmem:[%s479_s4 + $0x8] sm:$0xf] %vm183_vm1, %v243_v21  ;;  %v223_v23 = vpop.permute.xlu1 %222  ;;  %258 = vst.msk [vmem:[%s479_s4 + $0x4] sm:$0xf] %vm183_vm1, %v242_v22  ;;  %v229_v25 = vpop.permute.xlu0 %228 }
 0x150   :  { %v235_v24 = vrot.slane %v223_v23, 4  ;;  %v238_v26 = vrot.slane %v229_v25, 4 }
 0x152   :  { %v244_v27 = vsel %vm65_vm0, %v223_v23, %v235_v24  ;;  %v247_v28 = vsel %vm65_vm0, %v229_v25, %v238_v26 }
 0x153   :  { %260 = vst.msk [vmem:[%s479_s4 + $0xc] sm:$0xf] %vm183_vm1, %v244_v27  ;;  %v231_v29 = vpop.permute.xlu1 %230  ;;  %263 = vst.msk [vmem:[%s479_s4 + $0x18] sm:$0xf] %vm183_vm1, %v247_v28 }
 0x154   :  { %v239_v30 = vrot.slane %v231_v29, 4 }
 0x156   :  { %v248_v31 = vsel %vm65_vm0, %v231_v29, %v239_v30 }
 0x157   :  { %264 = vst.msk [vmem:[%s479_s4 + $0x1c] sm:$0xf] %vm183_vm1, %v248_v31 }

// kernel: rnn_encoder_forward.8
= control target key start
LH: loop header
LB: loop body
LE: loop exit
PB: predicated region body
PF: predicated region fallthrough
CT: control target
= control target key end

     0   :  { %v478_v1 = vmov 0   ;;  %vm75_vm0 = vcmask 261120   ;;  %v268_v33 = vlaneseq  ;;  %vm326_vm1 = vcmask 781312   ;;  %s698_s3 = inlined_call_operand.vmem [shape: bf16[32,192], index: 3, kind: input, shape index: {}]   ;;  %s699_s2 = inlined_call_operand.vmem [shape: bf16[32,192], index: 2, kind: input, shape index: {}]   ;;  %s700_s1 = inlined_call_operand.vmem [shape: f32[64,32], index: 1, kind: input, shape index: {}]   ;;  %s701_s0 = inlined_call_operand.vmem [shape: f32[64,32], index: 0, kind: input, shape index: {}]   ;;  %s702_s4 = inlined_call_operand.vmem [shape: f32[1,192], index: 4, kind: input, shape index: {}]   ;;  %s703_s5 = inlined_call_operand.vmem [shape: bf16[64,96], index: 5, kind: output, shape index: {0}]   ;;  %s704_s6 = inlined_call_operand.vmem [shape: bf16[64,96], index: 6, kind: output, shape index: {1}]  }
   0x1   :  { %v466_v0 = vld [vmem:[%s698_s3 + $0x14] ss:$8 sps:$4 sm:$0xff]   ;;  %120 = vmatprep.mubr.bf16.mxu0 %v478_v1  ;;  %225 = vmatprep.mubr.bf16.mxu1 %v478_v1  ;;  %v470_v3 = vld [vmem:[%s698_s3 + $0x10] ss:$8 sps:$4 sm:$0xff]   ;;  %v472_v5 = vld [vmem:[%s698_s3 + $0x4] ss:$8 sps:$4 sm:$0xff]  }
   0x2   :  { %v468_v2 = vld [vmem:[%s699_s2 + $0x14] ss:$8 sps:$4 sm:$0xff]   ;;  %100 = vmatprep.subr.bf16.mxu0 %v466_v0  ;;  %v471_v4 = vld [vmem:[%s699_s2 + $0x10] ss:$8 sps:$4 sm:$0xff]   ;;  %v474_v6 = vld [vmem:[%s699_s2 + $0x4] ss:$8 sps:$4 sm:$0xff]  }
   0x3   :  { %205 = vmatprep.subr.bf16.mxu1 %v468_v2  ;;  %101 = vmatpush1.bf16.msra.mxu0 %v470_v3  ;;  %v476_v7 = vld [vmem:[%s698_s3] ss:$8 sps:$4 sm:$0xff]   ;;  %v41_v15 = vld [vmem:[%s700_s1 + $0x10] sm:$0xff]  ;;  %v42_v16 = vld [vmem:[%s700_s1 + $0x18] sm:$0xff]  ;;  %v269_v34 = vshrl.u32 %v268_v33, 7 }
   0x4   :  { %206 = vmatpush1.bf16.msra.mxu1 %v471_v4  ;;  %102 = vmatprep.subr.bf16.mxu0 %v472_v5  ;;  %v477_v8 = vld [vmem:[%s699_s2] ss:$8 sps:$4 sm:$0xff]   ;;  %v25_v17 = vld [vmem:[%s701_s0 + $0x10] sm:$0xff]  ;;  %v26_v18 = vld [vmem:[%s701_s0 + $0x18] sm:$0xff]  ;;  %v48_v19 = vpack.c.bf16 %v42_v16, %v41_v15 }
   0x5   :  { %v39_v9 = vld [vmem:[%s700_s1] sm:$0xff]  ;;  %v40_v10 = vld [vmem:[%s700_s1 + $0x8] sm:$0xff]  ;;  %207 = vmatprep.subr.bf16.mxu1 %v474_v6  ;;  %v32_v20 = vpack.c.bf16 %v26_v18, %v25_v17  ;;  %v45_v27 = vld [vmem:[%s700_s1 + $0x30] sm:$0xff]  ;;  %v270_v35 = vsub.s32 0, %v269_v34  ;;  %v274_v37 = vsub.s32 1, %v269_v34 }
   0x6   :  { %v23_v11 = vld [vmem:[%s701_s0] sm:$0xff]  ;;  %v24_v12 = vld [vmem:[%s701_s0 + $0x8] sm:$0xff]  ;;  %v47_v13 = vpack.c.bf16 %v40_v10, %v39_v9  ;;  %v46_v28 = vld [vmem:[%s700_s1 + $0x38] sm:$0xff] }
   0x7   :  { %v31_v14 = vpack.c.bf16 %v24_v12, %v23_v11  ;;  %103 = vmatpush1.bf16.msra.mxu0 %v476_v7  ;;  %v43_v21 = vld [vmem:[%s700_s1 + $0x20] sm:$0xff]  ;;  %v44_v22 = vld [vmem:[%s700_s1 + $0x28] sm:$0xff]  ;;  %v29_v29 = vld [vmem:[%s701_s0 + $0x30] sm:$0xff]  ;;  %v50_v31 = vpack.c.bf16 %v46_v28, %v45_v27 }
   0x8   :  { %208 = vmatpush1.bf16.msra.mxu1 %v477_v8  ;;  %v27_v23 = vld [vmem:[%s701_s0 + $0x20] sm:$0xff]  ;;  %v28_v24 = vld [vmem:[%s701_s0 + $0x28] sm:$0xff]  ;;  %v49_v25 = vpack.c.bf16 %v44_v22, %v43_v21  ;;  %v30_v30 = vld [vmem:[%s701_s0 + $0x38] sm:$0xff] }
   0x9   :  { %v33_v26 = vpack.c.bf16 %v28_v24, %v27_v23  ;;  %v34_v32 = vpack.c.bf16 %v30_v30, %v29_v29  ;;  %v266_v36 = vld [vmem:[%s702_s4] sm:$0x3]  ;;  %s479_s4 = smov 32  }
   0xa   :  { %420 = vmatmul.mubr.msk.bf16.vlgmr.msra.gmra.mxu0 %vm75_vm0, %v47_v13  ;;  %v598_v38 = vrot.slane %v266_v36, %v270_v35  ;;  %v600_v42 = vrot.slane %v266_v36, %v274_v37 }
   0xb   :  { %428 = vmatmul.mubr.msk.bf16.vlgmr.msra.gmra.mxu1 %vm75_vm0, %v31_v14  ;;  %130 = vmatprep.mubr.bf16.mxu0 %v478_v1 }
   0xc   :  { %235 = vmatprep.mubr.bf16.mxu1 %v478_v1 }
  0x12   :  { %421 = vmatmul.mubr.msk.bf16.gmra.mxu0 %vm75_vm0, %v48_v19 }
  0x13   :  { %429 = vmatmul.mubr.msk.bf16.gmra.mxu1 %vm75_vm0, %v32_v20  ;;  %140 = vmatprep.mubr.bf16.mxu0 %v478_v1 }
  0x14   :  { %245 = vmatprep.mubr.bf16.mxu1 %v478_v1 }
  0x1a   :  { %422 = vmatmul.mubr.msk.bf16.gmra.mxu0 %vm75_vm0, %v49_v25 }
  0x1b   :  { %430 = vmatmul.mubr.msk.bf16.gmra.mxu1 %vm75_vm0, %v33_v26  ;;  %150 = vmatprep.mubr.bf16.mxu0 %v478_v1 }
  0x1c   :  { %255 = vmatprep.mubr.bf16.mxu1 %v478_v1 }
  0x22   :  { %423 = vmatmul.mubr.msk.bf16.gmra.mxu0 %vm75_vm0, %v50_v31 }
  0x23   :  { %431 = vmatmul.mubr.msk.bf16.gmra.mxu1 %vm75_vm0, %v34_v32 }
  0xca   :  { %v122_v39 = vpop.f32.mrf.mxu0 }
  0xcb   :  { %v227_v40 = vpop.f32.mrf.mxu1 }
  0xcc   :  { %v228_v41 = vadd.f32 %v227_v40, %v122_v39  ;;  %v124_v43 = vpop.f32.mrf.mxu0 }
  0xcd   :  { %v229_v44 = vpop.f32.mrf.mxu1 }
  0xce   :  { %v278_v45 = vadd.f32 %v598_v38, %v228_v41  ;;  %v230_v46 = vadd.f32 %v229_v44, %v124_v43  ;;  %v126_v47 = vpop.f32.mrf.mxu0 }
  0xcf   :  { %v231_v48 = vpop.f32.mrf.mxu1 }
  0xd0   :  { %v448_v49 = vpack.c.bf16 %v278_v45, %v278_v45  ;;  %v279_v50 = vadd.f32 %v600_v42, %v230_v46  ;;  %v232_v51 = vadd.f32 %v231_v48, %v126_v47  ;;  %v128_v52 = vpop.f32.mrf.mxu0 }
  0xd1   :  { %v233_v53 = vpop.f32.mrf.mxu1 }
  0xd2   :  { %327 = vst.msk [vmem:[%s703_s5] sm:$0xf] %vm326_vm1, %v448_v49  ;;  %v280_v54 = vadd.f32 %v598_v38, %v232_v51  ;;  %v234_v55 = vadd.f32 %v233_v53, %v128_v52  ;;  %v456_v56 = vpack.c.bf16 %v279_v50, %v278_v45  ;;  %v132_v57 = vpop.f32.mrf.mxu0 }
  0xd3   :  { %v237_v58 = vpop.f32.mrf.mxu1 }
  0xd4   :  { %v449_v59 = vpack.c.bf16 %v280_v54, %v280_v54  ;;  %v281_v60 = vadd.f32 %v600_v42, %v234_v55  ;;  %v238_v61 = vadd.f32 %v237_v58, %v132_v57  ;;  %359 = vrot.lane.b32.xlu0 %v456_v56, %s479_s4  ;;  %v134_v62 = vpop.f32.mrf.mxu0 }
  0xd5   :  { %v239_v63 = vpop.f32.mrf.mxu1 }
  0xd6   :  { %328 = vst.msk [vmem:[%s703_s5 + $0x4] sm:$0xf] %vm326_vm1, %v449_v59  ;;  %v282_v0 = vadd.f32 %v598_v38, %v238_v61  ;;  %v240_v1 = vadd.f32 %v239_v63, %v134_v62  ;;  %v457_v2 = vpack.c.bf16 %v281_v60, %v280_v54  ;;  %v136_v3 = vpop.f32.mrf.mxu0 }
  0xd7   :  { %v241_v4 = vpop.f32.mrf.mxu1 }
  0xd8   :  { %v450_v5 = vpack.c.bf16 %v282_v0, %v282_v0  ;;  %v283_v6 = vadd.f32 %v600_v42, %v240_v1  ;;  %v242_v7 = vadd.f32 %v241_v4, %v136_v3  ;;  %361 = vrot.lane.b32.xlu0 %v457_v2, %s479_s4  ;;  %v138_v8 = vpop.f32.mrf.mxu0 }
  0xd9   :  { %v243_v9 = vpop.f32.mrf.mxu1 }
  0xda   :  { %329 = vst.msk [vmem:[%s703_s5 + $0x8] sm:$0xf] %vm326_vm1, %v450_v5  ;;  %v284_v10 = vadd.f32 %v598_v38, %v242_v7  ;;  %v244_v11 = vadd.f32 %v243_v9, %v138_v8  ;;  %v458_v12 = vpack.c.bf16 %v283_v6, %v282_v0  ;;  %v142_v13 = vpop.f32.mrf.mxu0 }
  0xdb   :  { %v247_v14 = vpop.f32.mrf.mxu1 }
  0xdc   :  { %v451_v15 = vpack.c.bf16 %v284_v10, %v284_v10  ;;  %v285_v16 = vadd.f32 %v600_v42, %v244_v11  ;;  %v248_v17 = vadd.f32 %v247_v14, %v142_v13  ;;  %363 = vrot.lane.b32.xlu1 %v458_v12, %s479_s4  ;;  %v144_v18 = vpop.f32.mrf.mxu0 }
  0xdd   :  { %v249_v19 = vpop.f32.mrf.mxu1 }
  0xde   :  { %330 = vst.msk [vmem:[%s703_s5 + $0xc] sm:$0xf] %vm326_vm1, %v451_v15  ;;  %v286_v20 = vadd.f32 %v598_v38, %v248_v17  ;;  %v250_v21 = vadd.f32 %v249_v19, %v144_v18  ;;  %v459_v22 = vpack.c.bf16 %v285_v16, %v284_v10  ;;  %v146_v23 = vpop.f32.mrf.mxu0 }
  0xdf   :  { %v251_v24 = vpop.f32.mrf.mxu1 }
  0xe0   :  { %v452_v25 = vpack.c.bf16 %v286_v20, %v286_v20  ;;  %v287_v26 = vadd.f32 %v600_v42, %v250_v21  ;;  %v252_v27 = vadd.f32 %v251_v24, %v146_v23  ;;  %365 = vrot.lane.b32.xlu1 %v459_v22, %s479_s4  ;;  %v148_v28 = vpop.f32.mrf.mxu0 }
  0xe1   :  { %v253_v29 = vpop.f32.mrf.mxu1 }
  0xe2   :  { %331 = vst.msk [vmem:[%s703_s5 + $0x10] sm:$0xf] %vm326_vm1, %v452_v25  ;;  %v288_v30 = vadd.f32 %v598_v38, %v252_v27  ;;  %v254_v31 = vadd.f32 %v253_v29, %v148_v28  ;;  %v460_v32 = vpack.c.bf16 %v287_v26, %v286_v20  ;;  %v152_v33 = vpop.f32.mrf.mxu0 }
  0xe3   :  { %v257_v34 = vpop.f32.mrf.mxu1 }
  0xe4   :  { %v453_v35 = vpack.c.bf16 %v288_v30, %v288_v30  ;;  %v289_v36 = vadd.f32 %v600_v42, %v254_v31  ;;  %v258_v37 = vadd.f32 %v257_v34, %v152_v33  ;;  %367 = vrot.lane.b32.xlu0 %v460_v32, %s479_s4  ;;  %v154_v39 = vpop.f32.mrf.mxu0 }
  0xe5   :  { %v259_v40 = vpop.f32.mrf.mxu1 }
  0xe6   :  { %332 = vst.msk [vmem:[%s703_s5 + $0x14] sm:$0xf] %vm326_vm1, %v453_v35  ;;  %v290_v41 = vadd.f32 %v598_v38, %v258_v37  ;;  %v260_v43 = vadd.f32 %v259_v40, %v154_v39  ;;  %v461_v44 = vpack.c.bf16 %v289_v36, %v288_v30  ;;  %v156_v45 = vpop.f32.mrf.mxu0 }
  0xe7   :  { %v261_v46 = vpop.f32.mrf.mxu1 }
  0xe8   :  { %v454_v47 = vpack.c.bf16 %v290_v41, %v290_v41  ;;  %v291_v48 = vadd.f32 %v600_v42, %v260_v43  ;;  %v262_v49 = vadd.f32 %v261_v46, %v156_v45  ;;  %369 = vrot.lane.b32.xlu1 %v461_v44, %s479_s4  ;;  %v158_v50 = vpop.f32.mrf.mxu0 }
  0xe9   :  { %v263_v51 = vpop.f32.mrf.mxu1 }
  0xea   :  { %333 = vst.msk [vmem:[%s703_s5 + $0x18] sm:$0xf] %vm326_vm1, %v454_v47  ;;  %v292_v52 = vadd.f32 %v598_v38, %v262_v49  ;;  %v264_v53 = vadd.f32 %v263_v51, %v158_v50  ;;  %v462_v54 = vpack.c.bf16 %v291_v48, %v290_v41 }
  0xec   :  { %v455_v55 = vpack.c.bf16 %v292_v52, %v292_v52  ;;  %v293_v56 = vadd.f32 %v600_v42, %v264_v53  ;;  %371 = vrot.lane.b32.xlu0 %v462_v54, %s479_s4 }
  0xee   :  { %334 = vst.msk [vmem:[%s703_s5 + $0x1c] sm:$0xf] %vm326_vm1, %v455_v55  ;;  %v463_v57 = vpack.c.bf16 %v293_v56, %v292_v52 }
  0xf0   :  { %373 = vrot.lane.b32.xlu1 %v463_v57, %s479_s4 }
 0x146   :  { %v360_v58 = vpop.permute.xlu0 %359 }
 0x147   :  { %v375_v59 = vrot.slane %v360_v58, 4 }
 0x149   :  { %v384_v60 = vsel %vm75_vm0, %v360_v58, %v375_v59 }
 0x14a   :  { %400 = vst.msk [vmem:[%s704_s6] sm:$0xf] %vm326_vm1, %v384_v60  ;;  %v362_v38 = vpop.permute.xlu0 %361 }
 0x14b   :  { %v376_v42 = vrot.slane %v362_v38, 4 }
 0x14d   :  { %v385_v61 = vsel %vm75_vm0, %v362_v38, %v376_v42 }
 0x14e   :  { %401 = vst.msk [vmem:[%s704_s6 + $0x4] sm:$0xf] %vm326_vm1, %v385_v61  ;;  %v364_v62 = vpop.permute.xlu1 %363 }
 0x14f   :  { %v377_v63 = vrot.slane %v364_v62, 4 }
 0x151   :  { %v386_v0 = vsel %vm75_vm0, %v364_v62, %v377_v63 }
 0x152   :  { %402 = vst.msk [vmem:[%s704_s6 + $0x8] sm:$0xf] %vm326_vm1, %v386_v0  ;;  %v366_v1 = vpop.permute.xlu1 %365 }
 0x153   :  { %v378_v2 = vrot.slane %v366_v1, 4 }
 0x155   :  { %v387_v3 = vsel %vm75_vm0, %v366_v1, %v378_v2 }
 0x156   :  { %403 = vst.msk [vmem:[%s704_s6 + $0xc] sm:$0xf] %vm326_vm1, %v387_v3  ;;  %v368_v4 = vpop.permute.xlu0 %367 }
 0x157   :  { %v379_v5 = vrot.slane %v368_v4, 4 }
 0x159   :  { %v388_v6 = vsel %vm75_vm0, %v368_v4, %v379_v5 }
 0x15a   :  { %404 = vst.msk [vmem:[%s704_s6 + $0x10] sm:$0xf] %vm326_vm1, %v388_v6  ;;  %v370_v7 = vpop.permute.xlu1 %369 }
 0x15b   :  { %v380_v8 = vrot.slane %v370_v7, 4 }
 0x15d   :  { %v389_v9 = vsel %vm75_vm0, %v370_v7, %v380_v8 }
 0x15e   :  { %405 = vst.msk [vmem:[%s704_s6 + $0x14] sm:$0xf] %vm326_vm1, %v389_v9  ;;  %v372_v10 = vpop.permute.xlu0 %371 }
 0x15f   :  { %v381_v11 = vrot.slane %v372_v10, 4 }
 0x161   :  { %v390_v12 = vsel %vm75_vm0, %v372_v10, %v381_v11 }
 0x162   :  { %406 = vst.msk [vmem:[%s704_s6 + $0x18] sm:$0xf] %vm326_vm1, %v390_v12  ;;  %v374_v13 = vpop.permute.xlu1 %373 }
 0x163   :  { %v382_v14 = vrot.slane %v374_v13, 4 }
 0x165   :  { %v391_v15 = vsel %vm75_vm0, %v374_v13, %v382_v14 }
 0x166   :  { %407 = vst.msk [vmem:[%s704_s6 + $0x1c] sm:$0xf] %vm326_vm1, %v391_v15 }

// kernel: rnn_encoder_forward.7
= control target key start
LH: loop header
LB: loop body
LE: loop exit
PB: predicated region body
PF: predicated region fallthrough
CT: control target
= control target key end

     0   :  { %v1823_v0 = vmov 0.0   ;;  %vm1824_vm0 = vmmov 0   ;;  %vm73_vm1 = vcmask 261120   ;;  %s1825_s21 = smov 64   ;;  %s1826_s26 = smov 32   ;;  %s2331_s4 = inlined_call_operand.vmem [shape: bf16[32,96], index: 4, kind: input, shape index: {}]   ;;  %s2332_s5 = inlined_call_operand.vmem [shape: bf16[32,96], index: 5, kind: input, shape index: {}]   ;;  %s2333_s2 = inlined_call_operand.vmem [shape: f32[8,32], index: 2, kind: input, shape index: {}]   ;;  %s2334_s3 = inlined_call_operand.vmem [shape: f32[8,32], index: 3, kind: input, shape index: {}]   ;;  %s2335_s6 = inlined_call_operand.vmem [shape: f32[1,96], index: 6, kind: input, shape index: {}]   ;;  %s2336_s7 = inlined_call_operand.vmem [shape: f32[1,96], index: 7, kind: input, shape index: {}]   ;;  %s2337_s0 = inlined_call_operand.vmem [shape: bf16[8,8,96], index: 0, kind: input, shape index: {}]   ;;  %s2338_s1 = inlined_call_operand.vmem [shape: bf16[8,8,96], index: 1, kind: input, shape index: {}]   ;;  %s2339_s8 = inlined_call_operand.vmem [shape: f32[8,8,32], index: 8, kind: output, shape index: {0}]   ;;  %s2340_s9 = inlined_call_operand.vmem [shape: f32[8,8,32], index: 9, kind: output, shape index: {1}]  }
   0x1   :  { %1588 = vmatprep.subr.bf16.mxu0 %v1823_v0  ;;  %1596 = vmatprep.subr.bf16.mxu1 %v1823_v0  ;;  %v1883_v1 = vld [vmem:[%s2331_s4 + $0x8] sm:$0xff]   ;;  %v1898_v3 = vld [vmem:[%s2331_s4] sm:$0xff]   ;;  %v1954_v25 = vld [vmem:[%s2338_s1 + $0x18] sm:$0xff]   ;;  %s1827_s27 = smov 96  }
   0x2   :  { %v1888_v2 = vld [vmem:[%s2332_s5 + $0x8] sm:$0xff]   ;;  %1592 = vmatprep.mubr.msk.bf16.mxu0 %vm1824_vm0, %v1823_v0  ;;  %1600 = vmatprep.mubr.msk.bf16.mxu1 %vm1824_vm0, %v1823_v0  ;;  %v1905_v4 = vld [vmem:[%s2332_s5] sm:$0xff]   ;;  %v253_v27 = vunpack.c.h.bf16 %v1954_v25 }
   0x3   :  { %1589 = vmatpush3.bf16.msra.mxu0 %v1883_v1  ;;  %1597 = vmatpush3.bf16.msra.mxu1 %v1888_v2  ;;  %v72_v5 = vld [vmem:[%s2333_s2] sm:$0xff] }
   0x4   :  { %1590 = vmatprep.subr.bf16.mxu0 %v1823_v0  ;;  %1598 = vmatprep.subr.bf16.mxu1 %v1823_v0  ;;  %v75_v6 = vld [vmem:[%s2334_s3] sm:$0xff]  ;;  %74 = vst.msk [vmem:[#allocation2] sm:$0xff] %vm73_vm1, %v72_v5 }
   0x5   :  { %76 = vst.msk [vmem:[#allocation3] sm:$0xff] %vm73_vm1, %v75_v6  ;;  %v1937_v11 = vld [vmem:[%s2335_s6] ss:$0 sm:$0xff] }
   0x6   :  { %v1942_v13 = vld [vmem:[%s2336_s7] ss:$0 sm:$0xff] }
   0x7   :  { %1591 = vmatpush3.bf16.msra.mxu0 %v1898_v3  ;;  %1599 = vmatpush3.bf16.msra.mxu1 %v1905_v4  ;;  %v89_v23 = vld [vmem:[%s2337_s0] sm:$0xf] }
   0x8   :  { %1604 = vmatprep.subr.bf16.mxu0 %v1823_v0  ;;  %1612 = vmatprep.subr.bf16.mxu1 %v1823_v0  ;;  %v153_v24 = vunpack.c.l.bf16 %v89_v23 }
   0xb   :  { %v87_v7 = vld [vmem:[#allocation2] sm:$0xff] }
   0xc   :  { %v88_v8 = vld [vmem:[#allocation3] sm:$0xff]  ;;  %v90_v9 = vpack.c.bf16 %v87_v7, %v87_v7 }
   0xd   :  { %v191_v10 = vpack.c.bf16 %v88_v8, %v88_v8 }
   0xe   :  { %1593 = vmatmul.mubr.msk.bf16.vlgmr.msra.gmra.mxu0 %vm73_vm1, %v90_v9 }
   0xf   :  { %1601 = vmatmul.mubr.msk.bf16.vlgmr.msra.gmra.mxu1 %vm73_vm1, %v191_v10  ;;  %1605 = vmatpush3.bf16.msra.mxu0 %v1883_v1 }
  0x10   :  { %1613 = vmatpush3.bf16.msra.mxu1 %v1888_v2  ;;  %1606 = vmatprep.subr.bf16.mxu0 %v1823_v0 }
  0x11   :  { %1608 = vmatprep.mubr.msk.bf16.mxu0 %vm1824_vm0, %v1823_v0  ;;  %1614 = vmatprep.subr.bf16.mxu1 %v1823_v0 }
  0x12   :  { %1616 = vmatprep.mubr.msk.bf16.mxu1 %vm1824_vm0, %v1823_v0 }
  0x13   :  { %1607 = vmatpush3.bf16.msra.mxu0 %v1898_v3 }
  0x14   :  { %1615 = vmatpush3.bf16.msra.mxu1 %v1905_v4  ;;  %1620 = vmatprep.subr.bf16.mxu0 %v1823_v0 }
  0x15   :  { %1628 = vmatprep.subr.bf16.mxu1 %v1823_v0 }
  0xce   :  { %v147_v12 = vpop.f32.mrf.mxu0 }
  0xcf   :  { %v247_v14 = vpop.f32.mrf.mxu1  ;;  %v148_v15 = vadd.f32 %v1937_v11, %v147_v12 }
  0xd0   :  { %v1594_v16 = vpop.f32.mrf.mxu0  ;;  %v248_v18 = vadd.f32 %v1942_v13, %v247_v14 }
  0xd1   :  { %v1602_v17 = vpop.f32.mrf.mxu1  ;;  %162 = vrot.lane.b32.xlu0 %v148_v15, %s1825_s21  ;;  %v154_v26 = vadd.f32 %v153_v24, %v148_v15  ;;  %v1992_v16 = vld [vmem:[%s2337_s0 + $0x4] sm:$0xff]  }
  0xd2   :  { %v150_v19 = vpop.f32.mrf.mxu0  ;;  %v254_v29 = vadd.f32 %v253_v27, %v248_v18  ;;  %v339_v17 = vunpack.c.l.bf16 %v1992_v16 }
  0xd3   :  { %v250_v20 = vpop.f32.mrf.mxu1  ;;  %v1478_v28 = vmul.f32 -1.442695, %v154_v26  ;;  %v421_v19 = vunpack.c.l.bf16 %v1954_v25 }
  0xd4   :  { %v1595_v21 = vpop.f32.mrf.mxu0  ;;  %v1484_v30 = vmul.f32 -1.442695, %v254_v29 }
  0xd5   :  { %v1603_v22 = vpop.f32.mrf.mxu1  ;;  %262 = vrot.lane.b32.xlu0 %v248_v18, %s1825_s21  ;;  %1725 = vpow2.f32 %v1478_v28 }
  0xd6   :  { %1727 = vpow2.f32 %v1484_v30 }
  0xe2   :  { %v1726_v31 = vpop.eup %1725 }
  0xe3   :  { %v158_v32 = vadd.f32 1.0, %v1726_v31  ;;  %v1728_v33 = vpop.eup %1727 }
  0xe4   :  { %v258_v34 = vadd.f32 1.0, %v1728_v33 }
  0xe5   :  { %1729 = vrcp.f32 %v158_v32 }
  0xe6   :  { %1731 = vrcp.f32 %v258_v34 }
  0xf2   :  { %v1730_v35 = vpop.eup %1729 }
  0xf3   :  { %v1732_v38 = vpop.eup %1731  ;;  %v172_v48 = vsub.f32 1.0, %v1730_v35 }
  0xf4   :  { %v272_v54 = vsub.f32 1.0, %v1732_v38 }
 0x143   :  { %v163_v36 = vpop.permute.xlu0 %162 }
 0x144   :  { %v165_v37 = vmul.f32 %v1730_v35, %v163_v36 }
 0x146   :  { %167 = vrot.lane.b32.xlu1 %v165_v37, %s1825_s21 }
 0x147   :  { %v263_v39 = vpop.permute.xlu0 %262 }
 0x148   :  { %v265_v40 = vmul.f32 %v1732_v38, %v263_v39 }
 0x14a   :  { %267 = vrot.lane.b32.xlu1 %v265_v40, %s1825_s21 }
 0x14e   :  { %179 = vrot.lane.b32.xlu1 %v87_v7, %s1826_s26 }
 0x152   :  { %279 = vrot.lane.b32.xlu1 %v88_v8, %s1826_s26 }
 0x1b8   :  { %v168_v41 = vpop.permute.xlu1 %167 }
 0x1b9   :  { %v170_v42 = vadd.f32 %v168_v41, %v153_v24 }
 0x1bb   :  { %1733 = vtanh.f32 %v170_v42 }
 0x1bc   :  { %v268_v43 = vpop.permute.xlu1 %267 }
 0x1bd   :  { %v270_v44 = vadd.f32 %v268_v43, %v253_v27 }
 0x1bf   :  { %1735 = vtanh.f32 %v270_v44 }
 0x1c0   :  { %v180_v47 = vpop.permute.xlu1 %179 }
 0x1c1   :  { %v182_v50 = vmul.f32 %v1730_v35, %v180_v47 }
 0x1c4   :  { %v280_v52 = vpop.permute.xlu1 %279 }
 0x1c5   :  { %v282_v56 = vmul.f32 %v1732_v38, %v280_v52 }
 0x1c8   :  { %v1734_v45 = vpop.eup %1733 }
 0x1c9   :  { %174 = vrot.lane.b32.xlu0 %v1734_v45, %s1827_s27 }
 0x1cc   :  { %v1736_v46 = vpop.eup %1735 }
 0x1cd   :  { %274 = vrot.lane.b32.xlu0 %v1736_v46, %s1827_s27 }
 0x23b   :  { %v175_v49 = vpop.permute.xlu0 %174 }
 0x23c   :  { %v177_v51 = vmul.f32 %v175_v49, %v172_v48 }
 0x23e   :  { %v1961_v53 = vadd.f32 %v182_v50, %v177_v51 }
 0x23f   :  { %v275_v55 = vpop.permute.xlu0 %274 }
 0x240   :  { %v277_v57 = vmul.f32 %v275_v55, %v272_v54  ;;  %v292_v58 = vpack.c.bf16 %v1961_v53, %v1961_v53 }
 0x242   :  { %v1965_v59 = vadd.f32 %v282_v56, %v277_v57  ;;  %294 = vrot.lane.b32.xlu0 %v292_v58, %s1827_s27 }
 0x244   :  { %v374_v60 = vpack.c.bf16 %v1965_v59, %v1965_v59 }
 0x246   :  { %376 = vrot.lane.b32.xlu1 %v374_v60, %s1827_s27 }
 0x2b4   :  { %v295_v61 = vpop.permute.xlu0 %294 }
 0x2b5   :  { %1609 = vmatmul.mubr.msk.bf16.vlgmr.msra.gmra.mxu0 %vm73_vm1, %v295_v61 }
 0x2b6   :  { %1621 = vmatpush3.bf16.msra.mxu0 %v1883_v1  ;;  %1624 = vmatprep.mubr.msk.bf16.mxu0 %vm1824_vm0, %v1823_v0 }
 0x2b7   :  { %1622 = vmatprep.subr.bf16.mxu0 %v1823_v0 }
 0x2b8   :  { %v377_v62 = vpop.permute.xlu1 %376 }
 0x2b9   :  { %1617 = vmatmul.mubr.msk.bf16.vlgmr.msra.gmra.mxu1 %vm73_vm1, %v377_v62 }
 0x2ba   :  { %1629 = vmatpush3.bf16.msra.mxu1 %v1888_v2  ;;  %1623 = vmatpush3.bf16.msra.mxu0 %v1898_v3 }
 0x2bb   :  { %1630 = vmatprep.subr.bf16.mxu1 %v1823_v0  ;;  %1632 = vmatprep.mubr.msk.bf16.mxu1 %vm1824_vm0, %v1823_v0 }
 0x2bc   :  { %1636 = vmatprep.subr.bf16.mxu0 %v1823_v0 }
 0x2be   :  { %1631 = vmatpush3.bf16.msra.mxu1 %v1905_v4 }
 0x2bf   :  { %1644 = vmatprep.subr.bf16.mxu1 %v1823_v0 }
 0x375   :  { %v333_v63 = vpop.f32.mrf.mxu0 }
 0x376   :  { %v334_v5 = vadd.f32 %v1937_v11, %v333_v63 }
 0x377   :  { %v1610_v6 = vpop.f32.mrf.mxu0 }
 0x378   :  { %348 = vrot.lane.b32.xlu0 %v334_v5, %s1825_s21  ;;  %v340_v18 = vadd.f32 %v339_v17, %v334_v5  ;;  %v503_v6 = vunpack.c.h.bf16 %v1992_v16 }
 0x379   :  { %v336_v7 = vpop.f32.mrf.mxu0  ;;  %v415_v8 = vpop.f32.mrf.mxu1 }
 0x37a   :  { %v416_v9 = vadd.f32 %v1942_v13, %v415_v8  ;;  %v1488_v20 = vmul.f32 -1.442695, %v340_v18  ;;  %v2034_v7 = vld [vmem:[%s2338_s1 + $0x10] sm:$0xff]  }
 0x37b   :  { %v1611_v10 = vpop.f32.mrf.mxu0  ;;  %v1618_v12 = vpop.f32.mrf.mxu1 }
 0x37c   :  { %430 = vrot.lane.b32.xlu1 %v416_v9, %s1825_s21  ;;  %v422_v21 = vadd.f32 %v421_v19, %v416_v9  ;;  %1737 = vpow2.f32 %v1488_v20  ;;  %v585_v9 = vunpack.c.h.bf16 %v2034_v7 }
 0x37d   :  { %v418_v14 = vpop.f32.mrf.mxu1 }
 0x37e   :  { %v1492_v22 = vmul.f32 -1.442695, %v422_v21 }
 0x37f   :  { %v1619_v15 = vpop.f32.mrf.mxu1 }
 0x380   :  { %1739 = vpow2.f32 %v1492_v22 }
 0x389   :  { %v1738_v23 = vpop.eup %1737 }
 0x38a   :  { %v344_v24 = vadd.f32 1.0, %v1738_v23 }
 0x38c   :  { %1741 = vrcp.f32 %v344_v24 }
 0x38d   :  { %v1740_v26 = vpop.eup %1739 }
 0x38e   :  { %v426_v27 = vadd.f32 1.0, %v1740_v26 }
 0x390   :  { %1743 = vrcp.f32 %v426_v27 }
 0x399   :  { %v1742_v28 = vpop.eup %1741 }
 0x39a   :  { %v358_v39 = vsub.f32 1.0, %v1742_v28  ;;  %v364_v41 = vmul.f32 %v1742_v28, %v1961_v53 }
 0x39d   :  { %v1744_v31 = vpop.eup %1743 }
 0x39e   :  { %v440_v44 = vsub.f32 1.0, %v1744_v31  ;;  %v446_v46 = vmul.f32 %v1744_v31, %v1965_v59 }
 0x3ea   :  { %v349_v29 = vpop.permute.xlu0 %348 }
 0x3eb   :  { %v351_v30 = vmul.f32 %v1742_v28, %v349_v29 }
 0x3ed   :  { %353 = vrot.lane.b32.xlu0 %v351_v30, %s1825_s21 }
 0x3ee   :  { %v431_v32 = vpop.permute.xlu1 %430 }
 0x3ef   :  { %v433_v33 = vmul.f32 %v1744_v31, %v431_v32 }
 0x3f1   :  { %435 = vrot.lane.b32.xlu1 %v433_v33, %s1825_s21 }
 0x45f   :  { %v354_v25 = vpop.permute.xlu0 %353 }
 0x460   :  { %v356_v34 = vadd.f32 %v354_v25, %v339_v17 }
 0x462   :  { %1745 = vtanh.f32 %v356_v34 }
 0x463   :  { %v436_v35 = vpop.permute.xlu1 %435 }
 0x464   :  { %v438_v36 = vadd.f32 %v436_v35, %v421_v19 }
 0x466   :  { %1747 = vtanh.f32 %v438_v36 }
 0x46f   :  { %v1746_v37 = vpop.eup %1745 }
 0x470   :  { %360 = vrot.lane.b32.xlu0 %v1746_v37, %s1827_s27 }
 0x473   :  { %v1748_v38 = vpop.eup %1747 }
 0x474   :  { %442 = vrot.lane.b32.xlu1 %v1748_v38, %s1827_s27 }
 0x4e2   :  { %v361_v40 = vpop.permute.xlu0 %360 }
 0x4e3   :  { %v363_v42 = vmul.f32 %v361_v40, %v358_v39 }
 0x4e5   :  { %v2001_v43 = vadd.f32 %v364_v41, %v363_v42 }
 0x4e6   :  { %v443_v45 = vpop.permute.xlu1 %442 }
 0x4e7   :  { %v445_v47 = vmul.f32 %v443_v45, %v440_v44  ;;  %v456_v48 = vpack.c.bf16 %v2001_v43, %v2001_v43 }
 0x4e9   :  { %v2006_v49 = vadd.f32 %v446_v46, %v445_v47  ;;  %458 = vrot.lane.b32.xlu0 %v456_v48, %s1827_s27 }
 0x4eb   :  { %v538_v50 = vpack.c.bf16 %v2006_v49, %v2006_v49 }
 0x4ed   :  { %540 = vrot.lane.b32.xlu1 %v538_v50, %s1827_s27 }
 0x55b   :  { %v459_v51 = vpop.permute.xlu0 %458 }
 0x55c   :  { %1625 = vmatmul.mubr.msk.bf16.vlgmr.msra.gmra.mxu0 %vm73_vm1, %v459_v51 }
 0x55d   :  { %1637 = vmatpush3.bf16.msra.mxu0 %v1883_v1  ;;  %1640 = vmatprep.mubr.msk.bf16.mxu0 %vm1824_vm0, %v1823_v0 }
 0x55e   :  { %1638 = vmatprep.subr.bf16.mxu0 %v1823_v0 }
 0x55f   :  { %v541_v52 = vpop.permute.xlu1 %540 }
 0x560   :  { %1633 = vmatmul.mubr.msk.bf16.vlgmr.msra.gmra.mxu1 %vm73_vm1, %v541_v52 }
 0x561   :  { %1645 = vmatpush3.bf16.msra.mxu1 %v1888_v2  ;;  %1639 = vmatpush3.bf16.msra.mxu0 %v1898_v3 }
 0x562   :  { %1646 = vmatprep.subr.bf16.mxu1 %v1823_v0  ;;  %1648 = vmatprep.mubr.msk.bf16.mxu1 %vm1824_vm0, %v1823_v0 }
 0x563   :  { %1652 = vmatprep.subr.bf16.mxu0 %v1823_v0 }
 0x565   :  { %1647 = vmatpush3.bf16.msra.mxu1 %v1905_v4 }
 0x566   :  { %1660 = vmatprep.subr.bf16.mxu1 %v1823_v0 }
 0x61c   :  { %v497_v54 = vpop.f32.mrf.mxu0 }
 0x61d   :  { %v498_v55 = vadd.f32 %v1937_v11, %v497_v54 }
 0x61e   :  { %v1626_v56 = vpop.f32.mrf.mxu0 }
 0x61f   :  { %512 = vrot.lane.b32.xlu0 %v498_v55, %s1825_s21  ;;  %v504_v8 = vadd.f32 %v503_v6, %v498_v55 }
 0x620   :  { %v500_v57 = vpop.f32.mrf.mxu0  ;;  %v579_v58 = vpop.f32.mrf.mxu1 }
 0x621   :  { %v580_v60 = vadd.f32 %v1942_v13, %v579_v58  ;;  %v1496_v10 = vmul.f32 -1.442695, %v504_v8  ;;  %v2074_v58 = vld [vmem:[%s2337_s0 + $0xc] sm:$0xff]  }
 0x622   :  { %v1627_v61 = vpop.f32.mrf.mxu0  ;;  %v1634_v62 = vpop.f32.mrf.mxu1 }
 0x623   :  { %594 = vrot.lane.b32.xlu1 %v580_v60, %s1825_s21  ;;  %v586_v12 = vadd.f32 %v585_v9, %v580_v60  ;;  %1749 = vpow2.f32 %v1496_v10  ;;  %v667_v60 = vunpack.c.l.bf16 %v2074_v58  ;;  %v749_v62 = vunpack.c.l.bf16 %v2034_v7 }
 0x624   :  { %v582_v63 = vpop.f32.mrf.mxu1 }
 0x625   :  { %v1500_v14 = vmul.f32 -1.442695, %v586_v12 }
 0x626   :  { %v1635_v5 = vpop.f32.mrf.mxu1 }
 0x627   :  { %1751 = vpow2.f32 %v1500_v14 }
 0x630   :  { %v1750_v15 = vpop.eup %1749 }
 0x631   :  { %v508_v17 = vadd.f32 1.0, %v1750_v15 }
 0x633   :  { %1753 = vrcp.f32 %v508_v17 }
 0x634   :  { %v1752_v18 = vpop.eup %1751 }
 0x635   :  { %v590_v19 = vadd.f32 1.0, %v1752_v18 }
 0x637   :  { %1755 = vrcp.f32 %v590_v19 }
 0x640   :  { %v1754_v16 = vpop.eup %1753 }
 0x641   :  { %v522_v32 = vsub.f32 1.0, %v1754_v16  ;;  %v528_v25 = vmul.f32 %v1754_v16, %v2001_v43 }
 0x644   :  { %v1756_v22 = vpop.eup %1755 }
 0x645   :  { %v604_v36 = vsub.f32 1.0, %v1756_v22  ;;  %v610_v38 = vmul.f32 %v1756_v22, %v2006_v49 }
 0x691   :  { %v513_v20 = vpop.permute.xlu0 %512 }
 0x692   :  { %v515_v21 = vmul.f32 %v1754_v16, %v513_v20 }
 0x694   :  { %517 = vrot.lane.b32.xlu0 %v515_v21, %s1825_s21 }
 0x695   :  { %v595_v23 = vpop.permute.xlu1 %594 }
 0x696   :  { %v597_v24 = vmul.f32 %v1756_v22, %v595_v23 }
 0x698   :  { %599 = vrot.lane.b32.xlu1 %v597_v24, %s1825_s21 }
 0x706   :  { %v518_v26 = vpop.permute.xlu0 %517 }
 0x707   :  { %v520_v27 = vadd.f32 %v518_v26, %v503_v6 }
 0x709   :  { %1757 = vtanh.f32 %v520_v27 }
 0x70a   :  { %v600_v28 = vpop.permute.xlu1 %599 }
 0x70b   :  { %v602_v29 = vadd.f32 %v600_v28, %v585_v9 }
 0x70d   :  { %1759 = vtanh.f32 %v602_v29 }
 0x716   :  { %v1758_v30 = vpop.eup %1757 }
 0x717   :  { %524 = vrot.lane.b32.xlu0 %v1758_v30, %s1827_s27 }
 0x71a   :  { %v1760_v31 = vpop.eup %1759 }
 0x71b   :  { %606 = vrot.lane.b32.xlu1 %v1760_v31, %s1827_s27 }
 0x789   :  { %v525_v33 = vpop.permute.xlu0 %524 }
 0x78a   :  { %v527_v34 = vmul.f32 %v525_v33, %v522_v32 }
 0x78c   :  { %v2042_v35 = vadd.f32 %v528_v25, %v527_v34 }
 0x78d   :  { %v607_v37 = vpop.permute.xlu1 %606 }
 0x78e   :  { %v609_v39 = vmul.f32 %v607_v37, %v604_v36  ;;  %v620_v40 = vpack.c.bf16 %v2042_v35, %v2042_v35 }
 0x790   :  { %v2047_v41 = vadd.f32 %v610_v38, %v609_v39  ;;  %622 = vrot.lane.b32.xlu0 %v620_v40, %s1827_s27 }
 0x792   :  { %v702_v42 = vpack.c.bf16 %v2047_v41, %v2047_v41 }
 0x794   :  { %704 = vrot.lane.b32.xlu1 %v702_v42, %s1827_s27 }
 0x802   :  { %v623_v44 = vpop.permute.xlu0 %622 }
 0x803   :  { %1641 = vmatmul.mubr.msk.bf16.vlgmr.msra.gmra.mxu0 %vm73_vm1, %v623_v44 }
 0x804   :  { %1653 = vmatpush3.bf16.msra.mxu0 %v1883_v1  ;;  %1656 = vmatprep.mubr.msk.bf16.mxu0 %vm1824_vm0, %v1823_v0 }
 0x805   :  { %1654 = vmatprep.subr.bf16.mxu0 %v1823_v0 }
 0x806   :  { %v705_v45 = vpop.permute.xlu1 %704 }
 0x807   :  { %1649 = vmatmul.mubr.msk.bf16.vlgmr.msra.gmra.mxu1 %vm73_vm1, %v705_v45 }
 0x808   :  { %1661 = vmatpush3.bf16.msra.mxu1 %v1888_v2  ;;  %1655 = vmatpush3.bf16.msra.mxu0 %v1898_v3 }
 0x809   :  { %1662 = vmatprep.subr.bf16.mxu1 %v1823_v0  ;;  %1664 = vmatprep.mubr.msk.bf16.mxu1 %vm1824_vm0, %v1823_v0 }
 0x80a   :  { %1668 = vmatprep.subr.bf16.mxu0 %v1823_v0 }
 0x80c   :  { %1663 = vmatpush3.bf16.msra.mxu1 %v1905_v4 }
 0x80d   :  { %1676 = vmatprep.subr.bf16.mxu1 %v1823_v0 }
 0x8c3   :  { %v661_v46 = vpop.f32.mrf.mxu0 }
 0x8c4   :  { %v662_v47 = vadd.f32 %v1937_v11, %v661_v46 }
 0x8c5   :  { %v1642_v48 = vpop.f32.mrf.mxu0 }
 0x8c6   :  { %676 = vrot.lane.b32.xlu0 %v662_v47, %s1825_s21  ;;  %v668_v61 = vadd.f32 %v667_v60, %v662_v47 }
 0x8c7   :  { %v664_v50 = vpop.f32.mrf.mxu0  ;;  %v743_v51 = vpop.f32.mrf.mxu1 }
 0x8c8   :  { %v744_v52 = vadd.f32 %v1942_v13, %v743_v51  ;;  %v1504_v63 = vmul.f32 -1.442695, %v668_v61 }
 0x8c9   :  { %v1643_v54 = vpop.f32.mrf.mxu0  ;;  %v1650_v55 = vpop.f32.mrf.mxu1 }
 0x8ca   :  { %758 = vrot.lane.b32.xlu1 %v744_v52, %s1825_s21  ;;  %v750_v5 = vadd.f32 %v749_v62, %v744_v52  ;;  %1761 = vpow2.f32 %v1504_v63  ;;  %v831_v54 = vunpack.c.h.bf16 %v2074_v58  ;;  %v2116_v55 = vld [vmem:[%s2338_s1 + $0x8] sm:$0xff]  }
 0x8cb   :  { %v746_v56 = vpop.f32.mrf.mxu1 }
 0x8cc   :  { %v1508_v6 = vmul.f32 -1.442695, %v750_v5 }
 0x8cd   :  { %v1651_v57 = vpop.f32.mrf.mxu1 }
 0x8ce   :  { %1763 = vpow2.f32 %v1508_v6  ;;  %v913_v57 = vunpack.c.h.bf16 %v2116_v55 }
 0x8d7   :  { %v1762_v8 = vpop.eup %1761 }
 0x8d8   :  { %v672_v9 = vadd.f32 1.0, %v1762_v8 }
 0x8da   :  { %1765 = vrcp.f32 %v672_v9 }
 0x8db   :  { %v1764_v10 = vpop.eup %1763 }
 0x8dc   :  { %v754_v12 = vadd.f32 1.0, %v1764_v10 }
 0x8de   :  { %1767 = vrcp.f32 %v754_v12 }
 0x8e7   :  { %v1766_v14 = vpop.eup %1765 }
 0x8e8   :  { %v686_v26 = vsub.f32 1.0, %v1766_v14  ;;  %v692_v28 = vmul.f32 %v1766_v14, %v2042_v35 }
 0x8eb   :  { %v1768_v18 = vpop.eup %1767 }
 0x8ec   :  { %v768_v31 = vsub.f32 1.0, %v1768_v18  ;;  %v774_v33 = vmul.f32 %v1768_v18, %v2047_v41 }
 0x938   :  { %v677_v15 = vpop.permute.xlu0 %676 }
 0x939   :  { %v679_v17 = vmul.f32 %v1766_v14, %v677_v15 }
 0x93b   :  { %681 = vrot.lane.b32.xlu0 %v679_v17, %s1825_s21 }
 0x93c   :  { %v759_v19 = vpop.permute.xlu1 %758 }
 0x93d   :  { %v761_v16 = vmul.f32 %v1768_v18, %v759_v19 }
 0x93f   :  { %763 = vrot.lane.b32.xlu1 %v761_v16, %s1825_s21 }
 0x9ad   :  { %v682_v7 = vpop.permute.xlu0 %681 }
 0x9ae   :  { %v684_v20 = vadd.f32 %v682_v7, %v667_v60 }
 0x9b0   :  { %1769 = vtanh.f32 %v684_v20 }
 0x9b1   :  { %v764_v21 = vpop.permute.xlu1 %763 }
 0x9b2   :  { %v766_v22 = vadd.f32 %v764_v21, %v749_v62 }
 0x9b4   :  { %1771 = vtanh.f32 %v766_v22 }
 0x9bd   :  { %v1770_v23 = vpop.eup %1769 }
 0x9be   :  { %688 = vrot.lane.b32.xlu0 %v1770_v23, %s1827_s27 }
 0x9c1   :  { %v1772_v24 = vpop.eup %1771 }
 0x9c2   :  { %770 = vrot.lane.b32.xlu1 %v1772_v24, %s1827_s27 }
 0xa30   :  { %v689_v27 = vpop.permute.xlu0 %688 }
 0xa31   :  { %v691_v29 = vmul.f32 %v689_v27, %v686_v26 }
 0xa33   :  { %v2083_v30 = vadd.f32 %v692_v28, %v691_v29 }
 0xa34   :  { %v771_v32 = vpop.permute.xlu1 %770 }
 0xa35   :  { %v773_v25 = vmul.f32 %v771_v32, %v768_v31  ;;  %v784_v34 = vpack.c.bf16 %v2083_v30, %v2083_v30 }
 0xa37   :  { %v2088_v36 = vadd.f32 %v774_v33, %v773_v25  ;;  %786 = vrot.lane.b32.xlu0 %v784_v34, %s1827_s27 }
 0xa39   :  { %v866_v37 = vpack.c.bf16 %v2088_v36, %v2088_v36 }
 0xa3b   :  { %868 = vrot.lane.b32.xlu1 %v866_v37, %s1827_s27 }
 0xaa9   :  { %v787_v38 = vpop.permute.xlu0 %786 }
 0xaaa   :  { %1657 = vmatmul.mubr.msk.bf16.vlgmr.msra.gmra.mxu0 %vm73_vm1, %v787_v38 }
 0xaab   :  { %1669 = vmatpush3.bf16.msra.mxu0 %v1883_v1  ;;  %1672 = vmatprep.mubr.msk.bf16.mxu0 %vm1824_vm0, %v1823_v0 }
 0xaac   :  { %1670 = vmatprep.subr.bf16.mxu0 %v1823_v0 }
 0xaad   :  { %v869_v39 = vpop.permute.xlu1 %868 }
 0xaae   :  { %1665 = vmatmul.mubr.msk.bf16.vlgmr.msra.gmra.mxu1 %vm73_vm1, %v869_v39 }
 0xaaf   :  { %1677 = vmatpush3.bf16.msra.mxu1 %v1888_v2  ;;  %1671 = vmatpush3.bf16.msra.mxu0 %v1898_v3 }
 0xab0   :  { %1678 = vmatprep.subr.bf16.mxu1 %v1823_v0  ;;  %1680 = vmatprep.mubr.msk.bf16.mxu1 %vm1824_vm0, %v1823_v0 }
 0xab1   :  { %1684 = vmatprep.subr.bf16.mxu0 %v1823_v0 }
 0xab3   :  { %1679 = vmatpush3.bf16.msra.mxu1 %v1905_v4 }
 0xab4   :  { %1692 = vmatprep.subr.bf16.mxu1 %v1823_v0 }
 0xb6a   :  { %v825_v40 = vpop.f32.mrf.mxu0 }
 0xb6b   :  { %v826_v42 = vadd.f32 %v1937_v11, %v825_v40 }
 0xb6c   :  { %v1658_v44 = vpop.f32.mrf.mxu0 }
 0xb6d   :  { %840 = vrot.lane.b32.xlu0 %v826_v42, %s1825_s21  ;;  %v832_v56 = vadd.f32 %v831_v54, %v826_v42 }
 0xb6e   :  { %v828_v45 = vpop.f32.mrf.mxu0  ;;  %v907_v46 = vpop.f32.mrf.mxu1 }
 0xb6f   :  { %v908_v47 = vadd.f32 %v1942_v13, %v907_v46  ;;  %v1512_v60 = vmul.f32 -1.442695, %v832_v56  ;;  %v1077_v56 = vunpack.c.l.bf16 %v2116_v55 }
 0xb70   :  { %v1659_v48 = vpop.f32.mrf.mxu0  ;;  %v1666_v50 = vpop.f32.mrf.mxu1 }
 0xb71   :  { %922 = vrot.lane.b32.xlu1 %v908_v47, %s1825_s21  ;;  %v914_v61 = vadd.f32 %v913_v57, %v908_v47  ;;  %1773 = vpow2.f32 %v1512_v60 }
 0xb72   :  { %v910_v51 = vpop.f32.mrf.mxu1 }
 0xb73   :  { %v1516_v62 = vmul.f32 -1.442695, %v914_v61  ;;  %v2156_v51 = vld [vmem:[%s2337_s0 + $0x14] sm:$0xff]  }
 0xb74   :  { %v1667_v52 = vpop.f32.mrf.mxu1 }
 0xb75   :  { %1775 = vpow2.f32 %v1516_v62  ;;  %v995_v52 = vunpack.c.l.bf16 %v2156_v51 }
 0xb7e   :  { %v1774_v63 = vpop.eup %1773 }
 0xb7f   :  { %v836_v5 = vadd.f32 1.0, %v1774_v63 }
 0xb81   :  { %1777 = vrcp.f32 %v836_v5 }
 0xb82   :  { %v1776_v6 = vpop.eup %1775 }
 0xb83   :  { %v918_v8 = vadd.f32 1.0, %v1776_v6 }
 0xb85   :  { %1779 = vrcp.f32 %v918_v8 }
 0xb8e   :  { %v1778_v58 = vpop.eup %1777 }
 0xb8f   :  { %v850_v21 = vsub.f32 1.0, %v1778_v58  ;;  %v856_v23 = vmul.f32 %v1778_v58, %v2083_v30 }
 0xb92   :  { %v1780_v12 = vpop.eup %1779 }
 0xb93   :  { %v932_v27 = vsub.f32 1.0, %v1780_v12  ;;  %v938_v29 = vmul.f32 %v1780_v12, %v2088_v36 }
 0xbdf   :  { %v841_v9 = vpop.permute.xlu0 %840 }
 0xbe0   :  { %v843_v10 = vmul.f32 %v1778_v58, %v841_v9 }
 0xbe2   :  { %845 = vrot.lane.b32.xlu0 %v843_v10, %s1825_s21 }
 0xbe3   :  { %v923_v14 = vpop.permute.xlu1 %922 }
 0xbe4   :  { %v925_v15 = vmul.f32 %v1780_v12, %v923_v14 }
 0xbe6   :  { %927 = vrot.lane.b32.xlu1 %v925_v15, %s1825_s21 }
 0xc54   :  { %v846_v17 = vpop.permute.xlu0 %845 }
 0xc55   :  { %v848_v18 = vadd.f32 %v846_v17, %v831_v54 }
 0xc57   :  { %1781 = vtanh.f32 %v848_v18 }
 0xc58   :  { %v928_v19 = vpop.permute.xlu1 %927 }
 0xc59   :  { %v930_v16 = vadd.f32 %v928_v19, %v913_v57 }
 0xc5b   :  { %1783 = vtanh.f32 %v930_v16 }
 0xc64   :  { %v1782_v7 = vpop.eup %1781 }
 0xc65   :  { %852 = vrot.lane.b32.xlu0 %v1782_v7, %s1827_s27 }
 0xc68   :  { %v1784_v20 = vpop.eup %1783 }
 0xc69   :  { %934 = vrot.lane.b32.xlu1 %v1784_v20, %s1827_s27 }
 0xcd7   :  { %v853_v22 = vpop.permute.xlu0 %852 }
 0xcd8   :  { %v855_v24 = vmul.f32 %v853_v22, %v850_v21 }
 0xcda   :  { %v2124_v26 = vadd.f32 %v856_v23, %v855_v24 }
 0xcdb   :  { %v935_v28 = vpop.permute.xlu1 %934 }
 0xcdc   :  { %v937_v31 = vmul.f32 %v935_v28, %v932_v27  ;;  %v948_v32 = vpack.c.bf16 %v2124_v26, %v2124_v26 }
 0xcde   :  { %v2129_v33 = vadd.f32 %v938_v29, %v937_v31  ;;  %950 = vrot.lane.b32.xlu0 %v948_v32, %s1827_s27 }
 0xce0   :  { %v1030_v25 = vpack.c.bf16 %v2129_v33, %v2129_v33 }
 0xce2   :  { %1032 = vrot.lane.b32.xlu1 %v1030_v25, %s1827_s27 }
 0xd50   :  { %v951_v34 = vpop.permute.xlu0 %950 }
 0xd51   :  { %1673 = vmatmul.mubr.msk.bf16.vlgmr.msra.gmra.mxu0 %vm73_vm1, %v951_v34 }
 0xd52   :  { %1685 = vmatpush3.bf16.msra.mxu0 %v1883_v1  ;;  %1688 = vmatprep.mubr.msk.bf16.mxu0 %vm1824_vm0, %v1823_v0 }
 0xd53   :  { %1686 = vmatprep.subr.bf16.mxu0 %v1823_v0 }
 0xd54   :  { %v1033_v37 = vpop.permute.xlu1 %1032 }
 0xd55   :  { %1681 = vmatmul.mubr.msk.bf16.vlgmr.msra.gmra.mxu1 %vm73_vm1, %v1033_v37 }
 0xd56   :  { %1693 = vmatpush3.bf16.msra.mxu1 %v1888_v2  ;;  %1687 = vmatpush3.bf16.msra.mxu0 %v1898_v3 }
 0xd57   :  { %1694 = vmatprep.subr.bf16.mxu1 %v1823_v0  ;;  %1696 = vmatprep.mubr.msk.bf16.mxu1 %vm1824_vm0, %v1823_v0 }
 0xd58   :  { %1700 = vmatprep.subr.bf16.mxu0 %v1823_v0 }
 0xd5a   :  { %1695 = vmatpush3.bf16.msra.mxu1 %v1905_v4 }
 0xd5b   :  { %1708 = vmatprep.subr.bf16.mxu1 %v1823_v0 }
 0xe11   :  { %v989_v38 = vpop.f32.mrf.mxu0 }
 0xe12   :  { %v990_v39 = vadd.f32 %v1937_v11, %v989_v38 }
 0xe13   :  { %v1674_v40 = vpop.f32.mrf.mxu0 }
 0xe14   :  { %1004 = vrot.lane.b32.xlu0 %v990_v39, %s1825_s21  ;;  %v996_v54 = vadd.f32 %v995_v52, %v990_v39 }
 0xe15   :  { %v992_v42 = vpop.f32.mrf.mxu0  ;;  %v1071_v44 = vpop.f32.mrf.mxu1 }
 0xe16   :  { %v1072_v45 = vadd.f32 %v1942_v13, %v1071_v44  ;;  %v1520_v57 = vmul.f32 -1.442695, %v996_v54 }
 0xe17   :  { %v1675_v46 = vpop.f32.mrf.mxu0  ;;  %v1682_v47 = vpop.f32.mrf.mxu1 }
 0xe18   :  { %1086 = vrot.lane.b32.xlu1 %v1072_v45, %s1825_s21  ;;  %v1078_v60 = vadd.f32 %v1077_v56, %v1072_v45  ;;  %1785 = vpow2.f32 %v1520_v57 }
 0xe19   :  { %v1074_v48 = vpop.f32.mrf.mxu1 }
 0xe1a   :  { %v1524_v61 = vmul.f32 -1.442695, %v1078_v60 }
 0xe1b   :  { %v1683_v50 = vpop.f32.mrf.mxu1 }
 0xe1c   :  { %1787 = vpow2.f32 %v1524_v61 }
 0xe25   :  { %v1786_v62 = vpop.eup %1785 }
 0xe26   :  { %v1000_v63 = vadd.f32 1.0, %v1786_v62 }
 0xe28   :  { %1789 = vrcp.f32 %v1000_v63 }
 0xe29   :  { %v1788_v5 = vpop.eup %1787 }
 0xe2a   :  { %v1082_v6 = vadd.f32 1.0, %v1788_v5 }
 0xe2c   :  { %1791 = vrcp.f32 %v1082_v6 }
 0xe35   :  { %v1790_v8 = vpop.eup %1789 }
 0xe36   :  { %v1014_v7 = vsub.f32 1.0, %v1790_v8  ;;  %v1020_v21 = vmul.f32 %v1790_v8, %v2124_v26 }
 0xe39   :  { %v1792_v10 = vpop.eup %1791 }
 0xe3a   :  { %v1096_v24 = vsub.f32 1.0, %v1792_v10  ;;  %v1102_v28 = vmul.f32 %v1792_v10, %v2129_v33 }
 0xe86   :  { %v1005_v58 = vpop.permute.xlu0 %1004 }
 0xe87   :  { %v1007_v9 = vmul.f32 %v1790_v8, %v1005_v58 }
 0xe89   :  { %1009 = vrot.lane.b32.xlu0 %v1007_v9, %s1825_s21 }
 0xe8a   :  { %v1087_v12 = vpop.permute.xlu1 %1086 }
 0xe8b   :  { %v1089_v14 = vmul.f32 %v1792_v10, %v1087_v12 }
 0xe8d   :  { %1091 = vrot.lane.b32.xlu1 %v1089_v14, %s1825_s21 }
 0xefb   :  { %v1010_v55 = vpop.permute.xlu0 %1009 }
 0xefc   :  { %v1012_v15 = vadd.f32 %v1010_v55, %v995_v52 }
 0xefe   :  { %1793 = vtanh.f32 %v1012_v15 }
 0xeff   :  { %v1092_v17 = vpop.permute.xlu1 %1091 }
 0xf00   :  { %v1094_v18 = vadd.f32 %v1092_v17, %v1077_v56 }
 0xf02   :  { %1795 = vtanh.f32 %v1094_v18 }
 0xf0b   :  { %v1794_v19 = vpop.eup %1793 }
 0xf0c   :  { %1016 = vrot.lane.b32.xlu0 %v1794_v19, %s1827_s27 }
 0xf0f   :  { %v1796_v16 = vpop.eup %1795 }
 0xf10   :  { %1098 = vrot.lane.b32.xlu1 %v1796_v16, %s1827_s27 }
 0xf7e   :  { %v1017_v20 = vpop.permute.xlu0 %1016 }
 0xf7f   :  { %v1019_v22 = vmul.f32 %v1017_v20, %v1014_v7 }
 0xf81   :  { %v2165_v23 = vadd.f32 %v1020_v21, %v1019_v22 }
 0xf82   :  { %v1099_v27 = vpop.permute.xlu1 %1098 }
 0xf83   :  { %v1101_v29 = vmul.f32 %v1099_v27, %v1096_v24  ;;  %v1112_v31 = vpack.c.bf16 %v2165_v23, %v2165_v23 }
 0xf85   :  { %v2170_v32 = vadd.f32 %v1102_v28, %v1101_v29  ;;  %1114 = vrot.lane.b32.xlu0 %v1112_v31, %s1827_s27  ;;  %v1821_v31 = vld [vmem:[%s2335_s6] ss:$0 sm:$0xff] }
 0xf87   :  { %v1194_v25 = vpack.c.bf16 %v2170_v32, %v2170_v32 }
 0xf89   :  { %1196 = vrot.lane.b32.xlu1 %v1194_v25, %s1827_s27 }
 0xff7   :  { %v1115_v34 = vpop.permute.xlu0 %1114 }
 0xff8   :  { %1689 = vmatmul.mubr.msk.bf16.vlgmr.msra.gmra.mxu0 %vm73_vm1, %v1115_v34 }
 0xff9   :  { %1701 = vmatpush3.bf16.msra.mxu0 %v1883_v1  ;;  %1704 = vmatprep.mubr.msk.bf16.mxu0 %vm1824_vm0, %v1823_v0 }
 0xffa   :  { %1702 = vmatprep.subr.bf16.mxu0 %v1823_v0 }
 0xffb   :  { %v1197_v37 = vpop.permute.xlu1 %1196 }
 0xffc   :  { %1697 = vmatmul.mubr.msk.bf16.vlgmr.msra.gmra.mxu1 %vm73_vm1, %v1197_v37 }
 0xffd   :  { %1709 = vmatpush3.bf16.msra.mxu1 %v1888_v2  ;;  %1703 = vmatpush3.bf16.msra.mxu0 %v1898_v3 }
 0xffe   :  { %1710 = vmatprep.subr.bf16.mxu1 %v1823_v0  ;;  %1712 = vmatprep.mubr.msk.bf16.mxu1 %vm1824_vm0, %v1823_v0  ;;  %v1159_v0 = vunpack.c.h.bf16 %v2156_v51 }
0x1001   :  { %1711 = vmatpush3.bf16.msra.mxu1 %v1905_v4  ;;  %v2196_v4 = vld [vmem:[%s2338_s1] sm:$0xff]  }
0x1002   :  { %v1241_v47 = vunpack.c.h.bf16 %v2196_v4 }
0x10b8   :  { %v1153_v1 = vpop.f32.mrf.mxu0 }
0x10b9   :  { %v1154_v38 = vadd.f32 %v1937_v11, %v1153_v1 }
0x10ba   :  { %v1690_v39 = vpop.f32.mrf.mxu0 }
0x10bb   :  { %1168 = vrot.lane.b32.xlu0 %v1154_v38, %s1825_s21  ;;  %v1160_v11 = vadd.f32 %v1159_v0, %v1154_v38  ;;  %v1822_v38 = vld [vmem:[%s2336_s7] ss:$0 sm:$0xff] }
0x10bc   :  { %v1156_v40 = vpop.f32.mrf.mxu0  ;;  %v1235_v42 = vpop.f32.mrf.mxu1 }
0x10bd   :  { %v1236_v44 = vadd.f32 %v1942_v13, %v1235_v42  ;;  %v1528_v48 = vmul.f32 -1.442695, %v1160_v11 }
0x10be   :  { %v1691_v2 = vpop.f32.mrf.mxu0  ;;  %v1698_v45 = vpop.f32.mrf.mxu1 }
0x10bf   :  { %1250 = vrot.lane.b32.xlu1 %v1236_v44, %s1825_s21  ;;  %v1242_v50 = vadd.f32 %v1241_v47, %v1236_v44  ;;  %1797 = vpow2.f32 %v1528_v48  ;;  %v1534_v45 = vld [vmem:[%s2337_s0 + $0x1c] sm:$0xf] }
0x10c0   :  { %v1238_v3 = vpop.f32.mrf.mxu1 }
0x10c1   :  { %v1532_v13 = vmul.f32 -1.442695, %v1242_v50  ;;  %v1323_v3 = vunpack.c.l.bf16 %v1534_v45 }
0x10c2   :  { %v1699_v46 = vpop.f32.mrf.mxu1 }
0x10c3   :  { %1799 = vpow2.f32 %v1532_v13 }
0x10cc   :  { %v1798_v52 = vpop.eup %1797 }
0x10cd   :  { %v1164_v54 = vadd.f32 1.0, %v1798_v52 }
0x10cf   :  { %1801 = vrcp.f32 %v1164_v54 }
0x10d0   :  { %v1800_v56 = vpop.eup %1799 }
0x10d1   :  { %v1246_v57 = vadd.f32 1.0, %v1800_v56 }
0x10d3   :  { %1803 = vrcp.f32 %v1246_v57 }
0x10dc   :  { %v1802_v51 = vpop.eup %1801 }
0x10dd   :  { %v1178_v14 = vsub.f32 1.0, %v1802_v51  ;;  %v1184_v15 = vmul.f32 %v1802_v51, %v2165_v23 }
0x10e0   :  { %v1804_v62 = vpop.eup %1803 }
0x10e1   :  { %v1260_v19 = vsub.f32 1.0, %v1804_v62  ;;  %v1266_v7 = vmul.f32 %v1804_v62, %v2170_v32 }
0x112d   :  { %v1169_v60 = vpop.permute.xlu0 %1168 }
0x112e   :  { %v1171_v61 = vmul.f32 %v1802_v51, %v1169_v60 }
0x1130   :  { %1173 = vrot.lane.b32.xlu0 %v1171_v61, %s1825_s21 }
0x1131   :  { %v1251_v63 = vpop.permute.xlu1 %1250 }
0x1132   :  { %v1253_v5 = vmul.f32 %v1804_v62, %v1251_v63 }
0x1134   :  { %1255 = vrot.lane.b32.xlu1 %v1253_v5, %s1825_s21 }
0x11a2   :  { %v1174_v6 = vpop.permute.xlu0 %1173 }
0x11a3   :  { %v1176_v8 = vadd.f32 %v1174_v6, %v1159_v0  ;;  %v1404_v0 = vunpack.c.l.bf16 %v2196_v4 }
0x11a5   :  { %1805 = vtanh.f32 %v1176_v8 }
0x11a6   :  { %v1256_v58 = vpop.permute.xlu1 %1255 }
0x11a7   :  { %v1258_v9 = vadd.f32 %v1256_v58, %v1241_v47 }
0x11a9   :  { %1807 = vtanh.f32 %v1258_v9 }
0x11b2   :  { %v1806_v10 = vpop.eup %1805 }
0x11b3   :  { %1180 = vrot.lane.b32.xlu0 %v1806_v10, %s1827_s27 }
0x11b6   :  { %v1808_v12 = vpop.eup %1807 }
0x11b7   :  { %1262 = vrot.lane.b32.xlu1 %v1808_v12, %s1827_s27 }
0x1225   :  { %v1181_v55 = vpop.permute.xlu0 %1180 }
0x1226   :  { %v1183_v17 = vmul.f32 %v1181_v55, %v1178_v14 }
0x1228   :  { %v2204_v18 = vadd.f32 %v1184_v15, %v1183_v17 }
0x1229   :  { %v1263_v16 = vpop.permute.xlu1 %1262 }
0x122a   :  { %v1265_v20 = vmul.f32 %v1263_v16, %v1260_v19  ;;  %v1276_v21 = vpack.c.bf16 %v2204_v18, %v2204_v18 }
0x122c   :  { %v2209_v22 = vadd.f32 %v1266_v7, %v1265_v20  ;;  %1278 = vrot.lane.b32.xlu0 %v1276_v21, %s1827_s27 }
0x122e   :  { %v1357_v24 = vpack.c.bf16 %v2209_v22, %v2209_v22 }
0x1230   :  { %1359 = vrot.lane.b32.xlu1 %v1357_v24, %s1827_s27 }
0x129e   :  { %v1279_v27 = vpop.permute.xlu0 %1278 }
0x129f   :  { %1705 = vmatmul.mubr.msk.bf16.vlgmr.msra.gmra.mxu0 %vm73_vm1, %v1279_v27 }
0x12a2   :  { %v1360_v28 = vpop.permute.xlu1 %1359 }
0x12a3   :  { %1713 = vmatmul.mubr.msk.bf16.vlgmr.msra.gmra.mxu1 %vm73_vm1, %v1360_v28 }
0x135f   :  { %v1317_v29 = vpop.f32.mrf.mxu0 }
0x1360   :  { %v1318_v25 = vadd.f32 %v1821_v31, %v1317_v29 }
0x1361   :  { %v1706_v34 = vpop.f32.mrf.mxu0 }
0x1362   :  { %1332 = vrot.lane.b32.xlu0 %v1318_v25, %s1825_s21  ;;  %v1324_v46 = vadd.f32 %v1323_v3, %v1318_v25 }
0x1363   :  { %v1320_v37 = vpop.f32.mrf.mxu0  ;;  %v1398_v1 = vpop.f32.mrf.mxu1 }
0x1364   :  { %v1399_v39 = vadd.f32 %v1822_v38, %v1398_v1  ;;  %v1536_v11 = vmul.f32 -1.442695, %v1324_v46 }
0x1365   :  { %v1707_v40 = vpop.f32.mrf.mxu0  ;;  %v1714_v42 = vpop.f32.mrf.mxu1 }
0x1366   :  { %1413 = vrot.lane.b32.xlu1 %v1399_v39, %s1825_s21  ;;  %v1405_v47 = vadd.f32 %v1404_v0, %v1399_v39  ;;  %1809 = vpow2.f32 %v1536_v11 }
0x1367   :  { %v1401_v44 = vpop.f32.mrf.mxu1 }
0x1368   :  { %v1539_v48 = vmul.f32 -1.442695, %v1405_v47 }
0x1369   :  { %v1715_v2 = vpop.f32.mrf.mxu1 }
0x136a   :  { %1811 = vpow2.f32 %v1539_v48 }
0x1373   :  { %v1810_v50 = vpop.eup %1809 }
0x1374   :  { %v1328_v13 = vadd.f32 1.0, %v1810_v50 }
0x1376   :  { %1813 = vrcp.f32 %v1328_v13 }
0x1377   :  { %v1812_v52 = vpop.eup %1811 }
0x1378   :  { %v1409_v54 = vadd.f32 1.0, %v1812_v52 }
0x137a   :  { %1815 = vrcp.f32 %v1409_v54 }
0x1383   :  { %v1814_v56 = vpop.eup %1813 }
0x1387   :  { %v1816_v60 = vpop.eup %1815 }
0x13d4   :  { %v1333_v57 = vpop.permute.xlu0 %1332 }
0x13d5   :  { %v1335_v51 = vmul.f32 %v1814_v56, %v1333_v57 }
0x13d7   :  { %1337 = vrot.lane.b32.xlu0 %v1335_v51, %s1825_s21 }
0x13d8   :  { %v1414_v61 = vpop.permute.xlu1 %1413 }
0x13d9   :  { %v1416_v62 = vmul.f32 %v1816_v60, %v1414_v61 }
0x13db   :  { %1418 = vrot.lane.b32.xlu1 %v1416_v62, %s1825_s21 }
0x1449   :  { %v1338_v4 = vpop.permute.xlu0 %1337 }
0x144a   :  { %v1340_v63 = vadd.f32 %v1338_v4, %v1323_v3 }
0x144c   :  { %1817 = vtanh.f32 %v1340_v63 }
0x144d   :  { %v1419_v5 = vpop.permute.xlu1 %1418 }
0x144e   :  { %v1421_v6 = vadd.f32 %v1419_v5, %v1404_v0 }
0x1450   :  { %1819 = vtanh.f32 %v1421_v6 }
0x1459   :  { %v1818_v8 = vpop.eup %1817 }
0x145a   :  { %1344 = vrot.lane.b32.xlu0 %v1818_v8, %s1827_s27 }
0x145d   :  { %v1820_v58 = vpop.eup %1819 }
0x145e   :  { %185 = vrot.lane.b32.xlu0 %v1961_v53, %s1827_s27  ;;  %1425 = vrot.lane.b32.xlu1 %v1820_v58, %s1827_s27  ;;  %v1342_v53 = vsub.f32 1.0, %v1814_v56 }
0x1462   :  { %367 = vrot.lane.b32.xlu0 %v2001_v43, %s1827_s27  ;;  %285 = vrot.lane.b32.xlu1 %v1965_v59, %s1827_s27  ;;  %v1348_v43 = vmul.f32 %v1814_v56, %v2204_v18 }
0x1466   :  { %531 = vrot.lane.b32.xlu0 %v2042_v35, %s1827_s27  ;;  %449 = vrot.lane.b32.xlu1 %v2006_v49, %s1827_s27 }
0x146a   :  { %695 = vrot.lane.b32.xlu0 %v2083_v30, %s1827_s27  ;;  %613 = vrot.lane.b32.xlu1 %v2047_v41, %s1827_s27  ;;  %v1423_v41 = vsub.f32 1.0, %v1816_v60 }
0x146e   :  { %859 = vrot.lane.b32.xlu0 %v2124_v26, %s1827_s27  ;;  %777 = vrot.lane.b32.xlu1 %v2088_v36, %s1827_s27  ;;  %v1429_v26 = vmul.f32 %v1816_v60, %v2209_v22 }
0x1472   :  { %1023 = vrot.lane.b32.xlu0 %v2165_v23, %s1827_s27  ;;  %941 = vrot.lane.b32.xlu1 %v2129_v33, %s1827_s27 }
0x1476   :  { %1187 = vrot.lane.b32.xlu0 %v2204_v18, %s1827_s27  ;;  %1105 = vrot.lane.b32.xlu1 %v2170_v32, %s1827_s27 }
0x147a   :  { %1269 = vrot.lane.b32.xlu1 %v2209_v22, %s1827_s27 }
0x14cc   :  { %v1345_v59 = vpop.permute.xlu0 %1344 }
0x14cd   :  { %v1347_v49 = vmul.f32 %v1345_v59, %v1342_v53 }
0x14cf   :  { %v1349_v35 = vadd.f32 %v1348_v43, %v1347_v49 }
0x14d0   :  { %v186_v30 = vpop.permute.xlu0 %185  ;;  %v1426_v36 = vpop.permute.xlu1 %1425 }
0x14d1   :  { %188 = vst.msk [vmem:[%s2339_s8] sm:$0xff] %vm73_vm1, %v186_v30  ;;  %v1428_v33 = vmul.f32 %v1426_v36, %v1423_v41  ;;  %1351 = vrot.lane.b32.xlu0 %v1349_v35, %s1827_s27 }
0x14d3   :  { %v1430_v23 = vadd.f32 %v1429_v26, %v1428_v33 }
0x14d4   :  { %v368_v32 = vpop.permute.xlu0 %367  ;;  %v286_v9 = vpop.permute.xlu1 %285 }
0x14d5   :  { %1489 = vst.msk [vmem:[%s2339_s8 + $0x8] sm:$0xff] %vm73_vm1, %v368_v32  ;;  %1485 = vst.msk [vmem:[%s2340_s9 + $0x38] sm:$0xff] %vm73_vm1, %v286_v9  ;;  %1432 = vrot.lane.b32.xlu1 %v1430_v23, %s1827_s27 }
0x14d8   :  { %v532_v10 = vpop.permute.xlu0 %531  ;;  %v450_v12 = vpop.permute.xlu1 %449 }
0x14d9   :  { %1497 = vst.msk [vmem:[%s2339_s8 + $0x10] sm:$0xff] %vm73_vm1, %v532_v10  ;;  %1493 = vst.msk [vmem:[%s2340_s9 + $0x30] sm:$0xff] %vm73_vm1, %v450_v12 }
0x14dc   :  { %v696_v14 = vpop.permute.xlu0 %695  ;;  %v614_v55 = vpop.permute.xlu1 %613 }
0x14dd   :  { %1505 = vst.msk [vmem:[%s2339_s8 + $0x18] sm:$0xff] %vm73_vm1, %v696_v14  ;;  %1501 = vst.msk [vmem:[%s2340_s9 + $0x28] sm:$0xff] %vm73_vm1, %v614_v55 }
0x14e0   :  { %v860_v15 = vpop.permute.xlu0 %859  ;;  %v778_v17 = vpop.permute.xlu1 %777 }
0x14e1   :  { %1513 = vst.msk [vmem:[%s2339_s8 + $0x20] sm:$0xff] %vm73_vm1, %v860_v15  ;;  %1509 = vst.msk [vmem:[%s2340_s9 + $0x20] sm:$0xff] %vm73_vm1, %v778_v17 }
0x14e4   :  { %v1024_v18 = vpop.permute.xlu0 %1023  ;;  %v942_v19 = vpop.permute.xlu1 %941 }
0x14e5   :  { %1521 = vst.msk [vmem:[%s2339_s8 + $0x28] sm:$0xff] %vm73_vm1, %v1024_v18  ;;  %1517 = vst.msk [vmem:[%s2340_s9 + $0x18] sm:$0xff] %vm73_vm1, %v942_v19 }
0x14e8   :  { %v1188_v16 = vpop.permute.xlu0 %1187  ;;  %v1106_v7 = vpop.permute.xlu1 %1105 }
0x14e9   :  { %1529 = vst.msk [vmem:[%s2339_s8 + $0x30] sm:$0xff] %vm73_vm1, %v1188_v16  ;;  %1525 = vst.msk [vmem:[%s2340_s9 + $0x10] sm:$0xff] %vm73_vm1, %v1106_v7 }
0x14ec   :  { %v1270_v20 = vpop.permute.xlu1 %1269 }
0x14ed   :  { %1533 = vst.msk [vmem:[%s2340_s9 + $0x8] sm:$0xff] %vm73_vm1, %v1270_v20 }
0x1543   :  { %v1352_v21 = vpop.permute.xlu0 %1351 }
0x1544   :  { %1537 = vst.msk [vmem:[%s2339_s8 + $0x38] sm:$0xff] %vm73_vm1, %v1352_v21  ;;  %1436 = vst.msk [vmem:[#allocation2] sm:$0xff] %vm73_vm1, %v1352_v21 }
0x1547   :  { %v1433_v22 = vpop.permute.xlu1 %1432 }
0x1548   :  { %1435 = vst.msk [vmem:[%s2340_s9] sm:$0xff] %vm73_vm1, %v1433_v22  ;;  %1437 = vst.msk [vmem:[#allocation3] sm:$0xff] %vm73_vm1, %v1433_v22 }

// kernel: rnn_encoder_forward.11
= control target key start
LH: loop header
LB: loop body
LE: loop exit
PB: predicated region body
PF: predicated region fallthrough
CT: control target
= control target key end

     0   :  { %11 = vsyncpa [#allocation3], 0  ;;  %v939_v1 = vmov 0.0   ;;  %vm940_vm0 = vmmov 0   ;;  %s1193_s0 = inlined_call_operand.vmem [shape: f32[4,4,64], index: 0, kind: input, shape index: {}]   ;;  %s1194_s1 = inlined_call_operand.vmem [shape: f32[4,4,64], index: 1, kind: input, shape index: {}]   ;;  %s1195_s2 = inlined_call_operand.vmem [shape: bf16[64,64], index: 2, kind: input, shape index: {}]   ;;  %s1196_s3 = inlined_call_operand.hbm [shape: f32[4,64], index: 3, kind: output, shape index: {0}]   ;;  %s1197_s4 = inlined_call_operand.hbm [shape: f32[4,64], index: 4, kind: output, shape index: {1}]   ;;  %s1198_s5 = inlined_call_operand.hbm [shape: f32[4,4], index: 5, kind: output, shape index: {2}]  }
   0x1   :  { %v979_v0 = vld [vmem:[%s1195_s2 + $0x18] sm:$0xff]   ;;  %796 = vmatprep.subr.bf16.mxu0 %v939_v1  ;;  %808 = vmatprep.subr.bf16.mxu1 %v939_v1  ;;  %v988_v2 = vld [vmem:[%s1195_s2 + $0x10] sm:$0xff]   ;;  %v999_v3 = vld [vmem:[%s1194_s1] sm:$0xf] }
   0x2   :  { %797 = vmatpush3.bf16.msra.mxu0 %v979_v0  ;;  %809 = vmatpush3.bf16.msra.mxu1 %v979_v0  ;;  %v1004_v4 = vld [vmem:[%s1194_s1 + $0x4] sm:$0xf]  ;;  %v1009_v5 = vld [vmem:[%s1194_s1 + $0x8] sm:$0xf]  ;;  %v1014_v6 = vld [vmem:[%s1194_s1 + $0xc] sm:$0xf]  ;;  %v36_v7 = vpack.c.bf16 %v999_v3, %v999_v3 }
   0x3   :  { %798 = vmatprep.subr.bf16.mxu0 %v939_v1  ;;  %810 = vmatprep.subr.bf16.mxu1 %v939_v1  ;;  %v37_v8 = vpack.c.bf16 %v1004_v4, %v1004_v4  ;;  %v38_v9 = vpack.c.bf16 %v1009_v5, %v1009_v5 }
   0x4   :  { %804 = vmatprep.mubr.msk.bf16.mxu0 %vm940_vm0, %v939_v1  ;;  %816 = vmatprep.mubr.msk.bf16.mxu1 %vm940_vm0, %v939_v1 }
   0x5   :  { %12 = vsyncpa [#allocation5], 0  ;;  %v855_v10 = vld [vmem:[%s1195_s2 + $0x8] sm:$0xff]   ;;  %v39_v11 = vpack.c.bf16 %v1014_v6, %v1014_v6  ;;  %v44_v12 = vunpack.c.l.b16 %v36_v7  ;;  %v45_v13 = vunpack.c.l.b16 %v37_v8  ;;  %v46_v14 = vunpack.c.l.b16 %v38_v9  ;;  %v856_v20 = vld [vmem:[%s1195_s2] sm:$0xff]   ;;  %s944_s16 = smov [#allocation2]   ;;  %s945_s18 = smov [#allocation6]  }
   0x6   :  { %799 = vmatpush3.bf16.msra.mxu0 %v988_v2  ;;  %811 = vmatpush3.bf16.msra.mxu1 %v988_v2  ;;  %vm49_vm1 = vcmask 1041409   ;;  %vm52_vm2 = vcmask 1042434   ;;  %vm55_vm3 = vcmask 1043459   ;;  %vm82_vm4 = vcmask 523264   ;;  %s733_s17 = sshll.u32 %s944_s16, 4  ;;  %s753_s19 = sshll.u32 %s945_s18, 4  ;;  %s734_s17 = int_to_ptr.vmem [resolvable:$true] %s733_s17  ;;  %s754_s19 = int_to_ptr.vmem [resolvable:$true] %s753_s19 }
   0x7   :  { %800 = vmatprep.subr.bf16.mxu0 %v939_v1  ;;  %812 = vmatprep.subr.bf16.mxu1 %v939_v1  ;;  %v47_v15 = vunpack.c.l.b16 %v39_v11  ;;  %v48_v16 = vrot.slane %v45_v13, 7  ;;  %v51_v17 = vrot.slane %v46_v14, 6  ;;  %v126_v18 = vrot.slane %v44_v12, 1 }
   0x8   :  { %v128_v19 = vrot.slane %v46_v14, 7  ;;  %v176_v31 = vrot.slane %v44_v12, 2  ;;  %v177_v32 = vrot.slane %v45_v13, 1  ;;  %v226_v33 = vrot.slane %v44_v12, 3 }
   0x9   :  { %v54_v21 = vrot.slane %v47_v15, 5  ;;  %v130_v22 = vrot.slane %v47_v15, 6  ;;  %v50_v23 = vsel %vm49_vm1, %v48_v16, %v44_v12  ;;  %v127_v24 = vsel %vm49_vm1, %v45_v13, %v126_v18 }
   0xa   :  { %801 = vmatpush3.bf16.msra.mxu0 %v855_v10  ;;  %813 = vmatpush3.bf16.msra.mxu1 %v855_v10  ;;  %v53_v25 = vsel %vm52_vm2, %v51_v17, %v50_v23  ;;  %v129_v26 = vsel %vm52_vm2, %v128_v19, %v127_v24  ;;  %v227_v34 = vrot.slane %v45_v13, 2  ;;  %v229_v35 = vrot.slane %v46_v14, 1 }
   0xb   :  { %802 = vmatprep.subr.bf16.mxu0 %v939_v1  ;;  %814 = vmatprep.subr.bf16.mxu1 %v939_v1  ;;  %v56_v27 = vsel %vm55_vm3, %v54_v21, %v53_v25  ;;  %v131_v28 = vsel %vm55_vm3, %v130_v22, %v129_v26  ;;  %v178_v36 = vsel %vm49_vm1, %v177_v32, %v176_v31  ;;  %v180_v38 = vrot.slane %v47_v15, 7 }
   0xc   :  { %v57_v29 = vpack.c.b16 %v56_v27, %v56_v27  ;;  %v132_v30 = vpack.c.b16 %v131_v28, %v131_v28  ;;  %v228_v37 = vsel %vm49_vm1, %v227_v34, %v226_v33  ;;  %v179_v39 = vsel %vm52_vm2, %v46_v14, %v178_v36 }
   0xd   :  { %v230_v40 = vsel %vm52_vm2, %v229_v35, %v228_v37  ;;  %v181_v41 = vsel %vm55_vm3, %v180_v38, %v179_v39  ;;  %v941_v45 = vmov 1966171168   ;;  %v280_v47 = vlaneseq }
   0xe   :  { %803 = vmatpush3.bf16.msra.mxu0 %v856_v20  ;;  %815 = vmatpush3.bf16.msra.mxu1 %v856_v20  ;;  %v231_v42 = vsel %vm55_vm3, %v47_v15, %v230_v40  ;;  %v182_v43 = vpack.c.b16 %v181_v41, %v181_v41  ;;  %v278_v46 = vunpack.c.l.s4 %v941_v45  ;;  %vm440_vm5 = vcmask 1040384  }
   0xf   :  { %820 = vmatprep.subr.bf16.mxu0 %v939_v1  ;;  %832 = vmatprep.subr.bf16.mxu1 %v939_v1  ;;  %v232_v44 = vpack.c.b16 %v231_v42, %v231_v42  ;;  %v1069_v49 = vshrl.u32 %v280_v47, 7  ;;  %vm445_vm6 = vcmask 1041408   ;;  %vm450_vm7 = vcmask 1042432  }
  0x10   :  { %v279_v48 = vunpack.c.0.s8 %v278_v46  ;;  %vm459_vm8 = vcmask 519168   ;;  %vm502_vm9 = vcmask 27648  }
  0x11   :  { %805 = vmatmul.mubr.msk.bf16.vlgmr.msra.gmra.mxu0 %vm82_vm4, %v57_v29  ;;  %817 = vmatmul.mubr.msk.bf16.vlgmr.msra.gmra.mxu1 %vm82_vm4, %v132_v30 }
  0x12   :  { %821 = vmatpush3.bf16.msra.mxu0 %v979_v0  ;;  %833 = vmatpush3.bf16.msra.mxu1 %v979_v0  ;;  %v282_v51 = vsub.s32 %v279_v48, %v1069_v49  ;;  %v1097_v48 = vld [vmem:[%s1193_s0 + $0x8] sm:$0xf] }
  0x13   :  { %822 = vmatprep.subr.bf16.mxu0 %v939_v1  ;;  %834 = vmatprep.subr.bf16.mxu1 %v939_v1 }
  0x14   :  { %828 = vmatprep.mubr.msk.bf16.mxu0 %vm940_vm0, %v939_v1  ;;  %840 = vmatprep.mubr.msk.bf16.mxu1 %vm940_vm0, %v939_v1 }
  0x16   :  { %823 = vmatpush3.bf16.msra.mxu0 %v988_v2  ;;  %835 = vmatpush3.bf16.msra.mxu1 %v988_v2 }
  0x17   :  { %824 = vmatprep.subr.bf16.mxu0 %v939_v1  ;;  %836 = vmatprep.subr.bf16.mxu1 %v939_v1 }
  0x1a   :  { %825 = vmatpush3.bf16.msra.mxu0 %v855_v10  ;;  %837 = vmatpush3.bf16.msra.mxu1 %v855_v10 }
  0x1b   :  { %826 = vmatprep.subr.bf16.mxu0 %v939_v1  ;;  %838 = vmatprep.subr.bf16.mxu1 %v939_v1  ;;  %v1073_v1 = vsub.s32 0, %v1069_v49 }
  0x1e   :  { %827 = vmatpush3.bf16.msra.mxu0 %v856_v20  ;;  %839 = vmatpush3.bf16.msra.mxu1 %v856_v20 }
  0x21   :  { %829 = vmatmul.mubr.msk.bf16.vlgmr.msra.gmra.mxu0 %vm82_vm4, %v182_v43  ;;  %841 = vmatmul.mubr.msk.bf16.vlgmr.msra.gmra.mxu1 %vm82_vm4, %v232_v44  ;;  %v1089_v43 = vld [vmem:[%s1193_s0] sm:$0xf] }
  0xd1   :  { %v120_v50 = vpop.f32.mrf.mxu0  ;;  %v170_v52 = vpop.f32.mrf.mxu1 }
  0xd2   :  { %v312_v55 = vrot.slane %v170_v52, %v282_v51  ;;  %v283_v60 = vrot.slane %v120_v50, %v282_v51 }
  0xd3   :  { %v806_v53 = vpop.f32.mrf.mxu0  ;;  %v818_v54 = vpop.f32.mrf.mxu1 }
  0xd4   :  { %v313_v61 = vcombine.high %v312_v55, %v312_v55  ;;  %v320_v62 = vrot.slane %v312_v55, %v282_v51  ;;  %v284_v63 = vcombine.high %v283_v60, %v283_v60  ;;  %v291_v2 = vrot.slane %v283_v60, %v282_v51  ;;  %v1106_v54 = vld [vmem:[%s1193_s0 + $0x4] sm:$0xf] }
  0xd5   :  { %v123_v56 = vpop.f32.mrf.mxu0  ;;  %v173_v57 = vpop.f32.mrf.mxu1 }
  0xd6   :  { %v327_v0 = vrot.slane %v313_v61, %v282_v51  ;;  %v328_v7 = vcombine.high %v320_v62, %v320_v62  ;;  %v298_v8 = vrot.slane %v284_v63, %v282_v51  ;;  %v383_v10 = vrot.slane %v320_v62, %v1073_v1 }
  0xd7   :  { %v807_v58 = vpop.f32.mrf.mxu0  ;;  %v819_v59 = vpop.f32.mrf.mxu1  ;;  %v299_v15 = vcombine.high %v291_v2, %v291_v2 }
  0xd8   :  { %v329_v9 = vcombine.high %v327_v0, %v327_v0  ;;  %v387_v16 = vrot.slane %v327_v0, %v1073_v1  ;;  %v391_v17 = vrot.slane %v328_v7, %v1073_v1  ;;  %v300_v24 = vcombine.high %v298_v8, %v298_v8  ;;  %v1115_v59 = vld [vmem:[%s1193_s0 + $0xc] sm:$0xf]  ;;  %s943_s0 = smov [#allocation4]  }
  0xd9   :  { %v441_v28 = vsel %vm440_vm5, %v291_v2, %v383_v10  ;;  %s743_s15 = sshll.u32 %s943_s0, 4  ;;  %s744_s15 = int_to_ptr.vmem [resolvable:$true] %s743_s15 }
  0xda   :  { %v395_v25 = vrot.slane %v329_v9, %v1073_v1  ;;  %v443_v37 = vsel %vm440_vm5, %v299_v15, %v391_v17  ;;  %v442_v38 = vsel %vm440_vm5, %v298_v8, %v387_v16  ;;  %v481_v15 = vand.u32 127, %v280_v47  ;;  %s875_s20 = scalar_lea.vmem %s744_s15, 64  ;;  %p880_p1 = scmp.lt.s32.totalorder %s744_s15, %s744_s15 }
  0xdb   :  { %p876_p0 = scmp.ne.s32.totalorder %s744_s15, %s875_s20  ;;  %p881_p2 = scmp.lt.s32.totalorder %s875_s20, %s875_s20 }
  0xdc   :  { %v444_v50 = vsel %vm440_vm5, %v300_v24, %v395_v25  ;;  %v1129_v16 = vsub.s32 %v481_v15, %v1069_v49 }
  0xdd   :  { %p882_p3 = por %p881_p2, %p880_p1 }
  0xdf   :  { %p883_p4 = pnand %p882_p3, %p876_p0 }
  0xe1   :  { %v220_v11 = vpop.f32.mrf.mxu0  ;;  %v270_v12 = vpop.f32.mrf.mxu1 }
  0xe2   :  { %v337_v13 = vrot.slane %v220_v11, %v282_v51  ;;  %v362_v14 = vrot.slane %v270_v12, %v282_v51 }
  0xe3   :  { %v830_v18 = vpop.f32.mrf.mxu0  ;;  %v842_v19 = vpop.f32.mrf.mxu1 }
  0xe4   :  { %v338_v20 = vcombine.high %v337_v13, %v337_v13  ;;  %v345_v21 = vrot.slane %v337_v13, %v282_v51  ;;  %v363_v22 = vcombine.high %v362_v14, %v362_v14  ;;  %v370_v23 = vrot.slane %v362_v14, %v282_v51 }
  0xe5   :  { %v223_v26 = vpop.f32.mrf.mxu0  ;;  %v273_v27 = vpop.f32.mrf.mxu1 }
  0xe6   :  { %v352_v29 = vrot.slane %v338_v20, %v282_v51  ;;  %v353_v30 = vcombine.high %v345_v21, %v345_v21  ;;  %v403_v31 = vrot.slane %v345_v21, %v1073_v1  ;;  %v377_v32 = vrot.slane %v363_v22, %v282_v51 }
  0xe7   :  { %v378_v33 = vcombine.high %v370_v23, %v370_v23  ;;  %v423_v34 = vrot.slane %v370_v23, %v1073_v1  ;;  %v831_v35 = vpop.f32.mrf.mxu0  ;;  %v843_v36 = vpop.f32.mrf.mxu1 }
  0xe8   :  { %v354_v39 = vcombine.high %v352_v29, %v352_v29  ;;  %v407_v40 = vrot.slane %v352_v29, %v1073_v1  ;;  %v411_v41 = vrot.slane %v353_v30, %v1073_v1  ;;  %v379_v42 = vcombine.high %v377_v32, %v377_v32 }
  0xe9   :  { %v427_v44 = vrot.slane %v377_v32, %v1073_v1  ;;  %v431_v45 = vrot.slane %v378_v33, %v1073_v1  ;;  %v446_v46 = vsel %vm445_vm6, %v441_v28, %v403_v31  ;;  %v942_v28 = vmov 0  }
  0xea   :  { %v415_v51 = vrot.slane %v354_v39, %v1073_v1  ;;  %v451_v52 = vsel %vm450_vm7, %v446_v46, %v423_v34  ;;  %v448_v53 = vsel %vm445_vm6, %v443_v37, %v411_v41  ;;  %v447_v55 = vsel %vm445_vm6, %v442_v38, %v407_v40  ;;  %852 = vset.pattern.permute.xlu0 %v942_v28 }
  0xeb   :  { %v455_v56 = vmul.f32 %v451_v52, %v1089_v43  ;;  %v453_v57 = vsel %vm450_vm7, %v448_v53, %v431_v45  ;;  %v452_v58 = vsel %vm450_vm7, %v447_v55, %v427_v44  ;;  %v435_v60 = vrot.slane %v379_v42, %v1073_v1  ;;  %851 = vset.pattern.permute.xlu1 %v942_v28 }
  0xec   :  { %v457_v61 = vmul.f32 %v453_v57, %v1097_v48  ;;  %v449_v62 = vsel %vm445_vm6, %v444_v50, %v415_v51  ;;  %v456_v0 = vmul.f32 %v452_v58, %v1106_v54  ;;  %v513_v29 = vsub.s32 1, %v1069_v49 }
  0xed   :  { %v460_v63 = vsel %vm459_vm8, %v455_v56, 0.0  ;;  %v454_v2 = vsel %vm450_vm7, %v449_v62, %v435_v60  ;;  %v517_v30 = vsub.s32 2, %v1069_v49  ;;  %v521_v31 = vsub.s32 3, %v1069_v49 }
  0xee   :  { %461 = vadd.xlane.f32.xlu0 %v460_v63  ;;  %v466_v7 = vsel %vm459_vm8, %v457_v61, 0.0  ;;  %v458_v8 = vmul.f32 %v454_v2, %v1115_v59  ;;  %v463_v9 = vsel %vm459_vm8, %v456_v0, 0.0 }
  0xef   :  { %467 = vadd.xlane.f32.xlu1 %v466_v7 }
  0xf0   :  { %v469_v10 = vsel %vm459_vm8, %v458_v8, 0.0 }
  0xf2   :  { %464 = vadd.xlane.f32.xlu0 %v463_v9 }
  0xf3   :  { %470 = vadd.xlane.f32.xlu1 %v469_v10 }
 0x177   :  { %v462_v11 = vpop.xlane.xlu0 %461 }
 0x178   :  { %v468_v12 = vpop.xlane.xlu1 %467  ;;  %857 = vtanh.f32 %v462_v11 }
 0x179   :  { %859 = vtanh.f32 %v468_v12 }
 0x17b   :  { %v465_v13 = vpop.xlane.xlu0 %464 }
 0x17c   :  { %861 = vtanh.f32 %v465_v13  ;;  %v471_v14 = vpop.xlane.xlu1 %470 }
 0x17d   :  { %863 = vtanh.f32 %v471_v14 }
 0x185   :  { %v858_v17 = vpop.eup %857 }
 0x186   :  { %v860_v18 = vpop.eup %859  ;;  %v485_v21 = vrot.slane %v858_v17, %v1129_v16 }
 0x187   :  { %v493_v23 = vrot.slane %v860_v18, %v1129_v16 }
 0x189   :  { %v862_v19 = vpop.eup %861 }
 0x18a   :  { %v864_v20 = vpop.eup %863  ;;  %v489_v22 = vrot.slane %v862_v19, %v1129_v16 }
 0x18b   :  { %v497_v24 = vrot.slane %v864_v20, %v1129_v16 }
 0x18c   :  { %v498_v25 = vsel %vm49_vm1, %v489_v22, %v485_v21 }
 0x18d   :  { %v499_v47 = vsel %vm52_vm2, %v493_v23, %v498_v25 }
 0x18e   :  { %v500_v26 = vsel %vm55_vm3, %v497_v24, %v499_v47 }
 0x18f   :  { %v503_v27 = vsel %vm502_vm9, %v500_v26, -inf }
 0x190   :  { %504 = vmax.xlane.f32.xlu0 %v503_v27 }
 0x219   :  { %v505_v32 = vpop.xlane.xlu0 %504 }
 0x21a   :  { %v510_v33 = vrot.slane %v505_v32, %v1073_v1  ;;  %v514_v34 = vrot.slane %v505_v32, %v513_v29  ;;  %v518_v35 = vrot.slane %v505_v32, %v517_v30  ;;  %v522_v36 = vrot.slane %v505_v32, %v521_v31 }
 0x21c   :  { %v527_v37 = vsub.f32 %v858_v17, %v510_v33  ;;  %v528_v38 = vsub.f32 %v862_v19, %v514_v34  ;;  %v529_v39 = vsub.f32 %v860_v18, %v518_v35  ;;  %v530_v42 = vsub.f32 %v864_v20, %v522_v36 }
 0x21e   :  { %v531_v40 = vmul.f32 1.442695, %v527_v37  ;;  %v533_v41 = vmul.f32 1.442695, %v528_v38  ;;  %v535_v44 = vmul.f32 1.442695, %v529_v39 }
 0x21f   :  { %v537_v45 = vmul.f32 1.442695, %v530_v42 }
 0x220   :  { %865 = vpow2.f32 %v531_v40 }
 0x221   :  { %867 = vpow2.f32 %v533_v41 }
 0x222   :  { %869 = vpow2.f32 %v535_v44 }
 0x223   :  { %871 = vpow2.f32 %v537_v45 }
 0x22d   :  { %v866_v46 = vpop.eup %865 }
 0x22e   :  { %v868_v49 = vpop.eup %867  ;;  %544 = vperm.xlu1 %851, %v866_v46  }
 0x22f   :  { %547 = vperm.xlu0 %852, %v868_v49   ;;  %v870_v50 = vpop.eup %869 }
 0x230   :  { %v872_v51 = vpop.eup %871 }
 0x232   :  { %550 = vperm.xlu1 %851, %v870_v50  }
 0x236   :  { %553 = vperm.xlu1 %851, %v872_v51  }
 0x2a9   :  { %v545_v52 = vpop.permute.xlu1 %544 }
 0x2aa   :  { %v548_v53 = vpop.permute.xlu0 %547  ;;  %v558_v57 = vrot.slane %v545_v52, %v1129_v16 }
 0x2ab   :  { %v562_v56 = vrot.slane %v548_v53, %v1129_v16 }
 0x2ad   :  { %v551_v55 = vpop.permute.xlu1 %550  ;;  %v571_v61 = vsel %vm49_vm1, %v562_v56, %v558_v57 }
 0x2ae   :  { %v566_v58 = vrot.slane %v551_v55, %v1129_v16 }
 0x2b0   :  { %v572_v63 = vsel %vm52_vm2, %v566_v58, %v571_v61 }
 0x2b1   :  { %v554_v60 = vpop.permute.xlu1 %553 }
 0x2b2   :  { %v570_v62 = vrot.slane %v554_v60, %v1129_v16 }
 0x2b4   :  { %v573_v0 = vsel %vm55_vm3, %v570_v62, %v572_v63 }
 0x2b5   :  { %v575_v2 = vsel %vm502_vm9, %v573_v0, 0.0 }
 0x2b6   :  { %576 = vadd.xlane.f32.xlu1 %v575_v2 }
 0x33f   :  { %v577_v7 = vpop.xlane.xlu1 %576 }
 0x340   :  { %873 = vrcp.f32 %v577_v7 }
 0x34d   :  { %v874_v8 = vpop.eup %873 }
 0x34e   :  { %v583_v9 = vrot.slane %v874_v8, %v1073_v1  ;;  %v587_v11 = vrot.slane %v874_v8, %v513_v29  ;;  %v591_v13 = vrot.slane %v874_v8, %v517_v30  ;;  %v595_v15 = vrot.slane %v874_v8, %v521_v31 }
 0x350   :  { %v600_v10 = vmul.f32 %v866_v46, %v583_v9  ;;  %v601_v12 = vmul.f32 %v868_v49, %v587_v11  ;;  %v602_v14 = vmul.f32 %v870_v50, %v591_v13  ;;  %v603_v17 = vmul.f32 %v872_v51, %v595_v15 }
 0x352   :  { %606 = vperm.xlu0 %852, %v600_v10  }
 0x356   :  { %611 = vperm.xlu0 %852, %v601_v12  }
 0x35a   :  { %616 = vperm.xlu0 %852, %v602_v14  }
 0x35e   :  { %621 = vperm.xlu0 %852, %v603_v17  }
 0x3cd   :  { %v607_v18 = vpop.permute.xlu0 %606 }
 0x3ce   :  { %v624_v19 = vmul.f32 %v607_v18, %v1089_v43  ;;  %v665_v20 = vmul.f32 %v607_v18, %v999_v3  ;;  %v709_v32 = vrot.slane %v607_v18, %v1129_v16 }
 0x3d0   :  { %v628_v21 = vsel %vm459_vm8, %v624_v19, 0.0  ;;  %v669_v1 = vsel %vm459_vm8, %v665_v20, 0.0 }
 0x3d1   :  { %v629_v22 = vrot.slane %v628_v21, 4  ;;  %v670_v23 = vrot.slane %v669_v1, 4  ;;  %v612_v24 = vpop.permute.xlu0 %611 }
 0x3d2   :  { %v625_v25 = vmul.f32 %v612_v24, %v1106_v54  ;;  %v666_v47 = vmul.f32 %v612_v24, %v1004_v4  ;;  %v713_v43 = vrot.slane %v612_v24, %v1129_v16 }
 0x3d3   :  { %v630_v26 = vadd.f32 %v629_v22, %v628_v21  ;;  %v671_v29 = vadd.f32 %v670_v23, %v669_v1 }
 0x3d4   :  { %v635_v27 = vsel %vm459_vm8, %v625_v25, 0.0  ;;  %v676_v28 = vsel %vm459_vm8, %v666_v47, 0.0  ;;  %v722_v38 = vsel %vm49_vm1, %v713_v43, %v709_v32 }
 0x3d5   :  { %v636_v3 = vrot.slane %v635_v27, 4  ;;  %v677_v30 = vrot.slane %v676_v28, 4  ;;  %v617_v31 = vpop.permute.xlu0 %616  ;;  %v631_v54 = vrot.slane %v630_v26, 2  ;;  %v672_v39 = vrot.slane %v671_v29, 2 }
 0x3d6   :  { %v626_v33 = vmul.f32 %v617_v31, %v1097_v48  ;;  %v667_v34 = vmul.f32 %v617_v31, %v1009_v5  ;;  %v717_v42 = vrot.slane %v617_v31, %v1129_v16 }
 0x3d7   :  { %v637_v35 = vadd.f32 %v636_v3, %v635_v27  ;;  %v678_v4 = vadd.f32 %v677_v30, %v676_v28  ;;  %v632_v49 = vadd.f32 %v631_v54, %v630_v26  ;;  %v673_v58 = vadd.f32 %v672_v39, %v671_v29 }
 0x3d8   :  { %v642_v36 = vsel %vm459_vm8, %v626_v33, 0.0  ;;  %v683_v37 = vsel %vm459_vm8, %v667_v34, 0.0  ;;  %v723_v62 = vsel %vm52_vm2, %v717_v42, %v722_v38 }
 0x3d9   :  { %v638_v40 = vrot.slane %v637_v35, 2  ;;  %v679_v41 = vrot.slane %v678_v4, 2  ;;  %v622_v44 = vpop.permute.xlu0 %621  ;;  %v643_v45 = vrot.slane %v642_v36, 4  ;;  %v684_v46 = vrot.slane %v683_v37, 4 }
 0x3da   :  { %v627_v48 = vmul.f32 %v622_v44, %v1115_v59  ;;  %v668_v5 = vmul.f32 %v622_v44, %v1014_v6  ;;  %v721_v52 = vrot.slane %v622_v44, %v1129_v16  ;;  %v633_v10 = vrot.slane %v632_v49, 1 }
 0x3db   :  { %v639_v50 = vadd.f32 %v638_v40, %v637_v35  ;;  %v680_v51 = vadd.f32 %v679_v41, %v678_v4  ;;  %v644_v53 = vadd.f32 %v643_v45, %v642_v36  ;;  %v685_v55 = vadd.f32 %v684_v46, %v683_v37 }
 0x3dc   :  { %v649_v56 = vsel %vm459_vm8, %v627_v48, 0.0  ;;  %v690_v57 = vsel %vm459_vm8, %v668_v5, 0.0  ;;  %v724_v6 = vsel %vm55_vm3, %v721_v52, %v723_v62  ;;  %v674_v11 = vrot.slane %v673_v58, 1 }
 0x3dd   :  { %v650_v60 = vrot.slane %v649_v56, 4  ;;  %v691_v61 = vrot.slane %v690_v57, 4  ;;  %v645_v63 = vrot.slane %v644_v53, 2  ;;  %v686_v59 = vrot.slane %v685_v55, 2  ;;  %726 = vst.msk [vmem:[#allocation6] sm:$0xf] %vm502_vm9, %v724_v6 }
 0x3de   :  { %v640_v0 = vrot.slane %v639_v50, 1  ;;  %v681_v2 = vrot.slane %v680_v51, 1  ;;  %v675_v22 = vadd.f32 %v674_v11, %v673_v58  ;;  %v634_v24 = vadd.f32 %v633_v10, %v632_v49 }
 0x3df   :  { %v651_v7 = vadd.f32 %v650_v60, %v649_v56  ;;  %v692_v8 = vadd.f32 %v691_v61, %v690_v57  ;;  %v646_v16 = vadd.f32 %v645_v63, %v644_v53  ;;  %v687_v9 = vadd.f32 %v686_v59, %v685_v55 }
 0x3e0   :  { %v682_v17 = vadd.f32 %v681_v2, %v680_v51  ;;  %v641_v20 = vadd.f32 %v640_v0, %v639_v50 }
 0x3e1   :  { %v652_v12 = vrot.slane %v651_v7, 2  ;;  %v693_v13 = vrot.slane %v692_v8, 2  ;;  %v688_v14 = vrot.slane %v687_v9, 1  ;;  %v647_v15 = vrot.slane %v646_v16, 1 }
 0x3e2   :  { %v701_v26 = vsel %vm49_vm1, %v682_v17, %v675_v22  ;;  %v660_v28 = vsel %vm49_vm1, %v641_v20, %v634_v24 }
 0x3e3   :  { %v653_v18 = vadd.f32 %v652_v12, %v651_v7  ;;  %v694_v19 = vadd.f32 %v693_v13, %v692_v8  ;;  %v689_v21 = vadd.f32 %v688_v14, %v687_v9  ;;  %v648_v1 = vadd.f32 %v647_v15, %v646_v16 }
 0x3e5   :  { %v695_v23 = vrot.slane %v694_v19, 1  ;;  %v654_v25 = vrot.slane %v653_v18, 1  ;;  %v702_v43 = vsel %vm52_vm2, %v689_v21, %v701_v26  ;;  %v661_v29 = vsel %vm52_vm2, %v648_v1, %v660_v28 }
 0x3e7   :  { %v696_v47 = vadd.f32 %v695_v23, %v694_v19  ;;  %v655_v27 = vadd.f32 %v654_v25, %v653_v18 }
 0x3e9   :  { %v703_v3 = vsel %vm55_vm3, %v696_v47, %v702_v43  ;;  %v662_v30 = vsel %vm55_vm3, %v655_v27, %v661_v29 }
 0x3ea   :  { %705 = vst.msk [vmem:[#allocation4] sm:$0xf] %vm459_vm8, %v703_v3  ;;  %664 = vst.msk [vmem:[#allocation2] sm:$0xf] %vm459_vm8, %v662_v30 }
 0x3eb   :  { %886 = shalt.err (!%p883_p4)
}
 0x3ec   :  { %746 = dma.vmem_to_hbm [thread:$0]  %s744_s15, 64, %s1197_s4, [#allocation5]  }
 0x3ed   :  { %s895_s23 = scalar_lea.vmem %s734_s17, 64  ;;  %p900_p6 = scmp.lt.s32.totalorder %s734_s17, %s734_s17 }
 0x3ee   :  { %p896_p5 = scmp.ne.s32.totalorder %s734_s17, %s895_s23  ;;  %p901_p7 = scmp.lt.s32.totalorder %s895_s23, %s895_s23 }
 0x3f0   :  { %p902_p8 = por %p901_p7, %p900_p6 }
 0x3f2   :  { %p903_p9 = pnand %p902_p8, %p896_p5 }
 0x3f4   :  { %906 = shalt.err (!%p903_p9)
}
 0x3f5   :  { %736 = dma.vmem_to_hbm [thread:$0]  %s734_s17, 64, %s1196_s3, [#allocation3]  }
 0x3f6   :  { %s915_s26 = scalar_lea.vmem %s754_s19, 64  ;;  %p920_p11 = scmp.lt.s32.totalorder %s754_s19, %s754_s19 }
 0x3f7   :  { %p916_p10 = scmp.ne.s32.totalorder %s754_s19, %s915_s26  ;;  %p921_p12 = scmp.lt.s32.totalorder %s915_s26, %s915_s26 }
 0x3f9   :  { %p922_p13 = por %p921_p12, %p920_p11 }
 0x3fb   :  { %p923_p0 = pnand %p922_p13, %p916_p10 }
 0x3fd   :  { %926 = shalt.err (!%p923_p0)
}
 0x3fe   :  { %756 = dma.vmem_to_hbm [thread:$0]  %s754_s19, 64, %s1198_s5, [#allocation5]  }
 0x3ff   :  { %935 = dma.done.wait [#allocation3], 64  }
 0x400   :  { %936 = vsyncadd [#allocation3], 4294967232 }
 0x401   :  { %937 = dma.done.wait [#allocation5], 128  }
 0x402   :  { %938 = vsyncadd [#allocation5], 4294967168 }
 0x403   :  { %766 = vsyncpa [#allocation3], 1 }
 0x404   :  { %767 = vsyncpa [#allocation5], 1 }

// kernel: rnn_encoder_forward.10
= control target key start
LH: loop header
LB: loop body
LE: loop exit
PB: predicated region body
PF: predicated region fallthrough
CT: control target
= control target key end

     0   :  { %vm70_vm0 = vcmask 261120   ;;  %v1333_v29 = vmov 0   ;;  %vm257_vm1 = vcmask 130048   ;;  %vm399_vm2 = vcmask 31744   ;;  %s1940_s4 = inlined_call_operand.vmem [shape: bf16[32,16], index: 4, kind: input, shape index: {}]   ;;  %s1941_s1 = inlined_call_operand.vmem [shape: f32[8,8,32], index: 1, kind: input, shape index: {}]   ;;  %s1942_s3 = inlined_call_operand.vmem [shape: bf16[32,16], index: 3, kind: input, shape index: {}]   ;;  %s1943_s0 = inlined_call_operand.vmem [shape: f32[8,8,32], index: 0, kind: input, shape index: {}]   ;;  %s1944_s5 = inlined_call_operand.vmem [shape: bf16[16,4], index: 5, kind: input, shape index: {}]   ;;  %s1945_s2 = inlined_call_operand.vmem [shape: f32[8,8,1], index: 2, kind: input, shape index: {}]   ;;  %s1946_s7 = inlined_call_operand.vmem [shape: f32[8,8,4], index: 7, kind: output, shape index: {1}]   ;;  %s1947_s6 = inlined_call_operand.vmem [shape: f32[8,4,64], index: 6, kind: output, shape index: {0}]  }
   0x1   :  { %v1294_v0 = vld [vmem:[%s1940_s4 + $0x8] sm:$0xff]   ;;  %v1295_v1 = vld [vmem:[%s1940_s4] sm:$0xff]   ;;  %v1398_v4 = vld [vmem:[%s1941_s1 + $0x30] sm:$0xff]  ;;  %1262 = vset.pattern.permute.xlu1 %v1333_v29  ;;  %1261 = vset.pattern.permute.xlu0 %v1333_v29  ;;  %vm1139_vm3 = vcmask 1040384   ;;  %vm1148_vm4 = vcmask 1041408   ;;  %vm1157_vm5 = vcmask 1042432  }
   0x2   :  { %1251 = vmatprep.subr.bf16.mxu1 %v1294_v0  ;;  %1217 = vmatprep.subr.bf16.mxu0 %v1294_v0  ;;  %v1388_v2 = vld [vmem:[%s1941_s1 + $0x20] sm:$0xff]  ;;  %v1393_v3 = vld [vmem:[%s1941_s1 + $0x28] sm:$0xff]  ;;  %v1405_v6 = vld [vmem:[%s1941_s1 + $0x38] sm:$0xff]  ;;  %vm1166_vm6 = vcmask 519168  }
   0x3   :  { %1253 = vmatpush3.bf16.msra.mxu1 %v1294_v0  ;;  %1218 = vmatpush3.bf16.msra.mxu0 %v1294_v0  ;;  %v52_v5 = vpack.c.bf16 %v1393_v3, %v1388_v2  ;;  %v1296_v7 = vld [vmem:[%s1942_s3 + $0x8] sm:$0xff]   ;;  %v1413_v8 = vld [vmem:[%s1941_s1] sm:$0xff]  ;;  %v1426_v11 = vld [vmem:[%s1941_s1 + $0x10] sm:$0xff]  ;;  %v53_v13 = vpack.c.bf16 %v1405_v6, %v1398_v4 }
   0x4   :  { %1252 = vmatprep.subr.bf16.mxu1 %v1295_v1  ;;  %1219 = vmatprep.subr.bf16.mxu0 %v1295_v1  ;;  %v1418_v9 = vld [vmem:[%s1941_s1 + $0x8] sm:$0xff]  ;;  %v1431_v12 = vld [vmem:[%s1941_s1 + $0x18] sm:$0xff]  ;;  %v1440_v15 = vld [vmem:[%s1943_s0] sm:$0xff] }
   0x5   :  { %1225 = vmatprep.mubr.msk.bf16.mxu1 %vm70_vm0, %v52_v5  ;;  %v50_v10 = vpack.c.bf16 %v1418_v9, %v1413_v8  ;;  %v51_v14 = vpack.c.bf16 %v1431_v12, %v1426_v11  ;;  %v1445_v16 = vld [vmem:[%s1943_s0 + $0x8] sm:$0xff]  ;;  %v1297_v17 = vld [vmem:[%s1942_s3] sm:$0xff]   ;;  %v1459_v19 = vld [vmem:[%s1943_s0 + $0x10] sm:$0xff] }
   0x6   :  { %v42_v18 = vpack.c.bf16 %v1445_v16, %v1440_v15  ;;  %v1464_v20 = vld [vmem:[%s1943_s0 + $0x18] sm:$0xff]  ;;  %v1469_v21 = vld [vmem:[%s1943_s0 + $0x20] sm:$0xff]  ;;  %v1474_v22 = vld [vmem:[%s1943_s0 + $0x28] sm:$0xff] }
   0x7   :  { %1254 = vmatpush3.bf16.msra.mxu1 %v1295_v1  ;;  %1220 = vmatpush3.bf16.msra.mxu0 %v1295_v1  ;;  %v43_v23 = vpack.c.bf16 %v1464_v20, %v1459_v19  ;;  %v44_v24 = vpack.c.bf16 %v1474_v22, %v1469_v21  ;;  %v1485_v25 = vld [vmem:[%s1943_s0 + $0x30] sm:$0xff]  ;;  %v1490_v26 = vld [vmem:[%s1943_s0 + $0x38] sm:$0xff]  ;;  %v1298_v28 = vld [vmem:[%s1944_s5] sm:$0xff]  }
   0x8   :  { %1229 = vmatprep.subr.bf16.mxu1 %v1296_v7  ;;  %1221 = vmatprep.mubr.msk.bf16.mxu0 %vm70_vm0, %v50_v10  ;;  %v45_v27 = vpack.c.bf16 %v1490_v26, %v1485_v25  ;;  %v337_v30 = vld [vmem:[%s1945_s2 + $0x10] sm:$0xff]  ;;  %v335_v31 = vld [vmem:[%s1945_s2] sm:$0xff]  ;;  %v338_v32 = vld [vmem:[%s1945_s2 + $0x18] sm:$0xff] }
   0x9   :  { %1241 = vmatprep.subr.bf16.mxu0 %v1298_v28  ;;  %v345_v33 = vmul.f32 10000.0, %v337_v30  ;;  %v343_v34 = vmul.f32 10000.0, %v335_v31  ;;  %v336_v35 = vld [vmem:[%s1945_s2 + $0x8] sm:$0xff]  ;;  %v346_v36 = vmul.f32 10000.0, %v338_v32  ;;  %v339_v39 = vld [vmem:[%s1945_s2 + $0x20] sm:$0xff]  ;;  %v342_v42 = vld [vmem:[%s1945_s2 + $0x38] sm:$0xff] }
   0xa   :  { %1226 = vmatmul.mubr.msk.bf16.vlgmr.msra.gmra.mxu1 %vm70_vm0, %v53_v13  ;;  %1222 = vmatmul.mubr.msk.bf16.vlgmr.msra.gmra.mxu0 %vm70_vm0, %v51_v14  ;;  %v344_v37 = vmul.f32 10000.0, %v336_v35  ;;  %v340_v38 = vld [vmem:[%s1945_s2 + $0x28] sm:$0xff]  ;;  %v347_v41 = vmul.f32 10000.0, %v339_v39  ;;  %v341_v43 = vld [vmem:[%s1945_s2 + $0x30] sm:$0xff]  ;;  %v350_v44 = vmul.f32 10000.0, %v342_v42  ;;  %v1334_v35 = vmov 1  }
   0xb   :  { %1230 = vmatpush3.bf16.msra.mxu1 %v1296_v7  ;;  %1233 = vmatprep.mubr.msk.bf16.mxu1 %vm70_vm0, %v42_v18  ;;  %v348_v40 = vmul.f32 10000.0, %v340_v38  ;;  %v349_v45 = vmul.f32 10000.0, %v341_v43 }
   0xc   :  { %1231 = vmatprep.subr.bf16.mxu1 %v1297_v17  ;;  %1242 = vmatpush3.bf16.msra.mxu0 %v1298_v28 }
   0xd   :  { %363 = vperm.xlu1 %1262, %v345_v33   ;;  %353 = vperm.xlu0 %1261, %v343_v34  }
   0xf   :  { %1232 = vmatpush3.bf16.msra.mxu1 %v1297_v17 }
  0x11   :  { %368 = vperm.xlu1 %1262, %v346_v36   ;;  %358 = vperm.xlu0 %1261, %v344_v37  }
  0x12   :  { %1234 = vmatmul.mubr.msk.bf16.vlgmr.msra.gmra.mxu1 %vm70_vm0, %v43_v23 }
  0x13   :  { %1237 = vmatprep.mubr.msk.bf16.mxu1 %vm70_vm0, %v44_v24 }
  0x15   :  { %378 = vperm.xlu1 %1262, %v348_v40   ;;  %373 = vperm.xlu0 %1261, %v347_v41  }
  0x19   :  { %388 = vperm.xlu1 %1262, %v350_v44   ;;  %383 = vperm.xlu0 %1261, %v349_v45  }
  0x1a   :  { %1238 = vmatmul.mubr.msk.bf16.gmra.mxu1 %vm70_vm0, %v45_v27 }
  0x1d   :  { %1264 = vset.pattern.permute.xlu1 %v1334_v35  ;;  %1263 = vset.pattern.permute.xlu0 %v1334_v35 }
  0x88   :  { %v354_v36 = vpop.permute.xlu0 %353  ;;  %v364_v37 = vpop.permute.xlu1 %363 }
  0x8c   :  { %v359_v38 = vpop.permute.xlu0 %358  ;;  %v369_v39 = vpop.permute.xlu1 %368 }
  0x90   :  { %v374_v42 = vpop.permute.xlu0 %373  ;;  %v379_v44 = vpop.permute.xlu1 %378 }
  0xca   :  { %v1227_v46 = vpop.f32.mrf.mxu1  ;;  %v1223_v48 = vpop.f32.mrf.mxu0 }
  0xcc   :  { %v133_v47 = vpop.f32.mrf.mxu1  ;;  %v117_v50 = vpop.f32.mrf.mxu0 }
  0xce   :  { %v1228_v49 = vpop.f32.mrf.mxu1  ;;  %v1224_v53 = vpop.f32.mrf.mxu0 }
  0xd0   :  { %v136_v51 = vpop.f32.mrf.mxu1  ;;  %v120_v59 = vpop.f32.mrf.mxu0 }
  0xd2   :  { %v1235_v52 = vpop.f32.mrf.mxu1 }
  0xd3   :  { %v215_v58 = vadd.f32 %v1235_v52, %v1223_v48  ;;  %v389_v52 = vpop.permute.xlu1 %388 }
  0xd4   :  { %v206_v54 = vpop.f32.mrf.mxu1 }
  0xd5   :  { %v207_v55 = vadd.f32 %v206_v54, %v117_v50 }
  0xd6   :  { %v1236_v56 = vpop.f32.mrf.mxu1 }
  0xd7   :  { %v218_v57 = vadd.f32 %v1236_v56, %v1224_v53  ;;  %1299 = vtanh.f32 %v207_v55 }
  0xd8   :  { %v209_v60 = vpop.f32.mrf.mxu1 }
  0xd9   :  { %v210_v61 = vadd.f32 %v209_v60, %v120_v59  ;;  %1301 = vtanh.f32 %v218_v57 }
  0xda   :  { %v1239_v62 = vpop.f32.mrf.mxu1 }
  0xdb   :  { %1303 = vtanh.f32 %v210_v61  ;;  %v231_v7 = vadd.f32 %v1239_v62, %v1227_v46 }
  0xdc   :  { %1305 = vtanh.f32 %v215_v58  ;;  %v222_v63 = vpop.f32.mrf.mxu1 }
  0xdd   :  { %v223_v0 = vadd.f32 %v222_v63, %v133_v47  ;;  %v384_v47 = vpop.permute.xlu0 %383 }
  0xde   :  { %v1240_v1 = vpop.f32.mrf.mxu1 }
  0xdf   :  { %v234_v5 = vadd.f32 %v1240_v1, %v1228_v49  ;;  %1307 = vtanh.f32 %v223_v0 }
  0xe0   :  { %v225_v10 = vpop.f32.mrf.mxu1 }
  0xe1   :  { %v226_v13 = vadd.f32 %v225_v10, %v136_v51  ;;  %1309 = vtanh.f32 %v234_v5 }
  0xe3   :  { %1311 = vtanh.f32 %v226_v13 }
  0xe4   :  { %1313 = vtanh.f32 %v231_v7  ;;  %v1300_v14 = vpop.eup %1299 }
  0xe6   :  { %v1302_v17 = vpop.eup %1301 }
  0xe8   :  { %v1304_v18 = vpop.eup %1303 }
  0xe9   :  { %v1306_v23 = vpop.eup %1305  ;;  %v245_v24 = vpack.c.bf16 %v1304_v18, %v1300_v14 }
  0xea   :  { %v246_v27 = vpack.c.bf16 %v1302_v17, %v1306_v23 }
  0xeb   :  { %1243 = vmatprep.mubr.msk.bf16.mxu0 %vm257_vm1, %v245_v24 }
  0xec   :  { %1244 = vmatmul.mubr.msk.bf16.vlgmr.msra.gmra.mxu0 %vm257_vm1, %v246_v27  ;;  %v1308_v28 = vpop.eup %1307 }
  0xee   :  { %v1310_v30 = vpop.eup %1309 }
  0xf0   :  { %v1312_v31 = vpop.eup %1311 }
  0xf1   :  { %v1314_v32 = vpop.eup %1313  ;;  %v247_v33 = vpack.c.bf16 %v1312_v31, %v1308_v28 }
  0xf2   :  { %v248_v34 = vpack.c.bf16 %v1310_v30, %v1314_v32 }
  0xf3   :  { %1247 = vmatprep.mubr.msk.bf16.mxu0 %vm257_vm1, %v247_v33 }
  0xf4   :  { %1248 = vmatmul.mubr.msk.bf16.gmra.mxu0 %vm257_vm1, %v248_v34 }
 0x1ac   :  { %v1245_v40 = vpop.f32.mrf.mxu0 }
 0x1ad   :  { %v393_v54 = vsub.f32 %v1245_v40, %v364_v37 }
 0x1ae   :  { %v304_v41 = vpop.f32.mrf.mxu0 }
 0x1af   :  { %v391_v55 = vsub.f32 %v304_v41, %v354_v36  ;;  %v402_v1 = vsel %vm399_vm2, %v393_v54, -inf }
 0x1b0   :  { %v1246_v43 = vpop.f32.mrf.mxu0 }
 0x1b1   :  { %v394_v48 = vsub.f32 %v1246_v43, %v369_v39  ;;  %v400_v5 = vsel %vm399_vm2, %v391_v55, -inf }
 0x1b2   :  { %v307_v45 = vpop.f32.mrf.mxu0 }
 0x1b3   :  { %v392_v56 = vsub.f32 %v307_v45, %v359_v38  ;;  %v403_v58 = vsel %vm399_vm2, %v394_v48, -inf }
 0x1b4   :  { %v1249_v46 = vpop.f32.mrf.mxu0 }
 0x1b5   :  { %v397_v50 = vsub.f32 %v1249_v46, %v384_v47  ;;  %v401_v7 = vsel %vm399_vm2, %v392_v56, -inf }
 0x1b6   :  { %v320_v49 = vpop.f32.mrf.mxu0 }
 0x1b7   :  { %v395_v51 = vsub.f32 %v320_v49, %v374_v42  ;;  %v408_v60 = vsel %vm399_vm2, %v397_v50, -inf }
 0x1b8   :  { %v1250_v53 = vpop.f32.mrf.mxu0  ;;  %v409_v13 = vmax.f32 %v402_v1, %v408_v60 }
 0x1b9   :  { %v398_v57 = vsub.f32 %v1250_v53, %v389_v52  ;;  %v404_v61 = vsel %vm399_vm2, %v395_v51, -inf }
 0x1ba   :  { %v323_v59 = vpop.f32.mrf.mxu0  ;;  %v405_v14 = vmax.f32 %v400_v5, %v404_v61 }
 0x1bb   :  { %v410_v62 = vsel %vm399_vm2, %v398_v57, -inf  ;;  %v396_v63 = vsub.f32 %v323_v59, %v379_v44 }
 0x1bc   :  { %v411_v0 = vmax.f32 %v403_v58, %v410_v62 }
 0x1bd   :  { %v406_v10 = vsel %vm399_vm2, %v396_v63, -inf }
 0x1be   :  { %v407_v17 = vmax.f32 %v401_v7, %v406_v10  ;;  %v413_v18 = vmax.f32 %v409_v13, %v411_v0 }
 0x1c0   :  { %v412_v23 = vmax.f32 %v405_v14, %v407_v17 }
 0x1c2   :  { %v414_v24 = vmax.f32 %v412_v23, %v413_v18 }
 0x1c4   :  { %v415_v27 = vsub.f32 %v391_v55, %v414_v24  ;;  %v416_v28 = vsub.f32 %v392_v56, %v414_v24  ;;  %v417_v30 = vsub.f32 %v393_v54, %v414_v24  ;;  %v418_v31 = vsub.f32 %v394_v48, %v414_v24 }
 0x1c5   :  { %v419_v32 = vsub.f32 %v395_v51, %v414_v24  ;;  %v420_v37 = vsub.f32 %v396_v63, %v414_v24  ;;  %v421_v39 = vsub.f32 %v397_v50, %v414_v24  ;;  %v422_v41 = vsub.f32 %v398_v57, %v414_v24 }
 0x1c6   :  { %v423_v33 = vmul.f32 1.442695, %v415_v27  ;;  %v425_v34 = vmul.f32 1.442695, %v416_v28  ;;  %v427_v36 = vmul.f32 1.442695, %v417_v30 }
 0x1c7   :  { %v429_v38 = vmul.f32 1.442695, %v418_v31  ;;  %v431_v40 = vmul.f32 1.442695, %v419_v32  ;;  %v433_v42 = vmul.f32 1.442695, %v420_v37 }
 0x1c8   :  { %1315 = vpow2.f32 %v423_v33  ;;  %v435_v43 = vmul.f32 1.442695, %v421_v39  ;;  %v437_v44 = vmul.f32 1.442695, %v422_v41  ;;  %v1335_v30 = vmov 2  }
 0x1c9   :  { %1317 = vpow2.f32 %v425_v34  ;;  %v1336_v31 = vmov 3  }
 0x1ca   :  { %1319 = vpow2.f32 %v427_v36 }
 0x1cb   :  { %1321 = vpow2.f32 %v429_v38 }
 0x1cc   :  { %1323 = vpow2.f32 %v431_v40 }
 0x1cd   :  { %1325 = vpow2.f32 %v433_v42 }
 0x1ce   :  { %1327 = vpow2.f32 %v435_v43 }
 0x1cf   :  { %1329 = vpow2.f32 %v437_v44 }
 0x1d5   :  { %v1316_v45 = vpop.eup %1315 }
 0x1d6   :  { %v1318_v46 = vpop.eup %1317  ;;  %v439_v47 = vsel %vm399_vm2, %v1316_v45, 0.0 }
 0x1d7   :  { %v1320_v48 = vpop.eup %1319  ;;  %v440_v49 = vsel %vm399_vm2, %v1318_v46, 0.0 }
 0x1d8   :  { %v1322_v50 = vpop.eup %1321  ;;  %v441_v51 = vadd.f32 %v440_v49, %v439_v47  ;;  %v442_v52 = vsel %vm399_vm2, %v1320_v48, 0.0 }
 0x1d9   :  { %v1324_v53 = vpop.eup %1323  ;;  %v444_v55 = vsel %vm399_vm2, %v1322_v50, 0.0 }
 0x1da   :  { %v443_v54 = vadd.f32 %v442_v52, %v441_v51  ;;  %v1326_v56 = vpop.eup %1325  ;;  %v446_v58 = vsel %vm399_vm2, %v1324_v53, 0.0 }
 0x1db   :  { %v1328_v59 = vpop.eup %1327  ;;  %v448_v61 = vsel %vm399_vm2, %v1326_v56, 0.0 }
 0x1dc   :  { %v445_v57 = vadd.f32 %v444_v55, %v443_v54  ;;  %v1330_v62 = vpop.eup %1329  ;;  %v450_v0 = vsel %vm399_vm2, %v1328_v59, 0.0 }
 0x1dd   :  { %v452_v5 = vsel %vm399_vm2, %v1330_v62, 0.0 }
 0x1de   :  { %v447_v60 = vadd.f32 %v446_v58, %v445_v57 }
 0x1e0   :  { %v449_v63 = vadd.f32 %v448_v61, %v447_v60 }
 0x1e2   :  { %v451_v1 = vadd.f32 %v450_v0, %v449_v63 }
 0x1e4   :  { %v453_v7 = vadd.f32 %v452_v5, %v451_v1 }
 0x1e6   :  { %1331 = vrcp.f32 %v453_v7 }
 0x1f3   :  { %v1332_v10 = vpop.eup %1331 }
 0x1f4   :  { %v456_v13 = vmul.f32 %v1332_v10, %v1318_v46  ;;  %v455_v14 = vmul.f32 %v1332_v10, %v1316_v45  ;;  %v457_v17 = vmul.f32 %v1332_v10, %v1320_v48  ;;  %v459_v18 = vmul.f32 %v1332_v10, %v1324_v53 }
 0x1f5   :  { %v458_v23 = vmul.f32 %v1332_v10, %v1322_v50  ;;  %v460_v24 = vmul.f32 %v1332_v10, %v1326_v56  ;;  %v1542_v27 = vmul.f32 %v1332_v10, %v1330_v62  ;;  %v1544_v28 = vmul.f32 %v1332_v10, %v1328_v59 }
 0x1f6   :  { %567 = vperm.xlu1 %1264, %v456_v13   ;;  %464 = vst.msk [vmem:[%s1946_s7 + $0x8] sm:$0xff] %vm399_vm2, %v456_v13  ;;  %563 = vperm.xlu0 %1263, %v455_v14   ;;  %463 = vst.msk [vmem:[%s1946_s7] sm:$0xff] %vm399_vm2, %v455_v14 }
 0x1f7   :  { %465 = vst.msk [vmem:[%s1946_s7 + $0x10] sm:$0xff] %vm399_vm2, %v457_v17  ;;  %467 = vst.msk [vmem:[%s1946_s7 + $0x20] sm:$0xff] %vm399_vm2, %v459_v18 }
 0x1f8   :  { %466 = vst.msk [vmem:[%s1946_s7 + $0x18] sm:$0xff] %vm399_vm2, %v458_v23  ;;  %468 = vst.msk [vmem:[%s1946_s7 + $0x28] sm:$0xff] %vm399_vm2, %v460_v24 }
 0x1f9   :  { %470 = vst.msk [vmem:[%s1946_s7 + $0x38] sm:$0xff] %vm399_vm2, %v1542_v27  ;;  %469 = vst.msk [vmem:[%s1946_s7 + $0x30] sm:$0xff] %vm399_vm2, %v1544_v28  ;;  %s1337_s7 = smov 32  }
 0x1fa   :  { %1265 = vset.pattern.permute.xlu1 %v1335_v30  ;;  %1266 = vset.pattern.permute.xlu0 %v1335_v30 }
 0x1fb   :  { %646 = vperm.xlu1 %1265, %v455_v14   ;;  %650 = vperm.xlu0 %1266, %v456_v13  }
 0x1ff   :  { %1267 = vset.pattern.permute.xlu1 %v1333_v29  ;;  %1268 = vset.pattern.permute.xlu0 %v1334_v35 }
 0x200   :  { %473 = vperm.xlu1 %1267, %v455_v14   ;;  %571 = vperm.xlu0 %1268, %v457_v17  }
 0x204   :  { %478 = vperm.xlu1 %1267, %v456_v13   ;;  %1270 = vset.pattern.permute.xlu0 %v1335_v30 }
 0x205   :  { %654 = vperm.xlu0 %1270, %v457_v17  }
 0x208   :  { %1269 = vset.pattern.permute.xlu1 %v1336_v31 }
 0x209   :  { %729 = vperm.xlu1 %1269, %v455_v14   ;;  %1273 = vset.pattern.permute.xlu0 %v1336_v31 }
 0x20a   :  { %737 = vperm.xlu0 %1273, %v457_v17  }
 0x20d   :  { %733 = vperm.xlu1 %1269, %v456_v13  }
 0x20e   :  { %1276 = vset.pattern.permute.xlu0 %v1334_v35 }
 0x20f   :  { %579 = vperm.xlu0 %1276, %v459_v18  }
 0x211   :  { %1271 = vset.pattern.permute.xlu1 %v1333_v29 }
 0x212   :  { %483 = vperm.xlu1 %1271, %v457_v17  }
 0x213   :  { %1279 = vset.pattern.permute.xlu0 %v1333_v29 }
 0x214   :  { %493 = vperm.xlu0 %1279, %v459_v18  }
 0x216   :  { %1272 = vset.pattern.permute.xlu1 %v1334_v35 }
 0x217   :  { %575 = vperm.xlu1 %1272, %v458_v23  }
 0x218   :  { %1282 = vset.pattern.permute.xlu0 %v1335_v30 }
 0x219   :  { %666 = vperm.xlu0 %1282, %v460_v24  }
 0x21b   :  { %1274 = vset.pattern.permute.xlu1 %v1335_v30 }
 0x21c   :  { %658 = vperm.xlu1 %1274, %v458_v23  }
 0x21d   :  { %1285 = vset.pattern.permute.xlu0 %v1336_v31 }
 0x21e   :  { %749 = vperm.xlu0 %1285, %v460_v24  }
 0x220   :  { %1275 = vset.pattern.permute.xlu1 %v1333_v29 }
 0x221   :  { %488 = vperm.xlu1 %1275, %v458_v23  }
 0x222   :  { %1288 = vset.pattern.permute.xlu0 %v1334_v35 }
 0x223   :  { %591 = vperm.xlu0 %1288, %v1542_v27  }
 0x225   :  { %1277 = vset.pattern.permute.xlu1 %v1336_v31 }
 0x226   :  { %741 = vperm.xlu1 %1277, %v458_v23  }
 0x227   :  { %1291 = vset.pattern.permute.xlu0 %v1333_v29 }
 0x228   :  { %508 = vperm.xlu0 %1291, %v1542_v27  }
 0x22a   :  { %1278 = vset.pattern.permute.xlu1 %v1335_v30 }
 0x22b   :  { %662 = vperm.xlu1 %1278, %v459_v18  }
 0x22c   :  { %1293 = vset.pattern.permute.xlu0 %v1336_v31 }
 0x22f   :  { %1280 = vset.pattern.permute.xlu1 %v1334_v35 }
 0x230   :  { %583 = vperm.xlu1 %1280, %v460_v24  }
 0x234   :  { %1281 = vset.pattern.permute.xlu1 %v1336_v31 }
 0x235   :  { %745 = vperm.xlu1 %1281, %v459_v18  }
 0x239   :  { %1283 = vset.pattern.permute.xlu1 %v1333_v29 }
 0x23a   :  { %498 = vperm.xlu1 %1283, %v460_v24  }
 0x23e   :  { %1284 = vset.pattern.permute.xlu1 %v1334_v35 }
 0x23f   :  { %587 = vperm.xlu1 %1284, %v1544_v28  }
 0x243   :  { %1286 = vset.pattern.permute.xlu1 %v1335_v30 }
 0x244   :  { %670 = vperm.xlu1 %1286, %v1544_v28  }
 0x248   :  { %1287 = vset.pattern.permute.xlu1 %v1333_v29 }
 0x249   :  { %503 = vperm.xlu1 %1287, %v1544_v28  }
 0x24d   :  { %1289 = vset.pattern.permute.xlu1 %v1336_v31 }
 0x24e   :  { %753 = vperm.xlu1 %1289, %v1544_v28  }
 0x252   :  { %1290 = vset.pattern.permute.xlu1 %v1335_v30 }
 0x253   :  { %674 = vperm.xlu1 %1290, %v1542_v27  }
 0x257   :  { %1292 = vset.pattern.permute.xlu1 %v1336_v31 }
 0x258   :  { %757 = vperm.xlu1 %1292, %v1542_v27  }
 0x271   :  { %v1601_v32 = vpop.permute.xlu1 %567  ;;  %v1603_v35 = vpop.permute.xlu0 %563 }
 0x272   :  { %v595_v33 = vmul.f32 %v1601_v32, %v1445_v16  ;;  %v594_v29 = vmul.f32 %v1603_v35, %v1440_v15 }
 0x274   :  { %v603_v34 = vsel %vm70_vm0, %v595_v33, 0.0  ;;  %v602_v36 = vsel %vm70_vm0, %v594_v29, 0.0 }
 0x275   :  { %v604_v37 = vadd.f32 %v603_v34, %v602_v36 }
 0x276   :  { %v1611_v38 = vpop.permute.xlu1 %646  ;;  %v1613_v39 = vpop.permute.xlu0 %650 }
 0x277   :  { %v677_v40 = vmul.f32 %v1611_v38, %v1440_v15  ;;  %v678_v41 = vmul.f32 %v1613_v39, %v1445_v16 }
 0x279   :  { %v685_v42 = vsel %vm70_vm0, %v677_v40, 0.0  ;;  %v686_v43 = vsel %vm70_vm0, %v678_v41, 0.0 }
 0x27a   :  { %v687_v44 = vadd.f32 %v686_v43, %v685_v42 }
 0x27b   :  { %v1621_v45 = vpop.permute.xlu1 %473  ;;  %v1623_v46 = vpop.permute.xlu0 %571 }
 0x27c   :  { %v596_v47 = vmul.f32 %v1623_v46, %v1459_v19  ;;  %v511_v48 = vmul.f32 %v1621_v45, %v1440_v15 }
 0x27e   :  { %v605_v49 = vsel %vm70_vm0, %v596_v47, 0.0  ;;  %v519_v55 = vsel %vm70_vm0, %v511_v48, 0.0 }
 0x27f   :  { %v606_v50 = vadd.f32 %v605_v49, %v604_v37  ;;  %v1630_v51 = vpop.permute.xlu1 %478 }
 0x280   :  { %v512_v52 = vmul.f32 %v1630_v51, %v1445_v16  ;;  %v1634_v53 = vpop.permute.xlu0 %654 }
 0x281   :  { %v679_v54 = vmul.f32 %v1634_v53, %v1459_v19 }
 0x282   :  { %v520_v56 = vsel %vm70_vm0, %v512_v52, 0.0 }
 0x283   :  { %v521_v57 = vadd.f32 %v520_v56, %v519_v55  ;;  %v688_v58 = vsel %vm70_vm0, %v679_v54, 0.0 }
 0x284   :  { %v689_v59 = vadd.f32 %v688_v58, %v687_v44  ;;  %v1641_v60 = vpop.permute.xlu1 %729 }
 0x285   :  { %v1643_v61 = vpop.permute.xlu0 %737  ;;  %v760_v62 = vmul.f32 %v1641_v60, %v1440_v15 }
 0x286   :  { %v762_v0 = vmul.f32 %v1643_v61, %v1459_v19 }
 0x287   :  { %v768_v5 = vsel %vm70_vm0, %v760_v62, 0.0 }
 0x288   :  { %v1647_v63 = vpop.permute.xlu1 %733  ;;  %v771_v13 = vsel %vm70_vm0, %v762_v0, 0.0 }
 0x289   :  { %v761_v1 = vmul.f32 %v1647_v63, %v1445_v16 }
 0x28a   :  { %v580_v18 = vpop.permute.xlu0 %579 }
 0x28b   :  { %v769_v7 = vsel %vm70_vm0, %v761_v1, 0.0  ;;  %v598_v16 = vmul.f32 %v580_v18, %v1469_v21  ;;  %v617_v1 = vmul.f32 %v1603_v35, %v1413_v8 }
 0x28c   :  { %v770_v10 = vadd.f32 %v769_v7, %v768_v5 }
 0x28d   :  { %v1656_v14 = vpop.permute.xlu1 %483  ;;  %v609_v33 = vsel %vm70_vm0, %v598_v16, 0.0 }
 0x28e   :  { %v513_v15 = vmul.f32 %v1656_v14, %v1459_v19  ;;  %v772_v17 = vadd.f32 %v771_v13, %v770_v10 }
 0x28f   :  { %v1669_v36 = vpop.permute.xlu0 %493 }
 0x290   :  { %v522_v23 = vsel %vm70_vm0, %v513_v15, 0.0  ;;  %v515_v42 = vmul.f32 %v1669_v36, %v1469_v21  ;;  %v619_v15 = vmul.f32 %v1623_v46, %v1426_v11 }
 0x291   :  { %v523_v24 = vadd.f32 %v522_v23, %v521_v57 }
 0x292   :  { %v576_v27 = vpop.permute.xlu1 %575  ;;  %v526_v48 = vsel %vm70_vm0, %v515_v42, 0.0  ;;  %v534_v42 = vmul.f32 %v1621_v45, %v1413_v8 }
 0x293   :  { %v597_v28 = vmul.f32 %v576_v27, %v1464_v20  ;;  %v620_v35 = vmul.f32 %v576_v27, %v1431_v12  ;;  %v535_v27 = vmul.f32 %v1630_v51, %v1418_v9 }
 0x294   :  { %v1681_v54 = vpop.permute.xlu0 %666 }
 0x295   :  { %v607_v30 = vsel %vm70_vm0, %v597_v28, 0.0  ;;  %v682_v58 = vmul.f32 %v1681_v54, %v1474_v22  ;;  %v543_v51 = vsel %vm70_vm0, %v535_v27, 0.0 }
 0x296   :  { %v608_v31 = vadd.f32 %v607_v30, %v606_v50  ;;  %v628_v30 = vsel %vm70_vm0, %v619_v15, 0.0 }
 0x297   :  { %v1665_v29 = vpop.permute.xlu1 %658  ;;  %v694_v5 = vsel %vm70_vm0, %v682_v58, 0.0 }
 0x298   :  { %v680_v19 = vmul.f32 %v1665_v29, %v1464_v20  ;;  %v610_v34 = vadd.f32 %v609_v33, %v608_v31 }
 0x29a   :  { %v690_v37 = vsel %vm70_vm0, %v680_v19, 0.0  ;;  %v630_v19 = vsel %vm70_vm0, %v620_v35, 0.0 }
 0x29b   :  { %v691_v40 = vadd.f32 %v690_v37, %v689_v59 }
 0x29c   :  { %v489_v41 = vpop.permute.xlu1 %488 }
 0x29d   :  { %v514_v43 = vmul.f32 %v489_v41, %v1464_v20 }
 0x29f   :  { %v524_v44 = vsel %vm70_vm0, %v514_v43, 0.0  ;;  %v621_v43 = vmul.f32 %v580_v18, %v1388_v2 }
 0x2a0   :  { %v525_v47 = vadd.f32 %v524_v44, %v523_v24 }
 0x2a1   :  { %v1677_v49 = vpop.permute.xlu1 %741  ;;  %v632_v18 = vsel %vm70_vm0, %v621_v43, 0.0 }
 0x2a2   :  { %v763_v50 = vmul.f32 %v1677_v49, %v1464_v20  ;;  %v527_v52 = vadd.f32 %v526_v48, %v525_v47  ;;  %v618_v20 = vmul.f32 %v1601_v32, %v1418_v9  ;;  %v625_v32 = vsel %vm70_vm0, %v617_v1, 0.0 }
 0x2a3   :  { %v536_v48 = vmul.f32 %v1656_v14, %v1426_v11 }
 0x2a4   :  { %v773_v55 = vsel %vm70_vm0, %v763_v50, 0.0  ;;  %v626_v24 = vsel %vm70_vm0, %v618_v20, 0.0  ;;  %v542_v20 = vsel %vm70_vm0, %v534_v42, 0.0 }
 0x2a5   :  { %v774_v56 = vadd.f32 %v773_v55, %v772_v17  ;;  %v1701_v17 = vpop.permute.xlu0 %749  ;;  %v627_v33 = vadd.f32 %v626_v24, %v625_v32  ;;  %v545_v14 = vsel %vm70_vm0, %v536_v48, 0.0  ;;  %v702_v32 = vmul.f32 %v1634_v53, %v1426_v11 }
 0x2a6   :  { %v1684_v57 = vpop.permute.xlu1 %662  ;;  %v765_v31 = vmul.f32 %v1701_v17, %v1474_v22 }
 0x2a7   :  { %v681_v59 = vmul.f32 %v1684_v57, %v1469_v21 }
 0x2a8   :  { %v777_v44 = vsel %vm70_vm0, %v765_v31, 0.0 }
 0x2a9   :  { %v692_v62 = vsel %vm70_vm0, %v681_v59, 0.0  ;;  %v537_v59 = vmul.f32 %v489_v41, %v1431_v12  ;;  %v700_v41 = vmul.f32 %v1611_v38, %v1413_v8 }
 0x2aa   :  { %v693_v0 = vadd.f32 %v692_v62, %v691_v40  ;;  %v629_v40 = vadd.f32 %v628_v30, %v627_v33 }
 0x2ab   :  { %v584_v7 = vpop.permute.xlu1 %583  ;;  %v547_v35 = vsel %vm70_vm0, %v537_v59, 0.0 }
 0x2ac   :  { %v599_v10 = vmul.f32 %v584_v7, %v1474_v22  ;;  %v1697_v13 = vadd.f32 %v694_v5, %v693_v0  ;;  %v622_v47 = vmul.f32 %v584_v7, %v1393_v3  ;;  %v631_v50 = vadd.f32 %v630_v19, %v629_v40 }
 0x2ae   :  { %v611_v23 = vsel %vm70_vm0, %v599_v10, 0.0  ;;  %v634_v62 = vsel %vm70_vm0, %v622_v47, 0.0  ;;  %v633_v1 = vadd.f32 %v632_v18, %v631_v50  ;;  %v783_v47 = vmul.f32 %v1641_v60, %v1413_v8 }
 0x2af   :  { %v612_v16 = vadd.f32 %v611_v23, %v610_v34  ;;  %v544_v23 = vadd.f32 %v543_v51, %v542_v20  ;;  %v785_v8 = vmul.f32 %v1643_v61, %v1426_v11 }
 0x2b0   :  { %v1707_v28 = vpop.permute.xlu1 %745  ;;  %v635_v24 = vadd.f32 %v634_v62, %v633_v1  ;;  %v786_v1 = vmul.f32 %v1677_v49, %v1431_v12 }
 0x2b1   :  { %v764_v46 = vmul.f32 %v1707_v28, %v1469_v21  ;;  %v546_v33 = vadd.f32 %v545_v14, %v544_v23  ;;  %v794_v23 = vsel %vm70_vm0, %v785_v8, 0.0 }
 0x2b3   :  { %v775_v37 = vsel %vm70_vm0, %v764_v46, 0.0  ;;  %v784_v46 = vmul.f32 %v1647_v63, %v1418_v9 }
 0x2b4   :  { %v776_v34 = vadd.f32 %v775_v37, %v774_v56  ;;  %v592_v56 = vpop.permute.xlu0 %591 }
 0x2b5   :  { %v499_v21 = vpop.permute.xlu1 %498  ;;  %v601_v5 = vmul.f32 %v592_v56, %v1490_v26  ;;  %v624_v7 = vmul.f32 %v592_v56, %v1405_v6  ;;  %v792_v60 = vsel %vm70_vm0, %v784_v46, 0.0 }
 0x2b6   :  { %v516_v55 = vmul.f32 %v499_v21, %v1474_v22  ;;  %v1726_v58 = vadd.f32 %v777_v44, %v776_v34  ;;  %v539_v53 = vmul.f32 %v499_v21, %v1393_v3  ;;  %v548_v34 = vadd.f32 %v547_v35, %v546_v33 }
 0x2b7   :  { %v615_v37 = vsel %vm70_vm0, %v601_v5, 0.0  ;;  %v638_v40 = vsel %vm70_vm0, %v624_v7, 0.0  ;;  %v796_v35 = vsel %vm70_vm0, %v786_v1, 0.0 }
 0x2b8   :  { %v528_v45 = vsel %vm70_vm0, %v516_v55, 0.0  ;;  %v1765_v21 = vpop.permute.xlu0 %508  ;;  %v704_v55 = vmul.f32 %v1684_v57, %v1388_v2  ;;  %v551_v51 = vsel %vm70_vm0, %v539_v53, 0.0 }
 0x2b9   :  { %v529_v0 = vadd.f32 %v528_v45, %v527_v52  ;;  %v701_v52 = vmul.f32 %v1613_v39, %v1418_v9  ;;  %v538_v39 = vmul.f32 %v1669_v36, %v1388_v2  ;;  %v708_v9 = vsel %vm70_vm0, %v700_v41, 0.0 }
 0x2ba   :  { %v588_v22 = vpop.permute.xlu1 %587  ;;  %v703_v36 = vmul.f32 %v1665_v29, %v1431_v12  ;;  %v541_v62 = vmul.f32 %v1765_v21, %v1405_v6 }
 0x2bb   :  { %v600_v10 = vmul.f32 %v588_v22, %v1485_v25  ;;  %v623_v15 = vmul.f32 %v588_v22, %v1398_v4  ;;  %v709_v63 = vsel %vm70_vm0, %v701_v52, 0.0  ;;  %v549_v50 = vsel %vm70_vm0, %v538_v39, 0.0 }
 0x2bc   :  { %v710_v56 = vadd.f32 %v709_v63, %v708_v9  ;;  %v550_v45 = vadd.f32 %v549_v50, %v548_v34  ;;  %v713_v59 = vsel %vm70_vm0, %v703_v36, 0.0  ;;  %v715_v22 = vsel %vm70_vm0, %v704_v55, 0.0 }
 0x2bd   :  { %v613_v30 = vsel %vm70_vm0, %v600_v10, 0.0  ;;  %v636_v31 = vsel %vm70_vm0, %v623_v15, 0.0  ;;  %v787_v15 = vmul.f32 %v1707_v28, %v1388_v2  ;;  %v555_v12 = vsel %vm70_vm0, %v541_v62, 0.0 }
 0x2be   :  { %v614_v19 = vadd.f32 %v613_v30, %v612_v16  ;;  %v637_v38 = vadd.f32 %v636_v31, %v635_v24  ;;  %v711_v16 = vsel %vm70_vm0, %v702_v32, 0.0  ;;  %v552_v11 = vadd.f32 %v551_v51, %v550_v45 }
 0x2bf   :  { %v671_v27 = vpop.permute.xlu1 %670  ;;  %v712_v14 = vadd.f32 %v711_v16, %v710_v56  ;;  %v705_v24 = vmul.f32 %v1681_v54, %v1393_v3  ;;  %v798_v2 = vsel %vm70_vm0, %v787_v15, 0.0  ;;  %v788_v39 = vmul.f32 %v1701_v17, %v1393_v3 }
 0x2c0   :  { %v683_v42 = vmul.f32 %v671_v27, %v1485_v25  ;;  %v639_v43 = vadd.f32 %v638_v40, %v637_v38  ;;  %v1756_v44 = vadd.f32 %v615_v37, %v614_v19  ;;  %v706_v49 = vmul.f32 %v671_v27, %v1398_v4 }
 0x2c1   :  { %v714_v10 = vadd.f32 %v713_v59, %v712_v14  ;;  %v717_v54 = vsel %vm70_vm0, %v705_v24, 0.0  ;;  %v1338_v55 = vmov 1966171168   ;;  %v816_v56 = vlaneseq }
 0x2c2   :  { %v696_v48 = vsel %vm70_vm0, %v683_v42, 0.0  ;;  %641 = vrot.lane.b32.xlu1 %v639_v43, %s1337_s7  ;;  %v719_v19 = vsel %vm70_vm0, %v706_v49, 0.0  ;;  %v814_v51 = vunpack.c.l.s4 %v1338_v55  ;;  %v518_v62 = vmul.f32 %v1765_v21, %v1490_v26 }
 0x2c3   :  { %v697_v29 = vadd.f32 %v696_v48, %v1697_v13  ;;  %v791_v13 = vsel %vm70_vm0, %v783_v47, 0.0  ;;  %v716_v30 = vadd.f32 %v715_v22, %v714_v10 }
 0x2c4   :  { %v504_v18 = vpop.permute.xlu1 %503  ;;  %v793_v61 = vadd.f32 %v792_v60, %v791_v13  ;;  %v815_v8 = vunpack.c.0.s8 %v814_v51  ;;  %v817_v60 = vshrl.u32 %v816_v56, 7  ;;  %v532_v1 = vsel %vm70_vm0, %v518_v62, 0.0 }
 0x2c5   :  { %v517_v20 = vmul.f32 %v504_v18, %v1485_v25  ;;  %v540_v57 = vmul.f32 %v504_v18, %v1398_v4 }
 0x2c6   :  { %v795_v33 = vadd.f32 %v794_v23, %v793_v61 }
 0x2c7   :  { %v530_v5 = vsel %vm70_vm0, %v517_v20, 0.0  ;;  %v553_v7 = vsel %vm70_vm0, %v540_v57, 0.0 }
 0x2c8   :  { %v531_v41 = vadd.f32 %v530_v5, %v529_v0  ;;  %v554_v52 = vadd.f32 %v553_v7, %v552_v11  ;;  %v797_v0 = vadd.f32 %v796_v35, %v795_v33  ;;  %v1833_v5 = vsub.s32 0, %v817_v60 }
 0x2c9   :  { %v754_v32 = vpop.permute.xlu1 %753 }
 0x2ca   :  { %v766_v31 = vmul.f32 %v754_v32, %v1485_v25  ;;  %v556_v46 = vadd.f32 %v555_v12, %v554_v52  ;;  %v718_v25 = vadd.f32 %v717_v54, %v716_v30  ;;  %v789_v37 = vmul.f32 %v754_v32, %v1398_v4 }
 0x2cb   :  { %v799_v53 = vadd.f32 %v798_v2, %v797_v0  ;;  %v533_v22 = vadd.f32 %v532_v1, %v531_v41 }
 0x2cc   :  { %v779_v28 = vsel %vm70_vm0, %v766_v31, 0.0  ;;  %558 = vrot.lane.b32.xlu1 %v556_v46, %s1337_s7  ;;  %v720_v42 = vadd.f32 %v719_v19, %v718_v25  ;;  %v802_v63 = vsel %vm70_vm0, %v789_v37, 0.0 }
 0x2cd   :  { %v1803_v38 = vadd.f32 %v779_v28, %v1726_v58  ;;  %v800_v58 = vsel %vm70_vm0, %v788_v39, 0.0 }
 0x2ce   :  { %v675_v40 = vpop.permute.xlu1 %674  ;;  %v801_v17 = vadd.f32 %v800_v58, %v799_v53 }
 0x2cf   :  { %v684_v27 = vmul.f32 %v675_v40, %v1490_v26  ;;  %v707_v34 = vmul.f32 %v675_v40, %v1405_v6 }
 0x2d0   :  { %v803_v47 = vadd.f32 %v802_v63, %v801_v17 }
 0x2d1   :  { %v698_v43 = vsel %vm70_vm0, %v684_v27, 0.0  ;;  %v721_v9 = vsel %vm70_vm0, %v707_v34, 0.0 }
 0x2d2   :  { %v1814_v36 = vadd.f32 %v698_v43, %v697_v29  ;;  %v722_v3 = vadd.f32 %v721_v9, %v720_v42  ;;  %v1820_v29 = vsub.s32 %v815_v8, %v817_v60 }
 0x2d3   :  { %v758_v4 = vpop.permute.xlu1 %757 }
 0x2d4   :  { %v790_v16 = vmul.f32 %v758_v4, %v1405_v6  ;;  %724 = vrot.lane.b32.xlu0 %v722_v3, %s1337_s7  ;;  %v767_v11 = vmul.f32 %v758_v4, %v1490_v26 }
 0x2d6   :  { %v804_v48 = vsel %vm70_vm0, %v790_v16, 0.0  ;;  %v781_v24 = vsel %vm70_vm0, %v767_v11, 0.0 }
 0x2d7   :  { %v805_v50 = vadd.f32 %v804_v48, %v803_v47 }
 0x2d9   :  { %807 = vrot.lane.b32.xlu0 %v805_v50, %s1337_s7  ;;  %v782_v50 = vadd.f32 %v781_v24, %v1803_v38 }
 0x334   :  { %v642_v45 = vpop.permute.xlu1 %641 }
 0x335   :  { %v644_v18 = vsel %vm70_vm0, %v1756_v44, %v642_v45 }
 0x336   :  { %v870_v6 = vcombine.high %v644_v18, %v644_v18  ;;  %v877_v59 = vrot.slane %v644_v18, %v1820_v29 }
 0x338   :  { %v884_v20 = vrot.slane %v870_v6, %v1820_v29  ;;  %v885_v57 = vcombine.high %v877_v59, %v877_v59  ;;  %v893_v13 = vrot.slane %v877_v59, %v1820_v29 }
 0x33a   :  { %v886_v14 = vcombine.high %v884_v20, %v884_v20  ;;  %v900_v61 = vrot.slane %v884_v20, %v1820_v29  ;;  %v907_v44 = vrot.slane %v885_v57, %v1820_v29  ;;  %v915_v10 = vcombine.high %v893_v13, %v893_v13 }
 0x33b   :  { %v1022_v49 = vrot.slane %v893_v13, %v1833_v5 }
 0x33c   :  { %v914_v21 = vrot.slane %v886_v14, %v1820_v29  ;;  %v916_v12 = vcombine.high %v900_v61, %v900_v61  ;;  %v917_v26 = vcombine.high %v907_v44, %v907_v44  ;;  %v1026_v31 = vrot.slane %v907_v44, %v1833_v5 }
 0x33d   :  { %v1030_v46 = vrot.slane %v915_v10, %v1833_v5  ;;  %v1038_v33 = vrot.slane %v900_v61, %v1833_v5 }
 0x33e   :  { %v559_v7 = vpop.permute.xlu1 %558  ;;  %v918_v30 = vcombine.high %v914_v21, %v914_v21  ;;  %v1034_v19 = vrot.slane %v917_v26, %v1833_v5  ;;  %v1042_v39 = vrot.slane %v914_v21, %v1833_v5  ;;  %v1046_v25 = vrot.slane %v916_v12, %v1833_v5 }
 0x33f   :  { %v561_v15 = vsel %vm70_vm0, %v533_v22, %v559_v7 }
 0x340   :  { %v812_v52 = vcombine.high %v561_v15, %v561_v15  ;;  %v819_v23 = vrot.slane %v561_v15, %v1820_v29  ;;  %v1050_v43 = vrot.slane %v918_v30, %v1833_v5 }
 0x342   :  { %v826_v41 = vrot.slane %v812_v52, %v1820_v29  ;;  %v827_v32 = vcombine.high %v819_v23, %v819_v23  ;;  %v835_v35 = vrot.slane %v819_v23, %v1820_v29 }
 0x344   :  { %v828_v2 = vcombine.high %v826_v41, %v826_v41  ;;  %v842_v28 = vrot.slane %v826_v41, %v1820_v29  ;;  %v849_v54 = vrot.slane %v827_v32, %v1820_v29  ;;  %v857_v0 = vcombine.high %v835_v35, %v835_v35 }
 0x345   :  { %v1140_v37 = vsel %vm1139_vm3, %v835_v35, %v1022_v49 }
 0x346   :  { %v856_v40 = vrot.slane %v828_v2, %v1820_v29  ;;  %v858_v53 = vcombine.high %v842_v28, %v842_v28  ;;  %v859_v27 = vcombine.high %v849_v54, %v849_v54  ;;  %v1141_v34 = vsel %vm1139_vm3, %v849_v54, %v1026_v31  ;;  %v725_v42 = vpop.permute.xlu0 %724 }
 0x347   :  { %v1142_v9 = vsel %vm1139_vm3, %v857_v0, %v1030_v46  ;;  %v1144_v58 = vsel %vm1139_vm3, %v842_v28, %v1038_v33  ;;  %v727_v63 = vsel %vm70_vm0, %v1814_v36, %v725_v42 }
 0x348   :  { %v860_v3 = vcombine.high %v856_v40, %v856_v40  ;;  %v1143_v17 = vsel %vm1139_vm3, %v859_v27, %v1034_v19  ;;  %v1145_v4 = vsel %vm1139_vm3, %v856_v40, %v1042_v39  ;;  %v1146_v16 = vsel %vm1139_vm3, %v858_v53, %v1046_v25 }
 0x349   :  { %v920_v47 = vcombine.high %v727_v63, %v727_v63  ;;  %v927_v48 = vrot.slane %v727_v63, %v1820_v29 }
 0x34a   :  { %v1147_v55 = vsel %vm1139_vm3, %v860_v3, %v1050_v43 }
 0x34b   :  { %v934_v51 = vrot.slane %v920_v47, %v1820_v29  ;;  %v935_v56 = vcombine.high %v927_v48, %v927_v48  ;;  %v943_v8 = vrot.slane %v927_v48, %v1820_v29  ;;  %v808_v36 = vpop.permute.xlu0 %807 }
 0x34c   :  { %v810_v60 = vsel %vm70_vm0, %v782_v50, %v808_v36 }
 0x34d   :  { %v936_v45 = vcombine.high %v934_v51, %v934_v51  ;;  %v950_v18 = vrot.slane %v934_v51, %v1820_v29  ;;  %v957_v6 = vrot.slane %v935_v56, %v1820_v29  ;;  %v965_v59 = vcombine.high %v943_v8, %v943_v8 }
 0x34e   :  { %v1062_v62 = vrot.slane %v943_v8, %v1833_v5  ;;  %v970_v38 = vcombine.high %v810_v60, %v810_v60  ;;  %v977_v20 = vrot.slane %v810_v60, %v1820_v29 }
 0x34f   :  { %v964_v57 = vrot.slane %v936_v45, %v1820_v29  ;;  %v966_v14 = vcombine.high %v950_v18, %v950_v18  ;;  %v967_v13 = vcombine.high %v957_v6, %v957_v6  ;;  %v1066_v1 = vrot.slane %v957_v6, %v1833_v5 }
 0x350   :  { %v1070_v11 = vrot.slane %v965_v59, %v1833_v5  ;;  %v1078_v61 = vrot.slane %v950_v18, %v1833_v5  ;;  %v1149_v44 = vsel %vm1148_vm4, %v1140_v37, %v1062_v62  ;;  %v984_v22 = vrot.slane %v970_v38, %v1820_v29 }
 0x351   :  { %v968_v7 = vcombine.high %v964_v57, %v964_v57  ;;  %v1074_v21 = vrot.slane %v967_v13, %v1833_v5  ;;  %v1082_v10 = vrot.slane %v964_v57, %v1833_v5  ;;  %v1086_v15 = vrot.slane %v966_v14, %v1833_v5 }
 0x352   :  { %v1150_v52 = vsel %vm1148_vm4, %v1141_v34, %v1066_v1  ;;  %v1151_v23 = vsel %vm1148_vm4, %v1142_v9, %v1070_v11  ;;  %v1153_v24 = vsel %vm1148_vm4, %v1144_v58, %v1078_v61  ;;  %v985_v12 = vcombine.high %v977_v20, %v977_v20 }
 0x353   :  { %v1090_v26 = vrot.slane %v968_v7, %v1833_v5  ;;  %v1152_v49 = vsel %vm1148_vm4, %v1143_v17, %v1074_v21  ;;  %v1154_v41 = vsel %vm1148_vm4, %v1145_v4, %v1082_v10  ;;  %v1155_v32 = vsel %vm1148_vm4, %v1146_v16, %v1086_v15 }
 0x354   :  { %v986_v35 = vcombine.high %v984_v22, %v984_v22  ;;  %v993_v30 = vrot.slane %v977_v20, %v1820_v29  ;;  %v1000_v31 = vrot.slane %v984_v22, %v1820_v29  ;;  %v1007_v46 = vrot.slane %v985_v12, %v1820_v29 }
 0x355   :  { %v1156_v33 = vsel %vm1148_vm4, %v1147_v55, %v1090_v26 }
 0x356   :  { %v1014_v2 = vrot.slane %v986_v35, %v1820_v29  ;;  %v1015_v28 = vcombine.high %v993_v30, %v993_v30  ;;  %v1016_v54 = vcombine.high %v1000_v31, %v1000_v31  ;;  %v1017_v0 = vcombine.high %v1007_v46, %v1007_v46 }
 0x357   :  { %v1102_v19 = vrot.slane %v993_v30, %v1833_v5  ;;  %v1106_v39 = vrot.slane %v1007_v46, %v1833_v5  ;;  %v1118_v25 = vrot.slane %v1000_v31, %v1833_v5 }
 0x358   :  { %v1018_v37 = vcombine.high %v1014_v2, %v1014_v2  ;;  %v1110_v40 = vrot.slane %v1015_v28, %v1833_v5  ;;  %v1114_v53 = vrot.slane %v1017_v0, %v1833_v5  ;;  %v1122_v27 = vrot.slane %v1014_v2, %v1833_v5 }
 0x359   :  { %v1126_v34 = vrot.slane %v1016_v54, %v1833_v5  ;;  %v1158_v29 = vsel %vm1157_vm5, %v1149_v44, %v1102_v19  ;;  %v1159_v42 = vsel %vm1157_vm5, %v1150_v52, %v1106_v39  ;;  %v1162_v43 = vsel %vm1157_vm5, %v1153_v24, %v1118_v25 }
 0x35a   :  { %v1130_v9 = vrot.slane %v1018_v37, %v1833_v5  ;;  %v1160_v58 = vsel %vm1157_vm5, %v1151_v23, %v1110_v40  ;;  %v1161_v63 = vsel %vm1157_vm5, %v1152_v49, %v1114_v53  ;;  %v1163_v3 = vsel %vm1157_vm5, %v1154_v41, %v1122_v27  ;;  %1167 = vst.msk [vmem:[%s1947_s6] sm:$0xf] %vm1166_vm6, %v1158_v29 }
 0x35b   :  { %1168 = vst.msk [vmem:[%s1947_s6 + $0x4] sm:$0xf] %vm1166_vm6, %v1159_v42  ;;  %1171 = vst.msk [vmem:[%s1947_s6 + $0x10] sm:$0xf] %vm1166_vm6, %v1162_v43  ;;  %v1164_v5 = vsel %vm1157_vm5, %v1155_v32, %v1126_v34 }
 0x35c   :  { %1169 = vst.msk [vmem:[%s1947_s6 + $0x8] sm:$0xf] %vm1166_vm6, %v1160_v58  ;;  %1170 = vst.msk [vmem:[%s1947_s6 + $0xc] sm:$0xf] %vm1166_vm6, %v1161_v63  ;;  %v1165_v17 = vsel %vm1157_vm5, %v1156_v33, %v1130_v9 }
 0x35d   :  { %1172 = vst.msk [vmem:[%s1947_s6 + $0x14] sm:$0xf] %vm1166_vm6, %v1163_v3  ;;  %1173 = vst.msk [vmem:[%s1947_s6 + $0x18] sm:$0xf] %vm1166_vm6, %v1164_v5 }
 0x35e   :  { %1174 = vst.msk [vmem:[%s1947_s6 + $0x1c] sm:$0xf] %vm1166_vm6, %v1165_v17 }

</bundles_post_ra>
